<compile_context>
chip_gen: v7x
topology: tpu7x:2x2x1
jax: 0.10.0
libtpu: 0.0.40
codegen_flags: <defaults>
</compile_context>

<pallas_src>
import jax
import jax.numpy as jnp
from jax.experimental import pallas as pl
from jax.experimental.pallas import tpu as pltpu


def _lora_qkv_kernel(x_ref, wqkv_ref, bqkv_ref, a_ref, b_ref, out_ref):
    """One (tm, C) row-tile of tokens: fused qkv projection + LoRA q/v delta."""
    C = x_ref.shape[-1]

    # Cast the f32 activation tile to the compute dtype *inside* the kernel
    # (avoids a separate XLA cast/pad pass over x in HBM).
    x = x_ref[...].astype(wqkv_ref.dtype)                           # (tm, C) bf16

    # Base qkv projection on the MXU, f32 accumulation, bias folded in.
    qkv = jnp.dot(x, wqkv_ref[...],
                  preferred_element_type=jnp.float32)               # (tm, 3C) f32
    qkv = qkv + bqkv_ref[...]

    # Fused LoRA: x @ [A_q^T | A_v^T]  ->  (tm, 2r)
    xa = jnp.dot(x, a_ref[...], preferred_element_type=jnp.float32)
    # (tm, 2r) @ block-sparse (2r, 2C): columns [:C] = new_q, [C:] = new_v.
    delta = jnp.dot(xa.astype(b_ref.dtype), b_ref[...],
                    preferred_element_type=jnp.float32)             # (tm, 2C) f32

    # Add deltas at static, 128-aligned slices, then a single lane-dense store.
    q = qkv[:, :C] + delta[:, :C]
    k = qkv[:, C:2 * C]
    v = qkv[:, 2 * C:] + delta[:, C:]
    out_ref[...] = jnp.concatenate([q, k, v], axis=-1).astype(out_ref.dtype)


def pack_lora_qkv_weights(w_qkv, b_qkv, w_a_q, w_b_q, w_a_v, w_b_v,
                          compute_dtype=jnp.bfloat16):
    """One-time weight packing (hoist out of the per-call path; cache result).

    Inputs are in PyTorch nn.Linear layout (out_features, in_features).
    Returns (wqkv_t, bqkv, a_cat, b_cat).
    """
    C = w_qkv.shape[1]
    r = w_a_q.shape[0]

    wqkv_t = jnp.asarray(w_qkv).T.astype(compute_dtype)              # (C, 3C)
    bqkv = jnp.asarray(b_qkv).reshape(1, 3 * C).astype(jnp.float32)  # (1, 3C) f32
    a_cat = jnp.concatenate(
        [jnp.asarray(w_a_q).T, jnp.asarray(w_a_v).T], axis=1
    ).astype(compute_dtype)                                          # (C, 2r)
    # Block-sparse LoRA-B with the all-zero "k" third dropped: (2r, 2C).
    b_cat = jnp.zeros((2 * r, 2 * C), compute_dtype)
    b_cat = b_cat.at[:r, :C].set(jnp.asarray(w_b_q).T.astype(compute_dtype))  # q
    b_cat = b_cat.at[r:, C:].set(jnp.asarray(w_b_v).T.astype(compute_dtype))  # v
    return wqkv_t, bqkv, a_cat, b_cat


def _vmem_limit_bytes(tm, C, r2, x_bytes, compute_bytes, out_bytes):
    """Size the scoped-VMEM budget from the actual buffers (+slack), cap 48 MiB."""
    weights = (C * 3 * C) * compute_bytes      # W_qkv^T (single-buffered)
    weights += 3 * C * 4                       # bias f32
    weights += C * r2 * compute_bytes          # A_cat
    weights += r2 * 2 * C * compute_bytes      # B_cat
    x_tiles = 2 * tm * C * x_bytes             # double-buffered x tile
    out_tiles = 2 * tm * 3 * C * out_bytes     # double-buffered out tile
    interm = tm * 3 * C * 4 + tm * 2 * C * 4 + tm * r2 * 4   # f32 intermediates
    need = weights + x_tiles + out_tiles + interm
    return int(min(48 * 1024 * 1024, int(need * 1.5) + (2 << 20)))


def lora_qkv_packed(x, wqkv_t, bqkv, a_cat, b_cat, *,
                    tm=512, out_dtype=jnp.bfloat16):
    """x: (B, H, W, C) f32/bf16.  Packed weights from pack_lora_qkv_weights()."""
    B, H, W, C = x.shape
    M = B * H * W
    r2 = a_cat.shape[1]

    # Clamp tm (kept a multiple of 8); Pallas masks the ragged last row tile.
    tm = max(8, min(tm, ((M + 7) // 8) * 8))
    grid_m = pl.cdiv(M, tm)

    x2 = x.reshape(M, C)   # metadata-only reshape; no cast, no pad

    vmem_limit = _vmem_limit_bytes(
        tm, C, r2,
        x_bytes=jnp.dtype(x.dtype).itemsize,
        compute_bytes=jnp.dtype(wqkv_t.dtype).itemsize,
        out_bytes=jnp.dtype(out_dtype).itemsize,
    )

    out = pl.pallas_call(
        _lora_qkv_kernel,
        out_shape=jax.ShapeDtypeStruct((M, 3 * C), out_dtype),
        grid_spec=pltpu.PrefetchScalarGridSpec(
            num_scalar_prefetch=0,
            grid=(grid_m,),
            in_specs=[
                # Activation row tile: double-buffered (default).
                pl.BlockSpec((tm, C), lambda i: (i, 0)),
                # Grid-invariant operands: VMEM-resident, single-buffered.
                pl.BlockSpec((C, 3 * C), lambda i: (0, 0),
                             pipeline_mode=pl.Buffered(1)),
                pl.BlockSpec((1, 3 * C), lambda i: (0, 0),
                             pipeline_mode=pl.Buffered(1)),
                pl.BlockSpec((C, r2), lambda i: (0, 0),
                             pipeline_mode=pl.Buffered(1)),
                pl.BlockSpec((r2, 2 * C), lambda i: (0, 0),
                             pipeline_mode=pl.Buffered(1)),
            ],
            out_specs=pl.BlockSpec((tm, 3 * C), lambda i: (i, 0)),
        ),
        compiler_params=pltpu.CompilerParams(
            dimension_semantics=("parallel",),   # shards row grid over v7x's 2 TCs
            vmem_limit_bytes=vmem_limit,
        ),
    )(x2, wqkv_t, bqkv, a_cat, b_cat)

    return out.reshape(B, H, W, 3 * C)


def lora_qkv(x, w_qkv, b_qkv, w_a_q, w_b_q, w_a_v, w_b_v, *,
             tm=512, compute_dtype=jnp.bfloat16, out_dtype=jnp.bfloat16):
    """Convenience wrapper (packs weights per call; prefer packing once)."""
    packed = pack_lora_qkv_weights(w_qkv, b_qkv, w_a_q, w_b_q, w_a_v, w_b_v,
                                   compute_dtype=compute_dtype)
    return lora_qkv_packed(x, *packed, tm=tm, out_dtype=out_dtype)


def _reference(x, w_qkv, b_qkv, w_a_q, w_b_q, w_a_v, w_b_v,
               compute_dtype=jnp.bfloat16):
    """Mixed-precision reference matching the kernel's bf16/f32 scheme."""
    C = x.shape[-1]
    xc = x.astype(compute_dtype)
    qkv = jnp.einsum("bhwc,oc->bhwo", xc, w_qkv.astype(compute_dtype),
                     preferred_element_type=jnp.float32) + b_qkv.astype(jnp.float32)
    xa_q = jnp.einsum("bhwc,rc->bhwr", xc, w_a_q.astype(compute_dtype),
                      preferred_element_type=jnp.float32)
    new_q = jnp.einsum("bhwr,or->bhwo", xa_q.astype(compute_dtype),
                       w_b_q.astype(compute_dtype),
                       preferred_element_type=jnp.float32)
    xa_v = jnp.einsum("bhwc,rc->bhwr", xc, w_a_v.astype(compute_dtype),
                      preferred_element_type=jnp.float32)
    new_v = jnp.einsum("bhwr,or->bhwo", xa_v.astype(compute_dtype),
                       w_b_v.astype(compute_dtype),
                       preferred_element_type=jnp.float32)
    qkv = qkv.at[..., :C].add(new_q)
    qkv = qkv.at[..., -C:].add(new_v)
    return qkv   # f32


if __name__ == "__main__":
    key = jax.random.PRNGKey(0)
    B, H, W, C = 2, 16, 32, 256   # small SAM-like channels-last block input
    r = 4                          # LoRA rank

    keys = jax.random.split(key, 8)
    x     = jax.random.normal(keys[0], (B, H, W, C), jnp.float32)
    w_qkv = jax.random.normal(keys[1], (3 * C, C), jnp.float32) * 0.05  # nn.Linear(dim, 3*dim)
    b_qkv = jax.random.normal(keys[2], (3 * C,), jnp.float32) * 0.05
    w_a_q = jax.random.normal(keys[3], (r, C), jnp.float32) * 0.05      # nn.Linear(dim, r)
    w_b_q = jax.random.normal(keys[4], (C, r), jnp.float32) * 0.05      # nn.Linear(r, dim)
    w_a_v = jax.random.normal(keys[5], (r, C), jnp.float32) * 0.05
    w_b_v = jax.random.normal(keys[6], (C, r), jnp.float32) * 0.05

    # Pack once (adapter-load time), reuse across calls.
    packed = pack_lora_qkv_weights(w_qkv, b_qkv, w_a_q, w_b_q, w_a_v, w_b_v)
    out = lora_qkv_packed(x, *packed)          # bf16 output by default
    out = jax.block_until_ready(out)

    ref = _reference(x, w_qkv, b_qkv, w_a_q, w_b_q, w_a_v, w_b_v)
    assert out.shape == (B, H, W, 3 * C)
    err = jnp.max(jnp.abs(out.astype(jnp.float32) - ref))
    assert jnp.allclose(out.astype(jnp.float32), ref, atol=5e-2, rtol=5e-2), float(err)

    print("KERNEL_OK")
</pallas_src>

<mosaic_0001>
module attributes {stable_mosaic.version = 11 : i64} {
  func.func @_lora_qkv_kernel(%arg0: i32, %arg1: memref<512x256xf32, #tpu.memory_space<vmem>>, %arg2: memref<256x768xbf16, #tpu.memory_space<vmem>>, %arg3: memref<1x768xf32, #tpu.memory_space<vmem>>, %arg4: memref<256x8xbf16, #tpu.memory_space<vmem>>, %arg5: memref<8x512xbf16, #tpu.memory_space<vmem>>, %arg6: memref<512x768xbf16, #tpu.memory_space<vmem>>) attributes {dimension_semantics = [#tpu.dimension_semantics<parallel>], iteration_bounds = array<i64: 2>, scalar_prefetch = 0 : i64, scratch_operands = 0 : i64, tpu.core_type = #tpu.core_type<tc>, window_params = [{transform_indices = @transform_0, window_bounds = array<i64: 512, 256>}, {pipeline_mode = #tpu.pipeline_mode<synchronous>, transform_indices = @transform_1, window_bounds = array<i64: 256, 768>}, {pipeline_mode = #tpu.pipeline_mode<synchronous>, transform_indices = @transform_2, window_bounds = array<i64: 1, 768>}, {pipeline_mode = #tpu.pipeline_mode<synchronous>, transform_indices = @transform_3, window_bounds = array<i64: 256, 8>}, {pipeline_mode = #tpu.pipeline_mode<synchronous>, transform_indices = @transform_4, window_bounds = array<i64: 8, 512>}, {transform_indices = @transform_5, window_bounds = array<i64: 512, 768>}]} {
    %c0 = arith.constant 0 : index
    %c0_0 = arith.constant 0 : index
    %0 = vector.load %arg1[%c0, %c0_0] : memref<512x256xf32, #tpu.memory_space<vmem>>, vector<512x256xf32>
    %1 = arith.truncf %0 : vector<512x256xf32> to vector<512x256xbf16>
    %c0_1 = arith.constant 0 : index
    %c0_2 = arith.constant 0 : index
    %2 = vector.load %arg2[%c0_1, %c0_2] : memref<256x768xbf16, #tpu.memory_space<vmem>>, vector<256x768xbf16>
    %cst = arith.constant dense<0.000000e+00> : vector<512x768xf32>
    %3 = tpu.matmul %1, %2, %cst {dimension_numbers = #tpu.dot_dimension_numbers<[1], [0], [0], [1], [0, 0, 1, 1], [], []>} : vector<512x256xbf16>, vector<256x768xbf16>, vector<512x768xf32> -> vector<512x768xf32>
    %c0_3 = arith.constant 0 : index
    %c0_4 = arith.constant 0 : index
    %4 = vector.load %arg3[%c0_3, %c0_4] : memref<1x768xf32, #tpu.memory_space<vmem>>, vector<1x768xf32>
    %5 = vector.broadcast %4 : vector<1x768xf32> to vector<512x768xf32>
    %6 = arith.addf %3, %5 : vector<512x768xf32>
    %c0_5 = arith.constant 0 : index
    %c0_6 = arith.constant 0 : index
    %7 = vector.load %arg4[%c0_5, %c0_6] : memref<256x8xbf16, #tpu.memory_space<vmem>>, vector<256x8xbf16>
    %cst_7 = arith.constant dense<0.000000e+00> : vector<512x8xf32>
    %8 = tpu.matmul %1, %7, %cst_7 {dimension_numbers = #tpu.dot_dimension_numbers<[1], [0], [0], [1], [0, 0, 1, 1], [], []>} : vector<512x256xbf16>, vector<256x8xbf16>, vector<512x8xf32> -> vector<512x8xf32>
    %9 = arith.truncf %8 : vector<512x8xf32> to vector<512x8xbf16>
    %c0_8 = arith.constant 0 : index
    %c0_9 = arith.constant 0 : index
    %10 = vector.load %arg5[%c0_8, %c0_9] : memref<8x512xbf16, #tpu.memory_space<vmem>>, vector<8x512xbf16>
    %cst_10 = arith.constant dense<0.000000e+00> : vector<512x512xf32>
    %11 = tpu.matmul %9, %10, %cst_10 {dimension_numbers = #tpu.dot_dimension_numbers<[1], [0], [0], [1], [0, 0, 1, 1], [], []>} : vector<512x8xbf16>, vector<8x512xbf16>, vector<512x512xf32> -> vector<512x512xf32>
    %12 = vector.extract_strided_slice %6 {offsets = [0, 0], sizes = [512, 256], strides = [1, 1]} : vector<512x768xf32> to vector<512x256xf32>
    %13 = vector.extract_strided_slice %11 {offsets = [0, 0], sizes = [512, 256], strides = [1, 1]} : vector<512x512xf32> to vector<512x256xf32>
    %14 = arith.addf %12, %13 : vector<512x256xf32>
    %15 = vector.extract_strided_slice %6 {offsets = [0, 256], sizes = [512, 256], strides = [1, 1]} : vector<512x768xf32> to vector<512x256xf32>
    %16 = vector.extract_strided_slice %6 {offsets = [0, 512], sizes = [512, 256], strides = [1, 1]} : vector<512x768xf32> to vector<512x256xf32>
    %17 = vector.extract_strided_slice %11 {offsets = [0, 256], sizes = [512, 256], strides = [1, 1]} : vector<512x512xf32> to vector<512x256xf32>
    %18 = arith.addf %16, %17 : vector<512x256xf32>
    %19 = tpu.concatenate %14, %15, %18 in 1 : vector<512x256xf32>, vector<512x256xf32>, vector<512x256xf32> -> vector<512x768xf32>
    %20 = arith.truncf %19 : vector<512x768xf32> to vector<512x768xbf16>
    %c0_11 = arith.constant 0 : index
    %c0_12 = arith.constant 0 : index
    %21 = vector.load %arg6[%c0_11, %c0_12] : memref<512x768xbf16, #tpu.memory_space<vmem>>, vector<512x768xbf16>
    tpu.vector_store %arg6[%c0_11, %c0_12], %20 {strides = array<i32>} : memref<512x768xbf16, #tpu.memory_space<vmem>>, vector<512x768xbf16>,
    return
  }
  func.func @transform_0(%arg0: i32) -> (i32, i32) {
    %c0_i32 = arith.constant 0 : i32
    %c0_i32_0 = arith.constant 0 : i32
    return %arg0, %c0_i32 : i32, i32
  }
  func.func @transform_1(%arg0: i32) -> (i32, i32) {
    %c0_i32 = arith.constant 0 : i32
    %c0_i32_0 = arith.constant 0 : i32
    %c0_i32_1 = arith.constant 0 : i32
    return %c0_i32, %c0_i32_0 : i32, i32
  }
  func.func @transform_2(%arg0: i32) -> (i32, i32) {
    %c0_i32 = arith.constant 0 : i32
    %c0_i32_0 = arith.constant 0 : i32
    %c0_i32_1 = arith.constant 0 : i32
    return %c0_i32, %c0_i32_0 : i32, i32
  }
  func.func @transform_3(%arg0: i32) -> (i32, i32) {
    %c0_i32 = arith.constant 0 : i32
    %c0_i32_0 = arith.constant 0 : i32
    %c0_i32_1 = arith.constant 0 : i32
    return %c0_i32, %c0_i32_0 : i32, i32
  }
  func.func @transform_4(%arg0: i32) -> (i32, i32) {
    %c0_i32 = arith.constant 0 : i32
    %c0_i32_0 = arith.constant 0 : i32
    %c0_i32_1 = arith.constant 0 : i32
    return %c0_i32, %c0_i32_0 : i32, i32
  }
  func.func @transform_5(%arg0: i32) -> (i32, i32) {
    %c0_i32 = arith.constant 0 : i32
    %c0_i32_0 = arith.constant 0 : i32
    return %arg0, %c0_i32 : i32, i32
  }
}

</mosaic_0001>

<bundles_post_ra>
// kernel: tpu_custom_call.1
= control target key start
LH: loop header
LB: loop body
LE: loop exit
PB: predicated region body
PF: predicated region fallthrough
CT: control target
= control target key end

     0   :  { %10 = vsyncpa [#allocation3], 0  ;;  %s8811_s0 = inlined_call_operand.hbm [shape: f32[1024,256], index: 0, kind: input, shape index: {}]   ;;  %s8812_s1 = inlined_call_operand.hbm [shape: bf16[256,768], index: 1, kind: input, shape index: {}]   ;;  %s8813_s2 = inlined_call_operand.hbm [shape: f32[1,768], index: 2, kind: input, shape index: {}]   ;;  %s8814_s3 = inlined_call_operand.vmem [shape: bf16[256,8], index: 3, kind: input, shape index: {}]   ;;  %s8815_s4 = inlined_call_operand.hbm [shape: bf16[8,512], index: 4, kind: input, shape index: {}]   ;;  %s8816_s5 = inlined_call_operand.hbm [shape: bf16[1024,768], index: 5, kind: output, shape index: {}]  }
   0x1   :  { %12 = vsyncpa [#allocation3 + $0x1], 0 }
   0x2   :  { %13 = vsyncpa [#allocation6], 0 }
   0x3   :  { %14 = vsyncpa [#allocation9], 0 }
   0x4   :  { %15 = vsyncpa [#allocation4], 0 }
   0x5   :  { %17 = vsyncpa [#allocation4 + $0x1], 0  ;;  %s6724_s18 = smov 0   ;;  %s6726_s19 = smov 0  }
   0x6   :  { %s6728_s20 = smov 0   ;;  %s6730_s21 = smov 0  }
   0x7 LB: > { %s6745_s22 = sadd.s32 4294967295, %s6680_s21   ;;  %s5140_s23 = sadd.s32 4294967294, %s6680_s21   ;;  %s6680_s21 = sphi %s6730_s21, %s9191_s21   ;;  %s6676_s20 = sphi %s6728_s20, %s9190_s20   ;;  %s6672_s19 = sphi %s6726_s19, %s9189_s19   ;;  %s6668_s18 = sphi %s6724_s18, %s9188_s18  }
   0x8   : > { %p43_p0 = scmp.ne.s32.totalorder %s6672_s19, %s6668_s18  ;;  %p8817_p1 = scmp.eq.s32.totalorder %s6745_s22, 0 }
   0x9   : > { %p157_p3 = scmp.eq.s32.totalorder %s5140_s23, 1  ;;  %p5141_p5 = scmp.ge.s32.totalorder %s6680_s21, 1 }
   0xa   : > { %p6754_p4 = por %p8817_p1, %p43_p0  ;;  %p164_p7 = scmp.lt.s32.totalorder %s6680_s21, 3 }
   0xb   : > { %p6759_p6 = por %p157_p3, %p43_p0  ;;  %s6682_s27 = smov [#allocation5]  }
   0xc   : > { %s8861_s24 = scalar_select %p6754_p4, 1, 0 }
   0xd   : > { %s8862_s25 = scalar_select %p6759_p6, 1, 0 }
   0xe   : > { %p6764_p8 = pnand %p5141_p5, %p164_p7  ;;  %s176_s28 = sshll.u32 %s6682_s27, 4  ;;  %s6768_s28 = int_to_ptr.vmem [resolvable:$true] %s176_s28 }
   0xf   : > { %s6683_s30 = smov [#allocation7]   ;;  %s6684_s7 = smov [#allocation8]  }
  0x10   : > { %s8863_s26 = scalar_select %p6764_p8, 1, 0 }
  0x11   : > { %p6258_p9 = pneg %p6764_p8  ;;  %s190_s6 = sshll.u32 %s6683_s30, 4  ;;  %s6779_s6 = int_to_ptr.vmem [resolvable:$true] %s190_s6 }
  0x12   : > { %s6781_s8 = sshll.u32 %s6684_s7, 4  ;;  %s6492_s11 = scalar_lea.hbm %s8812_s1, 12288  ;;  %s205_s8 = int_to_ptr.vmem [resolvable:$true] %s6781_s8 }
  0x13   : > { %p6775_p11 = pnand %p6258_p9, %p8817_p1  ;;  %p6493_p12 = scmp.ne.s32.totalorder %s8812_s1, %s6492_s11 }
  0x14   : > { %p6499_p5 = scmp.lt.u32.totalorder %s6492_s11, %s8812_s1 }
  0x15   : > { %p6791_p13 = pneg %p6775_p11 }
  0x17   : > { %p6495_p0 = pnand %p6791_p13, %p6493_p12 }
  0x19   : > { %p6496_p3 = pneg %p6495_p0 }
  0x1b   : > { %p6501_p7 = pnand %p6499_p5, %p6496_p3 }
  0x1d   : > { %6504 = shalt.err (!%p6501_p7)
}
  0x1e   : > { %s6505_s17 = scalar_lea.vmem %s6768_s28, 12288  ;;  %p6513_p2 = scmp.lt.s32.totalorder %s6768_s28, %s6768_s28 }
  0x1f   : > { %p6506_p9 = scmp.ne.s32.totalorder %s6768_s28, %s6505_s17  ;;  %p6514_p6 = scmp.lt.s32.totalorder %s6505_s17, %s6505_s17 }
  0x21   : > { %p6508_p10 = pnand %p6506_p9, %p6791_p13  ;;  %p6515_p12 = por %p6514_p6, %p6513_p2 }
  0x23   : > { %p6509_p1 = pneg %p6508_p10 }
  0x25   : > { %p6516_p0 = pnand %p6515_p12, %p6509_p1 }
  0x27   : > { %6519 = shalt.err (!%p6516_p0)
}
  0x28   : > { %s6685_s23 = smov 384   ;;  %s6686_s27 = smov 24  }
  0x29   : > { %6261 = dma.hbm_to_vmem [thread:$0]  (!%p6775_p11), %s8812_s1, 12288, %s6768_s28, [#allocation6], %s6685_s23, %s6685_s23, %s6686_s27  }
  0x2a   : > { %s6520_s11 = scalar_lea.hbm %s8813_s2, 96 }
  0x2b   : > { %p6521_p2 = scmp.ne.s32.totalorder %s8813_s2, %s6520_s11  ;;  %p6527_p10 = scmp.lt.u32.totalorder %s6520_s11, %s8813_s2 }
  0x2d   : > { %p6523_p1 = pnand %p6521_p2, %p6791_p13 }
  0x2f   : > { %p6524_p6 = pneg %p6523_p1 }
  0x31   : > { %p6529_p3 = pnand %p6527_p10, %p6524_p6 }
  0x33   : > { %6532 = shalt.err (!%p6529_p3)
}
  0x34   : > { %s6533_s28 = scalar_lea.vmem %s6779_s6, 96  ;;  %p6541_p12 = scmp.lt.s32.totalorder %s6779_s6, %s6779_s6 }
  0x35   : > { %p6534_p5 = scmp.ne.s32.totalorder %s6779_s6, %s6533_s28  ;;  %p6542_p0 = scmp.lt.s32.totalorder %s6533_s28, %s6533_s28 }
  0x37   : > { %p6536_p7 = pnand %p6534_p5, %p6791_p13  ;;  %p6543_p2 = por %p6542_p0, %p6541_p12 }
  0x39   : > { %p6537_p9 = pneg %p6536_p7 }
  0x3b   : > { %p6544_p1 = pnand %p6543_p2, %p6537_p9 }
  0x3d   : > { %6547 = shalt.err (!%p6544_p1)
}
  0x3e   : > { %6264 = dma.hbm_to_vmem [thread:$0]  (!%p6775_p11), %s8813_s2, 96, %s6779_s6, [#allocation6]  }
  0x3f   : > { %s6548_s7 = scalar_lea.hbm %s8815_s4, 256 }
  0x40   : > { %p6549_p6 = scmp.ne.s32.totalorder %s8815_s4, %s6548_s7  ;;  %p6555_p5 = scmp.lt.u32.totalorder %s6548_s7, %s8815_s4 }
  0x42   : > { %p6551_p10 = pnand %p6549_p6, %p6791_p13 }
  0x44   : > { %p6552_p3 = pneg %p6551_p10 }
  0x46   : > { %p6557_p7 = pnand %p6555_p5, %p6552_p3 }
  0x48   : > { %6560 = shalt.err (!%p6557_p7)
}
  0x49   : > { %s6561_s13 = scalar_lea.vmem %s205_s8, 256  ;;  %p6569_p2 = scmp.lt.s32.totalorder %s205_s8, %s205_s8 }
  0x4a   : > { %p6562_p9 = scmp.ne.s32.totalorder %s205_s8, %s6561_s13  ;;  %p6570_p1 = scmp.lt.s32.totalorder %s6561_s13, %s6561_s13 }
  0x4c   : > { %p6564_p12 = pnand %p6562_p9, %p6791_p13  ;;  %p6571_p4 = por %p6570_p1, %p6569_p2 }
  0x4e   : > { %p6565_p0 = pneg %p6564_p12 }
  0x50   : > { %p6572_p8 = pnand %p6571_p4, %p6565_p0 }
  0x52   : > { %6575 = shalt.err (!%p6572_p8)
}
  0x53   : > { %6267 = dma.hbm_to_vmem [thread:$0]  (!%p6775_p11), %s8815_s4, 256, %s205_s8, [#allocation9]  }
  0x54   : > { %s6855_s14 = sadd.s32 1, %s6680_s21   ;;  %s30_s29 = sadd.s32 1, %s6676_s20 }
  0x55   : > { %s27_s16 = ssub.s32 %s6680_s21, %s6855_s14  ;;  %p37_p8 = scmp.ne.s32.totalorder %s6676_s20, %s6672_s19 }
  0x56   : > { %p28_p4 = scmp.eq.s32.totalorder %s27_s16, 0  ;;  %p38_p13 = scmp.eq.s32.totalorder %s6680_s21, 0 }
  0x57   : > { %p6279_p6 = scmp.lt.s32.totalorder %s6680_s21, 2  ;;  %p8866_p3 = scmp.eq.s32.totalorder %s6745_s22, 1 }
  0x58   : > { %s6865_s28 = scalar_select %p28_p4, %s6676_s20, %s30_s29  }
  0x59   : > { %p39_p10 = por %p38_p13, %p37_p8  ;;  %p6869_p5 = por %p8866_p3, %p37_p8 }
  0x5a   : > { %s215_s23 = sand.u32 1, %s6676_s20   ;;  %s5535_s27 = sshll.u32 %s6680_s21, 14 }
  0x5b   : > { %s5146_s8 = sshll.u32 %s215_s23, 10  ;;  %s6878_s9 = scalar_lea.hbm %s8811_s0, %s5535_s27 }
  0x5c   : > { %s219_s10 = scalar_lea.vmem [#allocation2], %s5146_s8  ;;  %p6880_p11 = pnand %p6279_p6, %p39_p10 }
  0x5d   : > { %s227_s11 = sshll.u32 %s219_s10, 4  ;;  %s6886_s13 = scalar_lea.sflag [#allocation3], %s215_s23  ;;  %s6884_s11 = int_to_ptr.vmem [resolvable:$true] %s227_s11 }
  0x5e   : > { %s6576_s6 = scalar_lea.hbm %s6878_s9, 16384  ;;  %p6578_p9 = pneg %p6880_p11 }
  0x5f   : > { %p6577_p7 = scmp.ne.s32.totalorder %s6878_s9, %s6576_s6  ;;  %s6581_s29 = scalar_lea.hbm %s8811_s0, 32768 }
  0x60   : > { %p6582_p2 = scmp.lt.u32.totalorder %s6878_s9, %s8811_s0  ;;  %p6583_p1 = scmp.lt.u32.totalorder %s6581_s29, %s6576_s6 }
  0x61   : > { %p6579_p12 = pnand %p6578_p9, %p6577_p7  ;;  %p6585_p8 = scmp.lt.u32.totalorder %s6576_s6, %s6878_s9 }
  0x62   : > { %p6584_p4 = por %p6583_p1, %p6582_p2 }
  0x63   : > { %p6580_p0 = pneg %p6579_p12 }
  0x64   : > { %p6586_p13 = por %p6585_p8, %p6584_p4 }
  0x66   : > { %p6587_p6 = pnand %p6586_p13, %p6580_p0 }
  0x68   : > { %6590 = shalt.err (!%p6587_p6)
}
  0x69   : > { %s6591_s23 = scalar_lea.vmem %s6884_s11, 16384  ;;  %s6687_s30 = smov [#allocation2]  }
  0x6a   : > { %p6592_p10 = scmp.ne.s32.totalorder %s6884_s11, %s6591_s23  ;;  %s6596_s7 = sshll.u32 %s6687_s30, 4  ;;  %s6597_s7 = int_to_ptr.vmem [resolvable:$false] %s6596_s7 }
  0x6b   : > { %s6598_s10 = scalar_lea.vmem %s6597_s7, 32768  ;;  %p6599_p12 = scmp.lt.s32.totalorder %s6884_s11, %s6597_s7 }
  0x6c   : > { %p6594_p3 = pnand %p6592_p10, %p6578_p9  ;;  %p6600_p2 = scmp.lt.s32.totalorder %s6598_s10, %s6591_s23 }
  0x6e   : > { %p6595_p7 = pneg %p6594_p3  ;;  %p6601_p1 = por %p6600_p2, %p6599_p12 }
  0x70   : > { %p6602_p4 = pnand %p6601_p1, %p6595_p7 }
  0x72   : > { %6605 = shalt.err (!%p6602_p4)
}
  0x73   : > { %s6688_s6 = smov 256   ;;  %s6689_s15 = smov 16  }
  0x74   : > { %6271 = dma.hbm_to_vmem [thread:$0]  (!%p6880_p11), %s6878_s9, 16384, %s6884_s11, %s6886_s13, %s6688_s6, %s6688_s6, %s6689_s15  }
  0x75   : > { %p8869_p9 = scmp.ne.s32.totalorder %s8863_s26, 0 }
  0x77   : > { %239 = sbr.rel (%p8869_p9) target bundleno = 1668 (0x684), region = 40 }
  0x7e   : > { %s6917_s16 = sand.u32 1, %s6672_s19   ;;  %p8870_p0 = scmp.ne.s32.totalorder %s8861_s24, 0 }
  0x7f   : > { %s5151_s29 = sshll.u32 %s6917_s16, 10  ;;  %s242_s27 = scalar_lea.sflag [#allocation3], %s6917_s16 }
  0x80   : > { %s6921_s8 = scalar_lea.vmem [#allocation2], %s5151_s29 }
  0x81   : > { %6651 = dma.done.wait (%p8870_p0), %s242_s27, 16384  }
  0x82   : > { %6653 = vsyncadd (%p8870_p0), %s242_s27, 4294950912  ;;  %p8871_p11 = scmp.eq.s32.totalorder %s6745_s22, 0 }
  0x84   : > { %6655 = dma.done.wait (%p8871_p11), [#allocation6], 12384   ;;  %p8872_p8 = pmov %p8871_p11 }
  0x86   : > { %6657 = vsyncadd (%p8872_p8), [#allocation6], 4294954912  ;;  %p8873_p13 = pmov %p8872_p8 }
  0x87   : > { %p8874_p6 = pmov %p8872_p8 }
  0x88   : > { %6659 = dma.done.wait (%p8873_p13), [#allocation9], 256  }
  0x89   : > { %6661 = vsyncadd (%p8874_p6), [#allocation9], 4294967040  ;;  %v6326_v0 = vld [vmem:[#allocation5 + $0x4] ss:$24 sps:$4 sm:$0xff]   ;;  %v6328_v1 = vld [vmem:[#allocation5] ss:$24 sps:$4 sm:$0xff]  }
  0x8a   : > { %1087 = vmatprep.subr.bf16.mxu1 %v6326_v0  ;;  %v6329_v2 = vld [vmem:[#allocation5 + $0x34] ss:$24 sps:$4 sm:$0xff]   ;;  %v6331_v3 = vld [vmem:[#allocation5 + $0x30] ss:$24 sps:$4 sm:$0xff]   ;;  %v6332_v4 = vld [vmem:[#allocation5 + $0x64] ss:$24 sps:$4 sm:$0xff]  }
  0x8b   : > { %1088 = vmatpush1.bf16.msra.mxu1 %v6328_v1  ;;  %v6334_v5 = vld [vmem:[#allocation5 + $0x60] ss:$24 sps:$4 sm:$0xff]   ;;  %v6335_v6 = vld [vmem:[#allocation5 + $0x94] ss:$24 sps:$4 sm:$0xff]   ;;  %v6337_v7 = vld [vmem:[#allocation5 + $0x90] ss:$24 sps:$4 sm:$0xff]  }
  0x8c   : > { %1089 = vmatprep.subr.bf16.mxu1 %v6329_v2  ;;  %v6338_v8 = vld [vmem:[#allocation5 + $0xc4] ss:$24 sps:$4 sm:$0xff]   ;;  %v6340_v9 = vld [vmem:[#allocation5 + $0xc0] ss:$24 sps:$4 sm:$0xff]   ;;  %v6341_v10 = vld [vmem:[#allocation5 + $0xf4] ss:$24 sps:$4 sm:$0xff]  }
  0x8d   : > { %v6343_v11 = vld [vmem:[#allocation5 + $0xf0] ss:$24 sps:$4 sm:$0xff]   ;;  %v6344_v12 = vld [vmem:[#allocation5 + $0x124] ss:$24 sps:$4 sm:$0xff]   ;;  %v6346_v16 = vld [vmem:[#allocation5 + $0x120] ss:$24 sps:$4 sm:$0xff]  }
  0x8e   : > { %v288_v13 = vld [vmem:[%s6921_s8 + $0x8] sm:$0xff]  ;;  %v290_v14 = vld [vmem:[%s6921_s8 + $0x18] sm:$0xff]  ;;  %v287_v35 = vld [vmem:[%s6921_s8] sm:$0xff]  ;;  %vm2704_vm0 = vcmask 1043456   ;;  %s6240_s9 = smul.u32 1536, %s6917_s16  ;;  %vm2607_vm1 = vcmask 64512  }
  0x8f   : > { %1090 = vmatpush1.bf16.msra.mxu1 %v6331_v3  ;;  %v6937_v15 = vpack.c.bf16 %v290_v14, %v288_v13  ;;  %v6347_v17 = vld [vmem:[#allocation5 + $0x154] ss:$24 sps:$4 sm:$0xff]   ;;  %v6349_v18 = vld [vmem:[#allocation5 + $0x150] ss:$24 sps:$4 sm:$0xff]   ;;  %v6350_v19 = vld [vmem:[#allocation5 + $0x184] ss:$24 sps:$4 sm:$0xff]  }
  0x90   : > { %1091 = vmatprep.subr.bf16.mxu1 %v6332_v4  ;;  %v6352_v20 = vld [vmem:[#allocation5 + $0x180] ss:$24 sps:$4 sm:$0xff]   ;;  %v6353_v21 = vld [vmem:[#allocation5 + $0x1b4] ss:$24 sps:$4 sm:$0xff]   ;;  %v6355_v22 = vld [vmem:[#allocation5 + $0x1b0] ss:$24 sps:$4 sm:$0xff]  }
  0x91   : > { %8875 = vst [vmem:[#allocation15_spill] sm:$0xff] %v6937_v15  ;;  %1119 = vmatprep.mubr.bf16.mxu1 %v6937_v15  ;;  %1825 = vmatprep.mubr.bf16.mxu0 %v6937_v15  ;;  %v6356_v23 = vld [vmem:[#allocation5 + $0x1e4] ss:$24 sps:$4 sm:$0xff]   ;;  %v6358_v24 = vld [vmem:[#allocation5 + $0x1e0] ss:$24 sps:$4 sm:$0xff]   ;;  %v289_v36 = vld [vmem:[%s6921_s8 + $0x10] sm:$0xff] }
  0x92   : > { %v6359_v25 = vld [vmem:[#allocation5 + $0x214] ss:$24 sps:$4 sm:$0xff]   ;;  %v6361_v26 = vld [vmem:[#allocation5 + $0x210] ss:$24 sps:$4 sm:$0xff]   ;;  %v6362_v27 = vld [vmem:[#allocation5 + $0x244] ss:$24 sps:$4 sm:$0xff]   ;;  %v6945_v41 = vpack.c.bf16 %v289_v36, %v287_v35 }
  0x93   : > { %1092 = vmatpush1.bf16.msra.mxu1 %v6334_v5  ;;  %v6364_v28 = vld [vmem:[#allocation5 + $0x240] ss:$24 sps:$4 sm:$0xff]   ;;  %v6365_v29 = vld [vmem:[#allocation5 + $0x274] ss:$24 sps:$4 sm:$0xff]   ;;  %v6367_v30 = vld [vmem:[#allocation5 + $0x270] ss:$24 sps:$4 sm:$0xff]  }
  0x94   : > { %1093 = vmatprep.subr.bf16.mxu1 %v6335_v6  ;;  %v6368_v31 = vld [vmem:[#allocation5 + $0x2a4] ss:$24 sps:$4 sm:$0xff]   ;;  %v6370_v32 = vld [vmem:[#allocation5 + $0x2a0] ss:$24 sps:$4 sm:$0xff]   ;;  %v6371_v33 = vld [vmem:[#allocation5 + $0x2d4] ss:$24 sps:$4 sm:$0xff]  }
  0x95   : > { %v6373_v34 = vld [vmem:[#allocation5 + $0x2d0] ss:$24 sps:$4 sm:$0xff]   ;;  %v6376_v37 = vld [vmem:[#allocation5 + $0xc] ss:$24 sps:$4 sm:$0xff]   ;;  %v294_v39 = vld [vmem:[%s6921_s8 + $0x38] sm:$0xff]  ;;  %s7679_s11 = scalar_lea.vmem [#allocation10], %s6240_s9 }
  0x96   : > { %v292_v38 = vld [vmem:[%s6921_s8 + $0x28] sm:$0xff]  ;;  %v6379_v42 = vld [vmem:[#allocation5 + $0x3c] ss:$24 sps:$4 sm:$0xff]   ;;  %v291_v44 = vld [vmem:[%s6921_s8 + $0x20] sm:$0xff]  ;;  %s6241_s12 = smul.u32 24576, %s6745_s22  ;;  %s5038_s13 = sshll.u32 %s7679_s11, 4  ;;  %s8765_s13 = int_to_ptr.vmem [resolvable:$true] %s5038_s13 }
  0x97   : > { %1094 = vmatpush1.bf16.msra.mxu1 %v6337_v7  ;;  %v6374_v40 = vld [vmem:[#allocation5 + $0x8] ss:$24 sps:$4 sm:$0xff]   ;;  %v6947_v43 = vpack.c.bf16 %v294_v39, %v292_v38  ;;  %v293_v45 = vld [vmem:[%s6921_s8 + $0x30] sm:$0xff]  ;;  %v298_v47 = vld [vmem:[%s6921_s8 + $0x58] sm:$0xff]  ;;  %s5024_s22 = scalar_lea.sflag [#allocation4], %s6917_s16  ;;  %s6606_s10 = scalar_lea.vmem %s8765_s13, 24576 }
  0x98   : > { %1095 = vmatprep.subr.bf16.mxu1 %v6338_v8  ;;  %v296_v46 = vld [vmem:[%s6921_s8 + $0x48] sm:$0xff]  ;;  %v6377_v48 = vld [vmem:[#allocation5 + $0x38] ss:$24 sps:$4 sm:$0xff]   ;;  %v6955_v51 = vpack.c.bf16 %v293_v45, %v291_v44  ;;  %v6385_v52 = vld [vmem:[#allocation5 + $0x9c] ss:$24 sps:$4 sm:$0xff]   ;;  %s8763_s7 = scalar_lea.hbm %s8816_s5, %s6241_s12  ;;  %p6607_p10 = scmp.ne.s32.totalorder %s8765_s13, %s6606_s10 }
  0x99   : > { %v6382_v49 = vld [vmem:[#allocation5 + $0x6c] ss:$24 sps:$4 sm:$0xff]   ;;  %v6380_v50 = vld [vmem:[#allocation5 + $0x68] ss:$24 sps:$4 sm:$0xff]   ;;  %v6957_v53 = vpack.c.bf16 %v298_v47, %v296_v46  ;;  %v297_v55 = vld [vmem:[%s6921_s8 + $0x50] sm:$0xff]  ;;  %s6691_s6 = smov [#allocation10]  }
  0x9a   : > { %v295_v54 = vld [vmem:[%s6921_s8 + $0x40] sm:$0xff]  ;;  %v300_v56 = vld [vmem:[%s6921_s8 + $0x68] sm:$0xff]  ;;  %v302_v57 = vld [vmem:[%s6921_s8 + $0x78] sm:$0xff]  ;;  %p6608_p3 = pnand %p6607_p10, %p6869_p5  ;;  %s6610_s15 = sshll.u32 %s6691_s6, 4  ;;  %s6611_s15 = int_to_ptr.vmem [resolvable:$false] %s6610_s15 }
  0x9b   : > { %1096 = vmatpush1.bf16.msra.mxu1 %v6340_v9  ;;  %v6383_v58 = vld [vmem:[#allocation5 + $0x98] ss:$24 sps:$4 sm:$0xff]   ;;  %v6388_v59 = vld [vmem:[#allocation5 + $0xcc] ss:$24 sps:$4 sm:$0xff]   ;;  %v6386_v60 = vld [vmem:[#allocation5 + $0xc8] ss:$24 sps:$4 sm:$0xff]   ;;  %v6965_v61 = vpack.c.bf16 %v297_v55, %v295_v54  ;;  %v6967_v63 = vpack.c.bf16 %v302_v57, %v300_v56  ;;  %p6613_p12 = scmp.lt.s32.totalorder %s8765_s13, %s6611_s15 }
  0x9c   : > { %1097 = vmatprep.subr.bf16.mxu1 %v6341_v10  ;;  %v6391_v62 = vld [vmem:[#allocation5 + $0xfc] ss:$24 sps:$4 sm:$0xff]   ;;  %v299_v0 = vld [vmem:[%s6921_s8 + $0x60] sm:$0xff]  ;;  %v304_v2 = vld [vmem:[%s6921_s8 + $0x88] sm:$0xff]  ;;  %p6609_p7 = pneg %p6608_p3  ;;  %s6612_s29 = scalar_lea.vmem %s6611_s15, 49152 }
  0x9d   : > { %v301_v1 = vld [vmem:[%s6921_s8 + $0x70] sm:$0xff]  ;;  %v306_v3 = vld [vmem:[%s6921_s8 + $0x98] sm:$0xff]  ;;  %v6394_v5 = vld [vmem:[#allocation5 + $0x12c] ss:$24 sps:$4 sm:$0xff]   ;;  %p6614_p2 = scmp.lt.s32.totalorder %s6612_s29, %s6606_s10 }
  0x9e   : > { %v6389_v4 = vld [vmem:[#allocation5 + $0xf8] ss:$24 sps:$4 sm:$0xff]   ;;  %v6975_v6 = vpack.c.bf16 %v301_v1, %v299_v0  ;;  %v6977_v7 = vpack.c.bf16 %v306_v3, %v304_v2  ;;  %v6392_v8 = vld [vmem:[#allocation5 + $0x128] ss:$24 sps:$4 sm:$0xff]   ;;  %v6397_v9 = vld [vmem:[#allocation5 + $0x15c] ss:$24 sps:$4 sm:$0xff]  }
  0x9f   : > { %1098 = vmatpush1.bf16.msra.mxu1 %v6343_v11  ;;  %v303_v10 = vld [vmem:[%s6921_s8 + $0x80] sm:$0xff]  ;;  %v305_v11 = vld [vmem:[%s6921_s8 + $0x90] sm:$0xff]  ;;  %v308_v13 = vld [vmem:[%s6921_s8 + $0xa8] sm:$0xff]  ;;  %p6615_p1 = por %p6614_p2, %p6613_p12 }
  0xa0   : > { %1099 = vmatprep.subr.bf16.mxu1 %v6344_v12  ;;  %v6395_v12 = vld [vmem:[#allocation5 + $0x158] ss:$24 sps:$4 sm:$0xff]   ;;  %v315_v38 = vld [vmem:[%s6921_s8 + $0xe0] sm:$0xff]  ;;  %v332_v2 = vld [vmem:[%s6921_s8 + $0x168] sm:$0xff] }
  0xa1   : > { %v310_v14 = vld [vmem:[%s6921_s8 + $0xb8] sm:$0xff]  ;;  %v317_v39 = vld [vmem:[%s6921_s8 + $0xf0] sm:$0xff]  ;;  %v319_v46 = vld [vmem:[%s6921_s8 + $0x100] sm:$0xff]  ;;  %p6616_p4 = pnand %p6615_p1, %p6609_p7 }
  0xa2   : > { %v6407_v36 = vld [vmem:[#allocation5 + $0x218] ss:$24 sps:$4 sm:$0xff]   ;;  %v7015_v44 = vpack.c.bf16 %v317_v39, %v315_v38  ;;  %v6410_v54 = vld [vmem:[#allocation5 + $0x248] ss:$24 sps:$4 sm:$0xff]   ;;  %v6412_v55 = vld [vmem:[#allocation5 + $0x24c] ss:$24 sps:$4 sm:$0xff]  }
  0xa3   : > { %1100 = vmatpush1.bf16.msra.mxu1 %v6346_v16  ;;  %v6400_v16 = vld [vmem:[#allocation5 + $0x18c] ss:$24 sps:$4 sm:$0xff]   ;;  %v321_v47 = vld [vmem:[%s6921_s8 + $0x110] sm:$0xff]  ;;  %v334_v3 = vld [vmem:[%s6921_s8 + $0x178] sm:$0xff] }
  0xa4   : > { %1101 = vmatprep.subr.bf16.mxu1 %v6347_v17  ;;  %v6985_v17 = vpack.c.bf16 %v305_v11, %v303_v10  ;;  %v323_v56 = vld [vmem:[%s6921_s8 + $0x120] sm:$0xff]  ;;  %v325_v57 = vld [vmem:[%s6921_s8 + $0x130] sm:$0xff]  ;;  %v348_v39 = vld [vmem:[%s6921_s8 + $0x1e8] sm:$0xff] }
  0xa5   : > { %v327_v0 = vld [vmem:[%s6921_s8 + $0x140] sm:$0xff]  ;;  %v329_v1 = vld [vmem:[%s6921_s8 + $0x150] sm:$0xff] }
  0xa6   : > { %v331_v10 = vld [vmem:[%s6921_s8 + $0x160] sm:$0xff]  ;;  %v333_v11 = vld [vmem:[%s6921_s8 + $0x170] sm:$0xff] }
  0xa7   : > { %1102 = vmatpush1.bf16.msra.mxu1 %v6349_v18  ;;  %v6987_v18 = vpack.c.bf16 %v310_v14, %v308_v13  ;;  %v338_v13 = vld [vmem:[%s6921_s8 + $0x198] sm:$0xff]  ;;  %v7055_v14 = vpack.c.bf16 %v333_v11, %v331_v10  ;;  %v345_v38 = vld [vmem:[%s6921_s8 + $0x1d0] sm:$0xff]  ;;  %v8820_v11 = vmov 0  }
  0xa8   : > { %1103 = vmatprep.subr.bf16.mxu1 %v6350_v19  ;;  %v6398_v19 = vld [vmem:[#allocation5 + $0x188] ss:$24 sps:$4 sm:$0xff]   ;;  %v357_v10 = vld [vmem:[%s6921_s8 + $0x230] sm:$0xff] }
  0xab   : > { %1104 = vmatpush1.bf16.msra.mxu1 %v6352_v20  ;;  %v6403_v20 = vld [vmem:[#allocation5 + $0x1bc] ss:$24 sps:$4 sm:$0xff]  }
  0xac   : > { %1105 = vmatprep.subr.bf16.mxu1 %v6353_v21  ;;  %v307_v21 = vld [vmem:[%s6921_s8 + $0xa0] sm:$0xff] }
  0xaf   : > { %1106 = vmatpush1.bf16.msra.mxu1 %v6355_v22  ;;  %v309_v22 = vld [vmem:[%s6921_s8 + $0xb0] sm:$0xff] }
  0xb0   : > { %1107 = vmatprep.subr.bf16.mxu1 %v6356_v23  ;;  %v6401_v23 = vld [vmem:[#allocation5 + $0x1b8] ss:$24 sps:$4 sm:$0xff]  }
  0xb3   : > { %1108 = vmatpush1.bf16.msra.mxu1 %v6358_v24  ;;  %v312_v24 = vld [vmem:[%s6921_s8 + $0xc8] sm:$0xff] }
  0xb4   : > { %1109 = vmatprep.subr.bf16.mxu1 %v6359_v25  ;;  %v314_v25 = vld [vmem:[%s6921_s8 + $0xd8] sm:$0xff] }
  0xb7   : > { %1110 = vmatpush1.bf16.msra.mxu1 %v6361_v26  ;;  %v6406_v26 = vld [vmem:[#allocation5 + $0x1ec] ss:$24 sps:$4 sm:$0xff]  }
  0xb8   : > { %1111 = vmatprep.subr.bf16.mxu1 %v6362_v27  ;;  %v6995_v27 = vpack.c.bf16 %v309_v22, %v307_v21  ;;  %v340_v21 = vld [vmem:[%s6921_s8 + $0x1a8] sm:$0xff]  ;;  %v342_v22 = vld [vmem:[%s6921_s8 + $0x1b8] sm:$0xff] }
  0xbb   : > { %1112 = vmatpush1.bf16.msra.mxu1 %v6364_v28  ;;  %v6997_v28 = vpack.c.bf16 %v314_v25, %v312_v24  ;;  %v7067_v24 = vpack.c.bf16 %v342_v22, %v340_v21  ;;  %v6416_v25 = vld [vmem:[#allocation5 + $0x2a8] ss:$24 sps:$4 sm:$0xff]   ;;  %v361_v22 = vld [vmem:[%s6921_s8 + $0x250] sm:$0xff] }
  0xbc   : > { %1113 = vmatprep.subr.bf16.mxu1 %v6365_v29  ;;  %v6404_v29 = vld [vmem:[#allocation5 + $0x1e8] ss:$24 sps:$4 sm:$0xff]  }
  0xbd   : > { %8878 = vst [vmem:[#allocation18_spill] sm:$0xff] %v7067_v24  ;;  %v359_v21 = vld [vmem:[%s6921_s8 + $0x240] sm:$0xff] }
  0xbf   : > { %1114 = vmatpush1.bf16.msra.mxu1 %v6367_v30  ;;  %v311_v30 = vld [vmem:[%s6921_s8 + $0xc0] sm:$0xff] }
  0xc0   : > { %1115 = vmatprep.subr.bf16.mxu1 %v6368_v31  ;;  %v313_v31 = vld [vmem:[%s6921_s8 + $0xd0] sm:$0xff] }
  0xc3   : > { %1116 = vmatpush1.bf16.msra.mxu1 %v6370_v32  ;;  %v316_v32 = vld [vmem:[%s6921_s8 + $0xe8] sm:$0xff] }
  0xc4   : > { %1117 = vmatprep.subr.bf16.mxu1 %v6371_v33  ;;  %v318_v33 = vld [vmem:[%s6921_s8 + $0xf8] sm:$0xff] }
  0xc5   : > { %v7007_v35 = vpack.c.bf16 %v318_v33, %v316_v32  ;;  %v346_v32 = vld [vmem:[%s6921_s8 + $0x1d8] sm:$0xff] }
  0xc7   : > { %1118 = vmatpush1.bf16.msra.mxu1 %v6373_v34  ;;  %v7005_v34 = vpack.c.bf16 %v313_v31, %v311_v30  ;;  %v341_v30 = vld [vmem:[%s6921_s8 + $0x1b0] sm:$0xff]  ;;  %v344_v31 = vld [vmem:[%s6921_s8 + $0x1c8] sm:$0xff] }
  0xc8   : > { %1440 = vmatprep.subr.bf16.mxu1 %v6376_v37  ;;  %v6409_v37 = vld [vmem:[#allocation5 + $0x21c] ss:$24 sps:$4 sm:$0xff]  }
  0xca   : > { %1120 = vmatmul.mubr.bf16.vlgmr.msra.gmra.mrb[0].mxu1 %v6945_v41 }
  0xcb   : > { %1441 = vmatpush1.bf16.msra.mxu1 %v6374_v40  ;;  %1129 = vmatprep.mubr.bf16.mxu1 %v6947_v43  ;;  %v320_v40 = vld [vmem:[%s6921_s8 + $0x108] sm:$0xff] }
  0xcc   : > { %1442 = vmatprep.subr.bf16.mxu1 %v6379_v42  ;;  %v322_v42 = vld [vmem:[%s6921_s8 + $0x118] sm:$0xff] }
  0xcd   : > { %v7017_v45 = vpack.c.bf16 %v322_v42, %v320_v40  ;;  %v350_v40 = vld [vmem:[%s6921_s8 + $0x1f8] sm:$0xff] }
  0xcf   : > { %1443 = vmatpush1.bf16.msra.mxu1 %v6377_v48  ;;  %v324_v48 = vld [vmem:[%s6921_s8 + $0x128] sm:$0xff] }
  0xd0   : > { %1444 = vmatprep.subr.bf16.mxu1 %v6382_v49  ;;  %v326_v49 = vld [vmem:[%s6921_s8 + $0x138] sm:$0xff] }
  0xd2   : > { %1130 = vmatmul.mubr.bf16.gmra.mrb[4].mxu1 %v6955_v51 }
  0xd3   : > { %1139 = vmatprep.mubr.bf16.mxu1 %v6957_v53  ;;  %1445 = vmatpush1.bf16.msra.mxu1 %v6380_v50  ;;  %v7025_v50 = vpack.c.bf16 %v321_v47, %v319_v46  ;;  %v7087_v46 = vpack.c.bf16 %v350_v40, %v348_v39  ;;  %v6419_v47 = vld [vmem:[#allocation5 + $0x2d8] ss:$24 sps:$4 sm:$0xff]  }
  0xd4   : > { %1446 = vmatprep.subr.bf16.mxu1 %v6385_v52  ;;  %v7027_v52 = vpack.c.bf16 %v326_v49, %v324_v48  ;;  %v6421_v48 = vld [vmem:[#allocation5 + $0x2dc] ss:$24 sps:$4 sm:$0xff]   ;;  %v347_v49 = vld [vmem:[%s6921_s8 + $0x1e0] sm:$0xff] }
  0xd5   : > { %8882 = vst [vmem:[#allocation22_spill] sm:$0xff] %v7087_v46 }
  0xd7   : > { %1447 = vmatpush1.bf16.msra.mxu1 %v6383_v58  ;;  %v328_v58 = vld [vmem:[%s6921_s8 + $0x148] sm:$0xff] }
  0xd8   : > { %1448 = vmatprep.subr.bf16.mxu1 %v6388_v59  ;;  %v330_v59 = vld [vmem:[%s6921_s8 + $0x158] sm:$0xff] }
  0xda   : > { %1140 = vmatmul.mubr.bf16.gmra.mrb[8].mxu1 %v6965_v61 }
  0xdb   : > { %1149 = vmatprep.mubr.bf16.mxu1 %v6967_v63  ;;  %1449 = vmatpush1.bf16.msra.mxu1 %v6386_v60  ;;  %v7035_v60 = vpack.c.bf16 %v325_v57, %v323_v56  ;;  %v354_v56 = vld [vmem:[%s6921_s8 + $0x218] sm:$0xff] }
  0xdc   : > { %1450 = vmatprep.subr.bf16.mxu1 %v6391_v62  ;;  %v7037_v62 = vpack.c.bf16 %v330_v59, %v328_v58  ;;  %v351_v59 = vld [vmem:[%s6921_s8 + $0x200] sm:$0xff] }
  0xdf   : > { %1451 = vmatpush1.bf16.msra.mxu1 %v6389_v4  ;;  %v7045_v4 = vpack.c.bf16 %v329_v1, %v327_v0  ;;  %v353_v0 = vld [vmem:[%s6921_s8 + $0x210] sm:$0xff]  ;;  %v356_v1 = vld [vmem:[%s6921_s8 + $0x228] sm:$0xff] }
  0xe0   : > { %1452 = vmatprep.subr.bf16.mxu1 %v6394_v5  ;;  %v7047_v5 = vpack.c.bf16 %v334_v3, %v332_v2  ;;  %v358_v2 = vld [vmem:[%s6921_s8 + $0x238] sm:$0xff]  ;;  %v7105_v3 = vpack.c.bf16 %v353_v0, %v351_v59  ;;  %v371_v59 = vld [vmem:[%s6921_s8 + $0x2a0] sm:$0xff]  ;;  %v373_v0 = vld [vmem:[%s6921_s8 + $0x2b0] sm:$0xff] }
  0xe2   : > { %1150 = vmatmul.mubr.bf16.gmra.mrb[12].mxu1 %v6975_v6  ;;  %8885 = vst [vmem:[#allocation25_spill] sm:$0xff] %v7105_v3 }
  0xe3   : > { %1159 = vmatprep.mubr.bf16.mxu1 %v6977_v7  ;;  %1453 = vmatpush1.bf16.msra.mxu1 %v6392_v8  ;;  %v6413_v8 = vld [vmem:[#allocation5 + $0x278] ss:$24 sps:$4 sm:$0xff]  }
  0xe4   : > { %1454 = vmatprep.subr.bf16.mxu1 %v6397_v9  ;;  %v6415_v9 = vld [vmem:[#allocation5 + $0x27c] ss:$24 sps:$4 sm:$0xff]  }
  0xe7   : > { %1455 = vmatpush1.bf16.msra.mxu1 %v6395_v12  ;;  %v336_v12 = vld [vmem:[%s6921_s8 + $0x188] sm:$0xff] }
  0xe8   : > { %1456 = vmatprep.subr.bf16.mxu1 %v6400_v16  ;;  %v7057_v16 = vpack.c.bf16 %v338_v13, %v336_v12  ;;  %v360_v12 = vld [vmem:[%s6921_s8 + $0x248] sm:$0xff]  ;;  %v362_v13 = vld [vmem:[%s6921_s8 + $0x258] sm:$0xff] }
  0xea   : > { %1160 = vmatmul.mubr.bf16.gmra.mrb[16].mxu1 %v6985_v17  ;;  %8876 = vst [vmem:[#allocation16_spill] sm:$0xff] %v7057_v16 }
  0xeb   : > { %1169 = vmatprep.mubr.bf16.mxu1 %v6987_v18  ;;  %1457 = vmatpush1.bf16.msra.mxu1 %v6398_v19  ;;  %v335_v19 = vld [vmem:[%s6921_s8 + $0x180] sm:$0xff] }
  0xec   : > { %1458 = vmatprep.subr.bf16.mxu1 %v6403_v20  ;;  %v337_v20 = vld [vmem:[%s6921_s8 + $0x190] sm:$0xff] }
  0xef   : > { %1459 = vmatpush1.bf16.msra.mxu1 %v6401_v23  ;;  %v7065_v23 = vpack.c.bf16 %v337_v20, %v335_v19  ;;  %v7118_v20 = vpack.c.bf16 %v362_v13, %v360_v12  ;;  %v375_v12 = vld [vmem:[%s6921_s8 + $0x2c0] sm:$0xff]  ;;  %v377_v13 = vld [vmem:[%s6921_s8 + $0x2d0] sm:$0xff] }
  0xf0   : > { %1460 = vmatprep.subr.bf16.mxu1 %v6406_v26  ;;  %v6418_v26 = vld [vmem:[#allocation5 + $0x2ac] ss:$24 sps:$4 sm:$0xff]  }
  0xf1   : > { %8877 = vst [vmem:[#allocation17_spill] sm:$0xff] %v7065_v23  ;;  %8888 = vst [vmem:[#allocation28_spill] sm:$0xff] %v7118_v20 }
  0xf2   : > { %1170 = vmatmul.mubr.bf16.gmra.mrb[20].mxu1 %v6995_v27 }
  0xf3   : > { %1179 = vmatprep.mubr.bf16.mxu1 %v6997_v28  ;;  %1461 = vmatpush1.bf16.msra.mxu1 %v6404_v29  ;;  %v339_v29 = vld [vmem:[%s6921_s8 + $0x1a0] sm:$0xff] }
  0xf4   : > { %1462 = vmatprep.subr.bf16.mxu1 %v6409_v37  ;;  %v7075_v33 = vpack.c.bf16 %v341_v30, %v339_v29  ;;  %v343_v37 = vld [vmem:[%s6921_s8 + $0x1c0] sm:$0xff]  ;;  %v7126_v29 = vpack.c.bf16 %v361_v22, %v359_v21  ;;  %v380_v21 = vld [vmem:[%s6921_s8 + $0x2e8] sm:$0xff]  ;;  %v382_v22 = vld [vmem:[%s6921_s8 + $0x2f8] sm:$0xff] }
  0xf5   : > { %v7085_v42 = vpack.c.bf16 %v345_v38, %v343_v37  ;;  %v368_v37 = vld [vmem:[%s6921_s8 + $0x288] sm:$0xff]  ;;  %v370_v38 = vld [vmem:[%s6921_s8 + $0x298] sm:$0xff] }
  0xf6   : > { %8879 = vst [vmem:[#allocation19_spill] sm:$0xff] %v7075_v33  ;;  %v7138_v40 = vpack.c.bf16 %v370_v38, %v368_v37  ;;  %v384_v37 = vld [vmem:[%s6921_s8 + $0x308] sm:$0xff]  ;;  %v386_v38 = vld [vmem:[%s6921_s8 + $0x318] sm:$0xff] }
  0xf7   : > { %1463 = vmatpush1.bf16.msra.mxu1 %v6407_v36  ;;  %v7077_v36 = vpack.c.bf16 %v346_v32, %v344_v31  ;;  %8881 = vst [vmem:[#allocation21_spill] sm:$0xff] %v7085_v42  ;;  %v363_v31 = vld [vmem:[%s6921_s8 + $0x260] sm:$0xff]  ;;  %v365_v32 = vld [vmem:[%s6921_s8 + $0x270] sm:$0xff] }
  0xf8   : > { %1464 = vmatprep.subr.bf16.mxu1 %v6412_v55  ;;  %v352_v55 = vld [vmem:[%s6921_s8 + $0x208] sm:$0xff]  ;;  %v7136_v39 = vpack.c.bf16 %v365_v32, %v363_v31  ;;  %8889 = vst [vmem:[#allocation29_spill] sm:$0xff] %v7138_v40  ;;  %v379_v31 = vld [vmem:[%s6921_s8 + $0x2e0] sm:$0xff]  ;;  %v381_v32 = vld [vmem:[%s6921_s8 + $0x2f0] sm:$0xff] }
  0xf9   : > { %8880 = vst [vmem:[#allocation20_spill] sm:$0xff] %v7077_v36  ;;  %v7097_v58 = vpack.c.bf16 %v354_v56, %v352_v55 }
  0xfa   : > { %1180 = vmatmul.mubr.bf16.gmra.mrb[24].mxu1 %v7005_v34 }
  0xfb   : > { %1189 = vmatprep.mubr.bf16.mxu1 %v7007_v35  ;;  %1465 = vmatpush1.bf16.msra.mxu1 %v6410_v54  ;;  %v349_v54 = vld [vmem:[%s6921_s8 + $0x1f0] sm:$0xff]  ;;  %8884 = vst [vmem:[#allocation24_spill] sm:$0xff] %v7097_v58 }
  0xfc   : > { %1466 = vmatprep.subr.bf16.mxu1 %v6415_v9  ;;  %v7095_v57 = vpack.c.bf16 %v349_v54, %v347_v49  ;;  %v355_v9 = vld [vmem:[%s6921_s8 + $0x220] sm:$0xff]  ;;  %v372_v49 = vld [vmem:[%s6921_s8 + $0x2a8] sm:$0xff]  ;;  %v374_v54 = vld [vmem:[%s6921_s8 + $0x2b8] sm:$0xff] }
  0xfd   : > { %v7116_v19 = vpack.c.bf16 %v357_v10, %v355_v9  ;;  %v7148_v56 = vpack.c.bf16 %v374_v54, %v372_v49  ;;  %v7156_v9 = vpack.c.bf16 %v373_v0, %v371_v59  ;;  %v383_v49 = vld [vmem:[%s6921_s8 + $0x300] sm:$0xff]  ;;  %v385_v54 = vld [vmem:[%s6921_s8 + $0x310] sm:$0xff]  ;;  %v388_v59 = vld [vmem:[%s6921_s8 + $0x328] sm:$0xff] }
  0xfe   : > { %8883 = vst [vmem:[#allocation23_spill] sm:$0xff] %v7095_v57  ;;  %v390_v0 = vld [vmem:[%s6921_s8 + $0x338] sm:$0xff] }
  0xff   : > { %1467 = vmatpush1.bf16.msra.mxu1 %v6413_v8  ;;  %v7107_v8 = vpack.c.bf16 %v358_v2, %v356_v1  ;;  %8887 = vst [vmem:[#allocation27_spill] sm:$0xff] %v7116_v19  ;;  %v376_v1 = vld [vmem:[%s6921_s8 + $0x2c8] sm:$0xff]  ;;  %v378_v2 = vld [vmem:[%s6921_s8 + $0x2d8] sm:$0xff] }
 0x100   : > { %1468 = vmatprep.subr.bf16.mxu1 %v6418_v26  ;;  %v366_v26 = vld [vmem:[%s6921_s8 + $0x278] sm:$0xff]  ;;  %v7158_v10 = vpack.c.bf16 %v378_v2, %v376_v1  ;;  %v7186_v1 = vpack.c.bf16 %v385_v54, %v383_v49  ;;  %v7188_v2 = vpack.c.bf16 %v390_v0, %v388_v59  ;;  %v396_v49 = vld [vmem:[%s6921_s8 + $0x368] sm:$0xff] }
 0x101   : > { %8886 = vst [vmem:[#allocation26_spill] sm:$0xff] %v7107_v8  ;;  %v398_v54 = vld [vmem:[%s6921_s8 + $0x378] sm:$0xff] }
 0x102   : > { %1190 = vmatmul.mubr.bf16.gmra.mrb[28].mxu1 %v7015_v44  ;;  %8890 = vst [vmem:[#allocation30_spill] sm:$0xff] %v7188_v2  ;;  %v7208_v0 = vpack.c.bf16 %v398_v54, %v396_v49 }
 0x103   : > { %1199 = vmatprep.mubr.bf16.mxu1 %v7017_v45  ;;  %1469 = vmatpush1.bf16.msra.mxu1 %v6416_v25  ;;  %v364_v25 = vld [vmem:[%s6921_s8 + $0x268] sm:$0xff] }
 0x104   : > { %1470 = vmatprep.subr.bf16.mxu1 %v6421_v48  ;;  %v7128_v30 = vpack.c.bf16 %v366_v26, %v364_v25  ;;  %v369_v48 = vld [vmem:[%s6921_s8 + $0x290] sm:$0xff]  ;;  %v7166_v25 = vpack.c.bf16 %v377_v13, %v375_v12  ;;  %v7168_v26 = vpack.c.bf16 %v382_v22, %v380_v21  ;;  %v387_v12 = vld [vmem:[%s6921_s8 + $0x320] sm:$0xff]  ;;  %v392_v21 = vld [vmem:[%s6921_s8 + $0x348] sm:$0xff]  ;;  %8894 = vst [vmem:[#allocation34_spill] sm:$0xff] %v7208_v0 }
 0x105   : > { %v389_v13 = vld [vmem:[%s6921_s8 + $0x330] sm:$0xff]  ;;  %v394_v22 = vld [vmem:[%s6921_s8 + $0x358] sm:$0xff] }
 0x107   : > { %1471 = vmatpush1.bf16.msra.mxu1 %v6419_v47  ;;  %v367_v47 = vld [vmem:[%s6921_s8 + $0x280] sm:$0xff] }
 0x108   : > { %2274 = vmatprep.subr.bf16.mxu1 %v8820_v11  ;;  %v7146_v55 = vpack.c.bf16 %v369_v48, %v367_v47  ;;  %v7176_v47 = vpack.c.bf16 %v381_v32, %v379_v31  ;;  %v7178_v48 = vpack.c.bf16 %v386_v38, %v384_v37  ;;  %v7196_v31 = vpack.c.bf16 %v389_v13, %v387_v12  ;;  %v391_v37 = vld [vmem:[%s6921_s8 + $0x340] sm:$0xff]  ;;  %v393_v38 = vld [vmem:[%s6921_s8 + $0x350] sm:$0xff] }
 0x109   : > { %v7198_v32 = vpack.c.bf16 %v394_v22, %v392_v21  ;;  %v7206_v59 = vpack.c.bf16 %v393_v38, %v391_v37  ;;  %v395_v12 = vld [vmem:[%s6921_s8 + $0x360] sm:$0xff]  ;;  %v397_v13 = vld [vmem:[%s6921_s8 + $0x370] sm:$0xff]  ;;  %v400_v21 = vld [vmem:[%s6921_s8 + $0x388] sm:$0xff] }
 0x10a   : > { %1200 = vmatmul.mubr.bf16.gmra.mrb[32].mxu1 %v7025_v50  ;;  %8891 = vst [vmem:[#allocation31_spill] sm:$0xff] %v7196_v31  ;;  %v402_v22 = vld [vmem:[%s6921_s8 + $0x398] sm:$0xff]  ;;  %v7220_v37 = vpack.c.bf16 %v397_v13, %v395_v12 }
 0x10b   : > { %1209 = vmatprep.mubr.bf16.mxu1 %v7027_v52  ;;  %8892 = vst [vmem:[#allocation32_spill] sm:$0xff] %v7198_v32  ;;  %8893 = vst [vmem:[#allocation33_spill] sm:$0xff] %v7206_v59  ;;  %v7224_v49 = vpack.c.bf16 %v402_v22, %v400_v21 }
 0x10c   : > { %8897 = vst [vmem:[#allocation37_spill] sm:$0xff] %v7220_v37 }
 0x10d   : > { %8899 = vst [vmem:[#allocation39_spill] sm:$0xff] %v7224_v49 }
 0x112   : > { %1210 = vmatmul.mubr.bf16.gmra.mrb[36].mxu1 %v7035_v60 }
 0x113   : > { %1219 = vmatprep.mubr.bf16.mxu1 %v7037_v62 }
 0x11a   : > { %1220 = vmatmul.mubr.bf16.gmra.mrb[40].mxu1 %v7045_v4 }
 0x11b   : > { %1229 = vmatprep.mubr.bf16.mxu1 %v7047_v5 }
 0x122   : > { %1230 = vmatmul.mubr.bf16.gmra.mrb[44].mxu1 %v7055_v14 }
 0x123   : > { %1239 = vmatprep.mubr.bf16.mxu1 %v7057_v16 }
 0x12a   : > { %1240 = vmatmul.mubr.bf16.gmra.mrb[48].mxu1 %v7065_v23 }
 0x12b   : > { %1249 = vmatprep.mubr.bf16.mxu1 %v7067_v24 }
 0x132   : > { %1250 = vmatmul.mubr.bf16.gmra.mrb[52].mxu1 %v7075_v33 }
 0x133   : > { %1259 = vmatprep.mubr.bf16.mxu1 %v7077_v36 }
 0x13a   : > { %1260 = vmatmul.mubr.bf16.gmra.mrb[56].mxu1 %v7085_v42 }
 0x13b   : > { %1269 = vmatprep.mubr.bf16.mxu1 %v7087_v46 }
 0x142   : > { %1270 = vmatmul.mubr.bf16.gmra.mrb[60].mxu1 %v7095_v57 }
 0x143   : > { %1279 = vmatprep.mubr.bf16.mxu1 %v7097_v58 }
 0x14a   : > { %1280 = vmatmul.mubr.bf16.gmra.mrb[64].mxu1 %v7105_v3 }
 0x14b   : > { %1289 = vmatprep.mubr.bf16.mxu1 %v7107_v8 }
 0x152   : > { %1290 = vmatmul.mubr.bf16.gmra.mrb[68].mxu1 %v7116_v19 }
 0x153   : > { %1299 = vmatprep.mubr.bf16.mxu1 %v7118_v20 }
 0x15a   : > { %1300 = vmatmul.mubr.bf16.gmra.mrb[72].mxu1 %v7126_v29 }
 0x15b   : > { %1309 = vmatprep.mubr.bf16.mxu1 %v7128_v30 }
 0x162   : > { %1310 = vmatmul.mubr.bf16.gmra.mrb[76].mxu1 %v7136_v39 }
 0x163   : > { %1319 = vmatprep.mubr.bf16.mxu1 %v7138_v40 }
 0x16a   : > { %1320 = vmatmul.mubr.bf16.gmra.mrb[80].mxu1 %v7146_v55 }
 0x16b   : > { %1329 = vmatprep.mubr.bf16.mxu1 %v7148_v56 }
 0x172   : > { %1330 = vmatmul.mubr.bf16.gmra.mrb[84].mxu1 %v7156_v9 }
 0x173   : > { %1339 = vmatprep.mubr.bf16.mxu1 %v7158_v10 }
 0x17a   : > { %1340 = vmatmul.mubr.bf16.gmra.mrb[88].mxu1 %v7166_v25 }
 0x17b   : > { %1349 = vmatprep.mubr.bf16.mxu1 %v7168_v26 }
 0x182   : > { %1350 = vmatmul.mubr.bf16.gmra.mrb[92].mxu1 %v7176_v47 }
 0x183   : > { %1359 = vmatprep.mubr.bf16.mxu1 %v7178_v48 }
 0x18a   : > { %1360 = vmatmul.mubr.bf16.gmra.mrb[96].mxu1 %v7186_v1 }
 0x18b   : > { %1369 = vmatprep.mubr.bf16.mxu1 %v7188_v2 }
 0x192   : > { %1370 = vmatmul.mubr.bf16.gmra.mrb[100].mxu1 %v7196_v31  ;;  %v412_v31 = vld [vmem:[%s6921_s8 + $0x3e8] sm:$0xff] }
 0x193   : > { %1379 = vmatprep.mubr.bf16.mxu1 %v7198_v32 }
 0x19a   : > { %1380 = vmatmul.mubr.bf16.gmra.mrb[104].mxu1 %v7206_v59  ;;  %v404_v59 = vld [vmem:[%s6921_s8 + $0x3a8] sm:$0xff] }
 0x19b   : > { %1389 = vmatprep.mubr.bf16.mxu1 %v7208_v0  ;;  %v399_v0 = vld [vmem:[%s6921_s8 + $0x380] sm:$0xff] }
 0x19d   : > { %v7216_v11 = vpop.f32.mrb[0].mxu1 }
 0x19e   : > { %8895 = vst [vmem:[#allocation35_spill] sm:$0xff] %v7216_v11  ;;  %v7218_v32 = vpop.f32.mrb[1].mxu1  ;;  %v401_v11 = vld [vmem:[%s6921_s8 + $0x390] sm:$0xff] }
 0x19f   : > { %8896 = vst [vmem:[#allocation36_spill] sm:$0xff] %v7218_v32  ;;  %v7222_v38 = vpop.f32.mrb[2].mxu1  ;;  %v406_v32 = vld [vmem:[%s6921_s8 + $0x3b8] sm:$0xff]  ;;  %v7238_v21 = vpack.c.bf16 %v401_v11, %v399_v0 }
 0x1a0   : > { %8898 = vst [vmem:[#allocation38_spill] sm:$0xff] %v7222_v38  ;;  %v7226_v54 = vpop.f32.mrb[3].mxu1 }
 0x1a1   : > { %8900 = vst [vmem:[#allocation40_spill] sm:$0xff] %v7226_v54  ;;  %8903 = vst [vmem:[#allocation43_spill] sm:$0xff] %v7238_v21  ;;  %v7242_v54 = vpack.c.bf16 %v406_v32, %v404_v59 }
 0x1a2   : > { %1390 = vmatmul.mubr.bf16.gmra.mrb[108].mxu1 %v7220_v37  ;;  %v408_v37 = vld [vmem:[%s6921_s8 + $0x3c8] sm:$0xff] }
 0x1a3   : > { %1399 = vmatprep.mubr.bf16.mxu1 %v7224_v49  ;;  %8905 = vst [vmem:[#allocation45_spill] sm:$0xff] %v7242_v54  ;;  %v403_v49 = vld [vmem:[%s6921_s8 + $0x3a0] sm:$0xff] }
 0x1a5   : > { %v7234_v12 = vpop.f32.mrb[4].mxu1 }
 0x1a6   : > { %8901 = vst [vmem:[#allocation41_spill] sm:$0xff] %v7234_v12  ;;  %v7236_v13 = vpop.f32.mrb[5].mxu1  ;;  %v405_v12 = vld [vmem:[%s6921_s8 + $0x3b0] sm:$0xff] }
 0x1a7   : > { %8902 = vst [vmem:[#allocation42_spill] sm:$0xff] %v7236_v13  ;;  %v7240_v22 = vpop.f32.mrb[6].mxu1  ;;  %v410_v13 = vld [vmem:[%s6921_s8 + $0x3d8] sm:$0xff]  ;;  %v7256_v32 = vpack.c.bf16 %v405_v12, %v403_v49 }
 0x1a8   : > { %8904 = vst [vmem:[#allocation44_spill] sm:$0xff] %v7240_v22  ;;  %v7244_v38 = vpop.f32.mrb[7].mxu1 }
 0x1a9   : > { %8906 = vst [vmem:[#allocation46_spill] sm:$0xff] %v7244_v38  ;;  %8909 = vst [vmem:[#allocation49_spill] sm:$0xff] %v7256_v32  ;;  %v7260_v38 = vpack.c.bf16 %v410_v13, %v408_v37 }
 0x1aa   : > { %1400 = vmatmul.mubr.bf16.gmra.mrb[112].mxu1 %v7238_v21  ;;  %v409_v21 = vld [vmem:[%s6921_s8 + $0x3d0] sm:$0xff] }
 0x1ab   : > { %1409 = vmatprep.mubr.bf16.mxu1 %v7242_v54  ;;  %8911 = vst [vmem:[#allocation51_spill] sm:$0xff] %v7260_v38  ;;  %v407_v54 = vld [vmem:[%s6921_s8 + $0x3c0] sm:$0xff] }
 0x1ac   : > { %v7274_v12 = vpack.c.bf16 %v409_v21, %v407_v54 }
 0x1ad   : > { %v7252_v11 = vpop.f32.mrb[8].mxu1 }
 0x1ae   : > { %8907 = vst [vmem:[#allocation47_spill] sm:$0xff] %v7252_v11  ;;  %v7254_v0 = vpop.f32.mrb[9].mxu1  ;;  %v414_v11 = vld [vmem:[%s6921_s8 + $0x3f8] sm:$0xff] }
 0x1af   : > { %8908 = vst [vmem:[#allocation48_spill] sm:$0xff] %v7254_v0  ;;  %v7258_v59 = vpop.f32.mrb[10].mxu1  ;;  %v7278_v13 = vpack.c.bf16 %v414_v11, %v412_v31  ;;  %v413_v0 = vld [vmem:[%s6921_s8 + $0x3f0] sm:$0xff] }
 0x1b0   : > { %8910 = vst [vmem:[#allocation50_spill] sm:$0xff] %v7258_v59  ;;  %v7262_v22 = vpop.f32.mrb[11].mxu1  ;;  %v411_v59 = vld [vmem:[%s6921_s8 + $0x3e0] sm:$0xff] }
 0x1b1   : > { %8912 = vst [vmem:[#allocation52_spill] sm:$0xff] %v7262_v22 }
 0x1b2   : > { %1410 = vmatmul.mubr.bf16.gmra.mrb[116].mxu1 %v7256_v32 }
 0x1b3   : > { %1419 = vmatprep.mubr.bf16.mxu1 %v7260_v38 }
 0x1b5   : > { %v7270_v2 = vpop.f32.mrb[12].mxu1 }
 0x1b6   : > { %8913 = vst [vmem:[#allocation53_spill] sm:$0xff] %v7270_v2  ;;  %v7272_v49 = vpop.f32.mrb[13].mxu1  ;;  %v7290_v2 = vpack.c.bf16 %v413_v0, %v411_v59  ;;  %v6423_v59 = vld [vmem:[%s8814_s3 + $0x8] sm:$0xff]  }
 0x1b7   : > { %8914 = vst [vmem:[#allocation54_spill] sm:$0xff] %v7272_v49  ;;  %v7276_v37 = vpop.f32.mrb[14].mxu1  ;;  %v6440_v49 = vld [vmem:[#allocation5 + $0x70] ss:$24 sps:$4 sm:$0xff]  }
 0x1b8   : > { %8915 = vst [vmem:[#allocation55_spill] sm:$0xff] %v7276_v37  ;;  %v7280_v22 = vpop.f32.mrb[15].mxu1 }
 0x1b9   : > { %8916 = vst [vmem:[#allocation56_spill] sm:$0xff] %v7280_v22 }
 0x1ba   : > { %1420 = vmatmul.mubr.bf16.gmra.mrb[120].mxu1 %v7274_v12 }
 0x1bb   : > { %1429 = vmatprep.mubr.bf16.mxu1 %v7278_v13 }
 0x1bd   : > { %v7286_v38 = vpop.f32.mrb[16].mxu1 }
 0x1be   : > { %8917 = vst [vmem:[#allocation57_spill] sm:$0xff] %v7286_v38  ;;  %v7288_v32 = vpop.f32.mrb[17].mxu1  ;;  %v6434_v38 = vld [vmem:[#allocation5 + $0x10] ss:$24 sps:$4 sm:$0xff]  }
 0x1bf   : > { %8918 = vst [vmem:[#allocation58_spill] sm:$0xff] %v7288_v32  ;;  %v7292_v54 = vpop.f32.mrb[18].mxu1  ;;  %v6422_v32 = vld [vmem:[%s8814_s3] sm:$0xff]  }
 0x1c0   : > { %8919 = vst [vmem:[#allocation59_spill] sm:$0xff] %v7292_v54  ;;  %v7294_v21 = vpop.f32.mrb[19].mxu1 }
 0x1c1   : > { %8920 = vst [vmem:[#allocation60_spill] sm:$0xff] %v7294_v21 }
 0x1c2   : > { %1430 = vmatmul.mubr.bf16.gmra.mrb[124].mxu1 %v7290_v2 }
 0x1c3   : > { %1472 = vmatprep.mubr.bf16.mxu1 %v6937_v15 }
 0x1c5   : > { %v7298_v31 = vpop.f32.mrb[20].mxu1 }
 0x1c6   : > { %8921 = vst [vmem:[#allocation61_spill] sm:$0xff] %v7298_v31  ;;  %v7300_v11 = vpop.f32.mrb[21].mxu1  ;;  %v8925_v31 = vmov 0  }
 0x1c7   : > { %8922 = vst [vmem:[#allocation62_spill] sm:$0xff] %v7300_v11  ;;  %v7302_v22 = vpop.f32.mrb[22].mxu1 }
 0x1c8   : > { %8923 = vst [vmem:[#allocation63_spill] sm:$0xff] %v7302_v22  ;;  %v7307_v0 = vpop.f32.mrb[23].mxu1 }
 0x1c9   : > { %8924 = vst [vmem:[#allocation64_spill] sm:$0xff] %v7307_v0  ;;  %v6424_v0 = vld [vmem:[%s8814_s3 + $0x10] sm:$0xff]  }
 0x1ca   : > { %1473 = vmatmul.mubr.bf16.vlgmr.msra.gmra.mrb[128].mxu1 %v6945_v41 }
 0x1cb   : > { %2275 = vmatpush1.bf16.msra.mxu1 %v6422_v32  ;;  %1482 = vmatprep.mubr.bf16.mxu1 %v6947_v43 }
 0x1cc   : > { %2276 = vmatprep.subr.bf16.mxu1 %v8925_v31 }
 0x1cd   : > { %v7315_v11 = vpop.f32.mrb[24].mxu1 }
 0x1ce   : > { %8926 = vst [vmem:[#allocation65_spill] sm:$0xff] %v7315_v11  ;;  %v7317_v22 = vpop.f32.mrb[25].mxu1 }
 0x1cf   : > { %8927 = vst [vmem:[#allocation66_spill] sm:$0xff] %v7317_v22  ;;  %v7319_v21 = vpop.f32.mrb[26].mxu1  ;;  %2277 = vmatpush1.bf16.msra.mxu1 %v6423_v59  ;;  %v6425_v22 = vld [vmem:[%s8814_s3 + $0x18] sm:$0xff]  }
 0x1d0   : > { %8928 = vst [vmem:[#allocation67_spill] sm:$0xff] %v7319_v21  ;;  %v7324_v32 = vpop.f32.mrb[27].mxu1  ;;  %2278 = vmatprep.subr.bf16.mxu1 %v8925_v31 }
 0x1d1   : > { %8929 = vst [vmem:[#allocation68_spill] sm:$0xff] %v7324_v32  ;;  %v6426_v32 = vld [vmem:[%s8814_s3 + $0x20] sm:$0xff]  }
 0x1d2   : > { %1483 = vmatmul.mubr.bf16.gmra.mrb[132].mxu1 %v6955_v51 }
 0x1d3   : > { %1492 = vmatprep.mubr.bf16.mxu1 %v6957_v53  ;;  %2279 = vmatpush1.bf16.msra.mxu1 %v6424_v0  ;;  %v6427_v0 = vld [vmem:[%s8814_s3 + $0x28] sm:$0xff]  }
 0x1d4   : > { %2280 = vmatprep.subr.bf16.mxu1 %v8925_v31 }
 0x1d5   : > { %v7333_v59 = vpop.f32.mrb[28].mxu1 }
 0x1d6   : > { %8930 = vst [vmem:[#allocation69_spill] sm:$0xff] %v7333_v59  ;;  %v7335_v21 = vpop.f32.mrb[29].mxu1 }
 0x1d7   : > { %8931 = vst [vmem:[#allocation70_spill] sm:$0xff] %v7335_v21  ;;  %v7337_v11 = vpop.f32.mrb[30].mxu1  ;;  %2281 = vmatpush1.bf16.msra.mxu1 %v6425_v22 }
 0x1d8   : > { %8932 = vst [vmem:[#allocation71_spill] sm:$0xff] %v7337_v11  ;;  %v7342_v54 = vpop.f32.mrb[31].mxu1  ;;  %2282 = vmatprep.subr.bf16.mxu1 %v8925_v31 }
 0x1d9   : > { %8933 = vst [vmem:[#allocation72_spill] sm:$0xff] %v7342_v54  ;;  %v6428_v54 = vld [vmem:[%s8814_s3 + $0x30] sm:$0xff]  }
 0x1da   : > { %1493 = vmatmul.mubr.bf16.gmra.mrb[136].mxu1 %v6965_v61 }
 0x1db   : > { %1502 = vmatprep.mubr.bf16.mxu1 %v6967_v63  ;;  %2283 = vmatpush1.bf16.msra.mxu1 %v6426_v32  ;;  %v6432_v32 = vld [vmem:[#allocation5 + $0x14] ss:$24 sps:$4 sm:$0xff]  }
 0x1dc   : > { %2284 = vmatprep.subr.bf16.mxu1 %v8925_v31  ;;  %1793 = vmatprep.subr.bf16.mxu0 %v6432_v32 }
 0x1dd   : > { %v7351_v22 = vpop.f32.mrb[32].mxu1  ;;  %1794 = vmatpush1.bf16.msra.mxu0 %v6434_v38  ;;  %v6438_v38 = vld [vmem:[#allocation5 + $0x74] ss:$24 sps:$4 sm:$0xff]  }
 0x1de   : > { %8934 = vst [vmem:[#allocation73_spill] sm:$0xff] %v7351_v22  ;;  %v7353_v11 = vpop.f32.mrb[33].mxu1 }
 0x1df   : > { %8935 = vst [vmem:[#allocation74_spill] sm:$0xff] %v7353_v11  ;;  %v7355_v21 = vpop.f32.mrb[34].mxu1  ;;  %2285 = vmatpush1.bf16.msra.mxu1 %v6427_v0  ;;  %v6429_v0 = vld [vmem:[%s8814_s3 + $0x38] sm:$0xff]  }
 0x1e0   : > { %8936 = vst [vmem:[#allocation75_spill] sm:$0xff] %v7355_v21  ;;  %v7360_v59 = vpop.f32.mrb[35].mxu1  ;;  %2286 = vmatprep.subr.bf16.mxu1 %v8925_v31  ;;  %v6435_v21 = vld [vmem:[#allocation5 + $0x44] ss:$24 sps:$4 sm:$0xff]  }
 0x1e1   : > { %8937 = vst [vmem:[#allocation76_spill] sm:$0xff] %v7360_v59  ;;  %v6437_v59 = vld [vmem:[#allocation5 + $0x40] ss:$24 sps:$4 sm:$0xff]   ;;  %1795 = vmatprep.subr.bf16.mxu0 %v6435_v21  ;;  %v6431_v21 = vld [vmem:[%s8814_s3 + $0x48] sm:$0xff]  }
 0x1e2   : > { %1503 = vmatmul.mubr.bf16.gmra.mrb[140].mxu1 %v6975_v6  ;;  %1796 = vmatpush1.bf16.msra.mxu0 %v6437_v59 }
 0x1e3   : > { %1512 = vmatprep.mubr.bf16.mxu1 %v6977_v7  ;;  %2287 = vmatpush1.bf16.msra.mxu1 %v6428_v54  ;;  %v6430_v54 = vld [vmem:[%s8814_s3 + $0x40] sm:$0xff]  }
 0x1e4   : > { %2288 = vmatprep.subr.bf16.mxu1 %v8925_v31  ;;  %1797 = vmatprep.subr.bf16.mxu0 %v6438_v38 }
 0x1e5   : > { %v7369_v11 = vpop.f32.mrb[36].mxu1 }
 0x1e6   : > { %8938 = vst [vmem:[#allocation77_spill] sm:$0xff] %v7369_v11  ;;  %v7371_v22 = vpop.f32.mrb[37].mxu1  ;;  %1798 = vmatpush1.bf16.msra.mxu0 %v6440_v49  ;;  %v6445_v49 = vld [vmem:[#allocation5 + $0xd4] ss:$24 sps:$4 sm:$0xff]   ;;  %v6447_v11 = vld [vmem:[#allocation5 + $0xd0] ss:$24 sps:$4 sm:$0xff]  }
 0x1e7   : > { %8939 = vst [vmem:[#allocation78_spill] sm:$0xff] %v7371_v22  ;;  %v7373_v37 = vpop.f32.mrb[38].mxu1  ;;  %2289 = vmatpush1.bf16.msra.mxu1 %v6429_v0  ;;  %v6442_v0 = vld [vmem:[#allocation5 + $0xa4] ss:$24 sps:$4 sm:$0xff]  }
 0x1e8   : > { %8940 = vst [vmem:[#allocation79_spill] sm:$0xff] %v7373_v37  ;;  %v7378_v32 = vpop.f32.mrb[39].mxu1  ;;  %2290 = vmatprep.subr.bf16.mxu1 %v8925_v31  ;;  %v6444_v37 = vld [vmem:[#allocation5 + $0xa0] ss:$24 sps:$4 sm:$0xff]   ;;  %1799 = vmatprep.subr.bf16.mxu0 %v6442_v0  ;;  %v6448_v0 = vld [vmem:[#allocation5 + $0x104] ss:$24 sps:$4 sm:$0xff]  }
 0x1e9   : > { %8941 = vst [vmem:[#allocation80_spill] sm:$0xff] %v7378_v32 }
 0x1ea   : > { %1513 = vmatmul.mubr.bf16.gmra.mrb[144].mxu1 %v6985_v17  ;;  %1800 = vmatpush1.bf16.msra.mxu0 %v6444_v37 }
 0x1eb   : > { %1522 = vmatprep.mubr.bf16.mxu1 %v6987_v18  ;;  %2291 = vmatpush1.bf16.msra.mxu1 %v6430_v54  ;;  %v6441_v54 = vld [vmem:[%s8814_s3 + $0x50] sm:$0xff]  }
 0x1ec   : > { %2292 = vmatprep.subr.bf16.mxu1 %v8925_v31  ;;  %1801 = vmatprep.subr.bf16.mxu0 %v6445_v49  ;;  %v6453_v49 = vld [vmem:[#allocation5 + $0x130] ss:$24 sps:$4 sm:$0xff]  }
 0x1ed   : > { %v7387_v32 = vpop.f32.mrb[40].mxu1 }
 0x1ee   : > { %8942 = vst [vmem:[#allocation81_spill] sm:$0xff] %v7387_v32  ;;  %v7389_v59 = vpop.f32.mrb[41].mxu1  ;;  %1802 = vmatpush1.bf16.msra.mxu0 %v6447_v11  ;;  %v6451_v32 = vld [vmem:[#allocation5 + $0x134] ss:$24 sps:$4 sm:$0xff]   ;;  %v6454_v11 = vld [vmem:[%s8814_s3 + $0x58] sm:$0xff]  }
 0x1ef   : > { %8943 = vst [vmem:[#allocation82_spill] sm:$0xff] %v7389_v59  ;;  %v7391_v22 = vpop.f32.mrb[42].mxu1  ;;  %2293 = vmatpush1.bf16.msra.mxu1 %v6431_v21  ;;  %1803 = vmatprep.subr.bf16.mxu0 %v6448_v0 }
 0x1f0   : > { %8944 = vst [vmem:[#allocation83_spill] sm:$0xff] %v7391_v22  ;;  %v7396_v38 = vpop.f32.mrb[43].mxu1  ;;  %2294 = vmatprep.subr.bf16.mxu1 %v8925_v31  ;;  %v6450_v22 = vld [vmem:[#allocation5 + $0x100] ss:$24 sps:$4 sm:$0xff]  }
 0x1f1   : > { %8945 = vst [vmem:[#allocation84_spill] sm:$0xff] %v7396_v38 }
 0x1f2   : > { %1523 = vmatmul.mubr.bf16.gmra.mrb[148].mxu1 %v6995_v27  ;;  %1804 = vmatpush1.bf16.msra.mxu0 %v6450_v22 }
 0x1f3   : > { %1532 = vmatprep.mubr.bf16.mxu1 %v6997_v28  ;;  %2295 = vmatpush1.bf16.msra.mxu1 %v6441_v54  ;;  %v6455_v54 = vld [vmem:[#allocation5 + $0x164] ss:$24 sps:$4 sm:$0xff]  }
 0x1f4   : > { %2296 = vmatprep.subr.bf16.mxu1 %v8925_v31  ;;  %1805 = vmatprep.subr.bf16.mxu0 %v6451_v32 }
 0x1f5   : > { %v7402_v21 = vpop.f32.mrb[44].mxu1 }
 0x1f6   : > { %8946 = vst [vmem:[#allocation85_spill] sm:$0xff] %v7402_v21  ;;  %v7404_v59 = vpop.f32.mrb[45].mxu1  ;;  %1806 = vmatpush1.bf16.msra.mxu0 %v6453_v49  ;;  %v6460_v21 = vld [vmem:[#allocation5 + $0x190] ss:$24 sps:$4 sm:$0xff]   ;;  %v6461_v49 = vld [vmem:[#allocation5 + $0x1c4] ss:$24 sps:$4 sm:$0xff]  }
 0x1f7   : > { %8947 = vst [vmem:[#allocation86_spill] sm:$0xff] %v7404_v59  ;;  %v7406_v38 = vpop.f32.mrb[46].mxu1  ;;  %2297 = vmatpush1.bf16.msra.mxu1 %v6454_v11  ;;  %1807 = vmatprep.subr.bf16.mxu0 %v6455_v54  ;;  %v6458_v59 = vld [vmem:[#allocation5 + $0x194] ss:$24 sps:$4 sm:$0xff]  }
 0x1f8   : > { %8948 = vst [vmem:[#allocation87_spill] sm:$0xff] %v7406_v38  ;;  %v7408_v37 = vpop.f32.mrb[47].mxu1  ;;  %v6457_v38 = vld [vmem:[#allocation5 + $0x160] ss:$24 sps:$4 sm:$0xff]   ;;  %2298 = vmatprep.subr.bf16.mxu1 %v8925_v31 }
 0x1f9   : > { %8949 = vst [vmem:[#allocation88_spill] sm:$0xff] %v7408_v37 }
 0x1fa   : > { %1533 = vmatmul.mubr.bf16.gmra.mrb[152].mxu1 %v7005_v34  ;;  %1808 = vmatpush1.bf16.msra.mxu0 %v6457_v38  ;;  %v6464_v38 = vld [vmem:[#allocation5 + $0x1f4] ss:$24 sps:$4 sm:$0xff]  }
 0x1fb   : > { %1542 = vmatprep.mubr.bf16.mxu1 %v7007_v35  ;;  %1809 = vmatprep.subr.bf16.mxu0 %v6458_v59  ;;  %v6467_v59 = vld [vmem:[%s8814_s3 + $0x60] sm:$0xff]  }
 0x1fc   : > { %2299 = vmatpush1.bf16.msra.mxu1 %v6467_v59 }
 0x1fd   : > { %v7415_v0 = vpop.f32.mrb[48].mxu1  ;;  %2300 = vmatprep.subr.bf16.mxu1 %v8925_v31 }
 0x1fe   : > { %8950 = vst [vmem:[#allocation89_spill] sm:$0xff] %v7415_v0  ;;  %v7418_v22 = vpop.f32.mrb[49].mxu1  ;;  %1810 = vmatpush1.bf16.msra.mxu0 %v6460_v21  ;;  %v6463_v0 = vld [vmem:[#allocation5 + $0x1c0] ss:$24 sps:$4 sm:$0xff]   ;;  %v6468_v21 = vld [vmem:[#allocation5 + $0x224] ss:$24 sps:$4 sm:$0xff]  }
 0x1ff   : > { %8951 = vst [vmem:[#allocation90_spill] sm:$0xff] %v7418_v22  ;;  %v7420_v37 = vpop.f32.mrb[50].mxu1  ;;  %1811 = vmatprep.subr.bf16.mxu0 %v6461_v49 }
 0x200   : > { %8952 = vst [vmem:[#allocation91_spill] sm:$0xff] %v7420_v37  ;;  %v7422_v32 = vpop.f32.mrb[51].mxu1 }
 0x201   : > { %8953 = vst [vmem:[#allocation92_spill] sm:$0xff] %v7422_v32  ;;  %v6466_v32 = vld [vmem:[#allocation5 + $0x1f0] ss:$24 sps:$4 sm:$0xff]  }
 0x202   : > { %1543 = vmatmul.mubr.bf16.gmra.mrb[156].mxu1 %v7015_v44  ;;  %1812 = vmatpush1.bf16.msra.mxu0 %v6463_v0 }
 0x203   : > { %1552 = vmatprep.mubr.bf16.mxu1 %v7017_v45  ;;  %1813 = vmatprep.subr.bf16.mxu0 %v6464_v38 }
 0x205   : > { %v7426_v11 = vpop.f32.mrb[52].mxu1 }
 0x206   : > { %8954 = vst [vmem:[#allocation93_spill] sm:$0xff] %v7426_v11  ;;  %v7428_v15 = vpop.f32.mrb[53].mxu1  ;;  %1814 = vmatpush1.bf16.msra.mxu0 %v6466_v32  ;;  %v6473_v11 = vld [vmem:[#allocation5 + $0x250] ss:$24 sps:$4 sm:$0xff]   ;;  %v6474_v32 = vld [vmem:[#allocation5 + $0x284] ss:$24 sps:$4 sm:$0xff]  }
 0x207   : > { %8955 = vst [vmem:[#allocation94_spill] sm:$0xff] %v7428_v15  ;;  %v7430_v54 = vpop.f32.mrb[54].mxu1  ;;  %1815 = vmatprep.subr.bf16.mxu0 %v6468_v21  ;;  %v6471_v15 = vld [vmem:[#allocation5 + $0x254] ss:$24 sps:$4 sm:$0xff]  }
 0x208   : > { %8956 = vst [vmem:[#allocation95_spill] sm:$0xff] %v7430_v54  ;;  %v7432_v37 = vpop.f32.mrb[55].mxu1  ;;  %v6470_v54 = vld [vmem:[#allocation5 + $0x220] ss:$24 sps:$4 sm:$0xff]  }
 0x209   : > { %8957 = vst [vmem:[#allocation96_spill] sm:$0xff] %v7432_v37 }
 0x20a   : > { %1553 = vmatmul.mubr.bf16.gmra.mrb[160].mxu1 %v7025_v50  ;;  %1816 = vmatpush1.bf16.msra.mxu0 %v6470_v54  ;;  %v6477_v54 = vld [vmem:[#allocation5 + $0x2b4] ss:$24 sps:$4 sm:$0xff]  }
 0x20b   : > { %1562 = vmatprep.mubr.bf16.mxu1 %v7027_v52  ;;  %1817 = vmatprep.subr.bf16.mxu0 %v6471_v15  ;;  %v6480_v15 = vld [vmem:[%s8814_s3 + $0x68] sm:$0xff]  }
 0x20c   : > { %2301 = vmatpush1.bf16.msra.mxu1 %v6480_v15  ;;  %v2595_v15 = vld [vmem:[#allocation8] sm:$0xff] }
 0x20d   : > { %v7439_v49 = vpop.f32.mrb[56].mxu1  ;;  %2302 = vmatprep.subr.bf16.mxu1 %v8925_v31 }
 0x20e   : > { %8958 = vst [vmem:[#allocation97_spill] sm:$0xff] %v7439_v49  ;;  %v7442_v0 = vpop.f32.mrb[57].mxu1  ;;  %1818 = vmatpush1.bf16.msra.mxu0 %v6473_v11  ;;  %v6476_v49 = vld [vmem:[#allocation5 + $0x280] ss:$24 sps:$4 sm:$0xff]   ;;  %v6481_v11 = vld [vmem:[#allocation5 + $0x2e4] ss:$24 sps:$4 sm:$0xff]  }
 0x20f   : > { %8959 = vst [vmem:[#allocation98_spill] sm:$0xff] %v7442_v0  ;;  %v7444_v37 = vpop.f32.mrb[58].mxu1  ;;  %1819 = vmatprep.subr.bf16.mxu0 %v6474_v32 }
 0x210   : > { %8960 = vst [vmem:[#allocation99_spill] sm:$0xff] %v7444_v37  ;;  %v7446_v38 = vpop.f32.mrb[59].mxu1 }
 0x211   : > { %8961 = vst [vmem:[#allocation100_spill] sm:$0xff] %v7446_v38  ;;  %v6479_v38 = vld [vmem:[#allocation5 + $0x2b0] ss:$24 sps:$4 sm:$0xff]  }
 0x212   : > { %1563 = vmatmul.mubr.bf16.gmra.mrb[164].mxu1 %v7035_v60  ;;  %1820 = vmatpush1.bf16.msra.mxu0 %v6476_v49 }
 0x213   : > { %1572 = vmatprep.mubr.bf16.mxu1 %v7037_v62  ;;  %1821 = vmatprep.subr.bf16.mxu0 %v6477_v54 }
 0x215   : > { %v7450_v59 = vpop.f32.mrb[60].mxu1 }
 0x216   : > { %8962 = vst [vmem:[#allocation101_spill] sm:$0xff] %v7450_v59  ;;  %v7452_v22 = vpop.f32.mrb[61].mxu1  ;;  %1822 = vmatpush1.bf16.msra.mxu0 %v6479_v38 }
 0x217   : > { %8963 = vst [vmem:[#allocation102_spill] sm:$0xff] %v7452_v22  ;;  %v7454_v21 = vpop.f32.mrb[62].mxu1  ;;  %1823 = vmatprep.subr.bf16.mxu0 %v6481_v11  ;;  %v5268_v11 = vcombine.high %v2595_v15, %v2595_v15 }
 0x218   : > { %8964 = vst [vmem:[#allocation103_spill] sm:$0xff] %v7454_v21  ;;  %v7456_v37 = vpop.f32.mrb[63].mxu1  ;;  %v6483_v21 = vld [vmem:[#allocation5 + $0x2e0] ss:$24 sps:$4 sm:$0xff]  }
 0x219   : > { %8965 = vst [vmem:[#allocation104_spill] sm:$0xff] %v7456_v37 }
 0x21a   : > { %1573 = vmatmul.mubr.bf16.gmra.mrb[168].mxu1 %v7045_v4  ;;  %1824 = vmatpush1.bf16.msra.mxu0 %v6483_v21 }
 0x21b   : > { %1582 = vmatprep.mubr.bf16.mxu1 %v7047_v5  ;;  %5271 = vmatprep.subr.msk.bf16.mxu0 %vm2704_vm0, %v5268_v11 }
 0x21d   : > { %v7463_v32 = vpop.f32.mrb[64].mxu1  ;;  %1826 = vmatmul.mubr.bf16.vlgmr.msra.gmra.mrb[0].mxu0 %v6945_v41 }
 0x21e   : > { %8966 = vst [vmem:[#allocation105_spill] sm:$0xff] %v7463_v32  ;;  %v7466_v49 = vpop.f32.mrb[65].mxu1  ;;  %1835 = vmatprep.mubr.bf16.mxu0 %v6947_v43 }
 0x21f   : > { %8967 = vst [vmem:[#allocation106_spill] sm:$0xff] %v7466_v49  ;;  %v7468_v37 = vpop.f32.mrb[66].mxu1  ;;  %v5267_v49 = vcombine.low %v2595_v15, %v2595_v15  ;;  %v6486_v15 = vld [vmem:[%s8814_s3 + $0x70] sm:$0xff]  }
 0x220   : > { %8968 = vst [vmem:[#allocation107_spill] sm:$0xff] %v7468_v37  ;;  %v7470_v54 = vpop.f32.mrb[67].mxu1  ;;  %2303 = vmatpush1.bf16.msra.mxu1 %v6486_v15 }
 0x221   : > { %8969 = vst [vmem:[#allocation108_spill] sm:$0xff] %v7470_v54  ;;  %v2706_v21 = vsel %vm2704_vm0, %v5267_v49, 0  ;;  %2304 = vmatprep.subr.bf16.mxu1 %v8925_v31 }
 0x222   : > { %1583 = vmatmul.mubr.bf16.gmra.mrb[172].mxu1 %v7055_v14  ;;  %2718 = vmatpush1.bf16.msra.mxu0 %v2706_v21 }
 0x223   : > { %1592 = vmatprep.mubr.bf16.mxu1 %v7057_v16 }
 0x225   : > { %v7476_v38 = vpop.f32.mrb[68].mxu1  ;;  %1836 = vmatmul.mubr.bf16.gmra.mrb[4].mxu0 %v6955_v51 }
 0x226   : > { %8970 = vst [vmem:[#allocation109_spill] sm:$0xff] %v7476_v38  ;;  %v7478_v32 = vpop.f32.mrb[69].mxu1  ;;  %1845 = vmatprep.mubr.bf16.mxu0 %v6957_v53 }
 0x227   : > { %8971 = vst [vmem:[#allocation110_spill] sm:$0xff] %v7478_v32  ;;  %v7480_v37 = vpop.f32.mrb[70].mxu1 }
 0x228   : > { %8972 = vst [vmem:[#allocation111_spill] sm:$0xff] %v7480_v37  ;;  %v7482_v54 = vpop.f32.mrb[71].mxu1 }
 0x229   : > { %8973 = vst [vmem:[#allocation112_spill] sm:$0xff] %v7482_v54 }
 0x22a   : > { %1593 = vmatmul.mubr.bf16.gmra.mrb[176].mxu1 %v7065_v23 }
 0x22b   : > { %1602 = vmatprep.mubr.bf16.mxu1 %v7067_v24 }
 0x22d   : > { %v7490_v32 = vpop.f32.mrb[72].mxu1  ;;  %1846 = vmatmul.mubr.bf16.gmra.mrb[8].mxu0 %v6965_v61 }
 0x22e   : > { %8974 = vst [vmem:[#allocation113_spill] sm:$0xff] %v7490_v32  ;;  %v7495_v54 = vpop.f32.mrb[73].mxu1  ;;  %1855 = vmatprep.mubr.bf16.mxu0 %v6967_v63 }
 0x22f   : > { %8975 = vst [vmem:[#allocation114_spill] sm:$0xff] %v7495_v54  ;;  %v7497_v11 = vpop.f32.mrb[74].mxu1 }
 0x230   : > { %8976 = vst [vmem:[#allocation115_spill] sm:$0xff] %v7497_v11  ;;  %v7499_v49 = vpop.f32.mrb[75].mxu1 }
 0x231   : > { %8977 = vst [vmem:[#allocation116_spill] sm:$0xff] %v7499_v49 }
 0x232   : > { %1603 = vmatmul.mubr.bf16.gmra.mrb[180].mxu1 %v7075_v33 }
 0x233   : > { %1612 = vmatprep.mubr.bf16.mxu1 %v7077_v36 }
 0x235   : > { %v7506_v21 = vpop.f32.mrb[76].mxu1  ;;  %1856 = vmatmul.mubr.bf16.gmra.mrb[12].mxu0 %v6975_v6 }
 0x236   : > { %8978 = vst [vmem:[#allocation117_spill] sm:$0xff] %v7506_v21  ;;  %v7508_v32 = vpop.f32.mrb[77].mxu1  ;;  %1865 = vmatprep.mubr.bf16.mxu0 %v6977_v7  ;;  %v6487_v21 = vld [vmem:[%s8814_s3 + $0x78] sm:$0xff]  }
 0x237   : > { %8979 = vst [vmem:[#allocation118_spill] sm:$0xff] %v7508_v32  ;;  %v7510_v54 = vpop.f32.mrb[78].mxu1  ;;  %2305 = vmatpush1.bf16.msra.mxu1 %v6487_v21 }
 0x238   : > { %8980 = vst [vmem:[#allocation119_spill] sm:$0xff] %v7510_v54  ;;  %v7512_v11 = vpop.f32.mrb[79].mxu1 }
 0x239   : > { %8981 = vst [vmem:[#allocation120_spill] sm:$0xff] %v7512_v11 }
 0x23a   : > { %1613 = vmatmul.mubr.bf16.gmra.mrb[184].mxu1 %v7085_v42 }
 0x23b   : > { %1622 = vmatprep.mubr.bf16.mxu1 %v7087_v46 }
 0x23d   : > { %v7518_v15 = vpop.f32.mrb[80].mxu1  ;;  %1866 = vmatmul.mubr.bf16.gmra.mrb[16].mxu0 %v6985_v17 }
 0x23e   : > { %8982 = vst [vmem:[#allocation121_spill] sm:$0xff] %v7518_v15  ;;  %v7523_v49 = vpop.f32.mrb[81].mxu1  ;;  %1875 = vmatprep.mubr.bf16.mxu0 %v6987_v18 }
 0x23f   : > { %8983 = vst [vmem:[#allocation122_spill] sm:$0xff] %v7523_v49  ;;  %v7525_v32 = vpop.f32.mrb[82].mxu1 }
 0x240   : > { %8984 = vst [vmem:[#allocation123_spill] sm:$0xff] %v7525_v32  ;;  %v7527_v11 = vpop.f32.mrb[83].mxu1 }
 0x241   : > { %8985 = vst [vmem:[#allocation124_spill] sm:$0xff] %v7527_v11 }
 0x242   : > { %1623 = vmatmul.mubr.bf16.gmra.mrb[188].mxu1 %v7095_v57 }
 0x243   : > { %1632 = vmatprep.mubr.bf16.mxu1 %v7097_v58 }
 0x245   : > { %v7533_v15 = vpop.f32.mrb[84].mxu1  ;;  %1876 = vmatmul.mubr.bf16.gmra.mrb[20].mxu0 %v6995_v27 }
 0x246   : > { %8986 = vst [vmem:[#allocation125_spill] sm:$0xff] %v7533_v15  ;;  %v7535_v54 = vpop.f32.mrb[85].mxu1  ;;  %1885 = vmatprep.mubr.bf16.mxu0 %v6997_v28 }
 0x247   : > { %8987 = vst [vmem:[#allocation126_spill] sm:$0xff] %v7535_v54  ;;  %v7537_v37 = vpop.f32.mrb[86].mxu1 }
 0x248   : > { %8988 = vst [vmem:[#allocation127_spill] sm:$0xff] %v7537_v37  ;;  %v7539_v49 = vpop.f32.mrb[87].mxu1 }
 0x249   : > { %8989 = vst [vmem:[#allocation128_spill] sm:$0xff] %v7539_v49 }
 0x24a   : > { %1633 = vmatmul.mubr.bf16.gmra.mrb[192].mxu1 %v7105_v3 }
 0x24b   : > { %1642 = vmatprep.mubr.bf16.mxu1 %v7107_v8 }
 0x24d   : > { %v7545_v21 = vpop.f32.mrb[88].mxu1  ;;  %1886 = vmatmul.mubr.bf16.gmra.mrb[24].mxu0 %v7005_v34 }
 0x24e   : > { %8990 = vst [vmem:[#allocation129_spill] sm:$0xff] %v7545_v21  ;;  %v7547_v11 = vpop.f32.mrb[89].mxu1  ;;  %1895 = vmatprep.mubr.bf16.mxu0 %v7007_v35 }
 0x24f   : > { %8991 = vst [vmem:[#allocation130_spill] sm:$0xff] %v7547_v11  ;;  %v7549_v32 = vpop.f32.mrb[90].mxu1 }
 0x250   : > { %8992 = vst [vmem:[#allocation131_spill] sm:$0xff] %v7549_v32  ;;  %v7551_v15 = vpop.f32.mrb[91].mxu1 }
 0x251   : > { %8993 = vst [vmem:[#allocation132_spill] sm:$0xff] %v7551_v15 }
 0x252   : > { %1643 = vmatmul.mubr.bf16.gmra.mrb[196].mxu1 %v7116_v19 }
 0x253   : > { %1652 = vmatprep.mubr.bf16.mxu1 %v7118_v20 }
 0x255   : > { %v7557_v49 = vpop.f32.mrb[92].mxu1  ;;  %1896 = vmatmul.mubr.bf16.gmra.mrb[28].mxu0 %v7015_v44 }
 0x256   : > { %8994 = vst [vmem:[#allocation133_spill] sm:$0xff] %v7557_v49  ;;  %v7559_v37 = vpop.f32.mrb[93].mxu1  ;;  %1905 = vmatprep.mubr.bf16.mxu0 %v7017_v45 }
 0x257   : > { %8995 = vst [vmem:[#allocation134_spill] sm:$0xff] %v7559_v37  ;;  %v7561_v54 = vpop.f32.mrb[94].mxu1 }
 0x258   : > { %8996 = vst [vmem:[#allocation135_spill] sm:$0xff] %v7561_v54  ;;  %v7563_v21 = vpop.f32.mrb[95].mxu1 }
 0x259   : > { %8997 = vst [vmem:[#allocation136_spill] sm:$0xff] %v7563_v21 }
 0x25a   : > { %1653 = vmatmul.mubr.bf16.gmra.mrb[200].mxu1 %v7126_v29 }
 0x25b   : > { %1662 = vmatprep.mubr.bf16.mxu1 %v7128_v30 }
 0x25d   : > { %v7569_v15 = vpop.f32.mrb[96].mxu1  ;;  %1906 = vmatmul.mubr.bf16.gmra.mrb[32].mxu0 %v7025_v50 }
 0x25e   : > { %8998 = vst [vmem:[#allocation137_spill] sm:$0xff] %v7569_v15  ;;  %v7571_v32 = vpop.f32.mrb[97].mxu1  ;;  %1915 = vmatprep.mubr.bf16.mxu0 %v7027_v52 }
 0x25f   : > { %8999 = vst [vmem:[#allocation138_spill] sm:$0xff] %v7571_v32  ;;  %v7573_v11 = vpop.f32.mrb[98].mxu1 }
 0x260   : > { %9000 = vst [vmem:[#allocation139_spill] sm:$0xff] %v7573_v11  ;;  %v7575_v49 = vpop.f32.mrb[99].mxu1 }
 0x261   : > { %9001 = vst [vmem:[#allocation140_spill] sm:$0xff] %v7575_v49 }
 0x262   : > { %1663 = vmatmul.mubr.bf16.gmra.mrb[204].mxu1 %v7136_v39 }
 0x263   : > { %1672 = vmatprep.mubr.bf16.mxu1 %v7138_v40 }
 0x265   : > { %v7581_v21 = vpop.f32.mrb[100].mxu1  ;;  %1916 = vmatmul.mubr.bf16.gmra.mrb[36].mxu0 %v7035_v60 }
 0x266   : > { %9002 = vst [vmem:[#allocation141_spill] sm:$0xff] %v7581_v21  ;;  %v7583_v54 = vpop.f32.mrb[101].mxu1  ;;  %1925 = vmatprep.mubr.bf16.mxu0 %v7037_v62 }
 0x267   : > { %9003 = vst [vmem:[#allocation142_spill] sm:$0xff] %v7583_v54  ;;  %v7585_v37 = vpop.f32.mrb[102].mxu1 }
 0x268   : > { %9004 = vst [vmem:[#allocation143_spill] sm:$0xff] %v7585_v37  ;;  %v7587_v15 = vpop.f32.mrb[103].mxu1 }
 0x269   : > { %9005 = vst [vmem:[#allocation144_spill] sm:$0xff] %v7587_v15 }
 0x26a   : > { %1673 = vmatmul.mubr.bf16.gmra.mrb[208].mxu1 %v7146_v55 }
 0x26b   : > { %1682 = vmatprep.mubr.bf16.mxu1 %v7148_v56 }
 0x26d   : > { %v7593_v49 = vpop.f32.mrb[104].mxu1  ;;  %1926 = vmatmul.mubr.bf16.gmra.mrb[40].mxu0 %v7045_v4 }
 0x26e   : > { %9006 = vst [vmem:[#allocation145_spill] sm:$0xff] %v7593_v49  ;;  %v7595_v11 = vpop.f32.mrb[105].mxu1  ;;  %1935 = vmatprep.mubr.bf16.mxu0 %v7047_v5 }
 0x26f   : > { %9007 = vst [vmem:[#allocation146_spill] sm:$0xff] %v7595_v11  ;;  %v7597_v32 = vpop.f32.mrb[106].mxu1 }
 0x270   : > { %9008 = vst [vmem:[#allocation147_spill] sm:$0xff] %v7597_v32  ;;  %v7599_v21 = vpop.f32.mrb[107].mxu1 }
 0x271   : > { %9009 = vst [vmem:[#allocation148_spill] sm:$0xff] %v7599_v21 }
 0x272   : > { %1683 = vmatmul.mubr.bf16.gmra.mrb[212].mxu1 %v7156_v9 }
 0x273   : > { %1692 = vmatprep.mubr.bf16.mxu1 %v7158_v10 }
 0x275   : > { %v7605_v15 = vpop.f32.mrb[108].mxu1  ;;  %1936 = vmatmul.mubr.bf16.gmra.mrb[44].mxu0 %v7055_v14 }
 0x276   : > { %9010 = vst [vmem:[#allocation149_spill] sm:$0xff] %v7605_v15  ;;  %v7607_v37 = vpop.f32.mrb[109].mxu1  ;;  %1945 = vmatprep.mubr.bf16.mxu0 %v7057_v16 }
 0x277   : > { %9011 = vst [vmem:[#allocation150_spill] sm:$0xff] %v7607_v37  ;;  %v7609_v54 = vpop.f32.mrb[110].mxu1 }
 0x278   : > { %9012 = vst [vmem:[#allocation151_spill] sm:$0xff] %v7609_v54  ;;  %v7611_v49 = vpop.f32.mrb[111].mxu1 }
 0x279   : > { %9013 = vst [vmem:[#allocation152_spill] sm:$0xff] %v7611_v49 }
 0x27a   : > { %1693 = vmatmul.mubr.bf16.gmra.mrb[216].mxu1 %v7166_v25 }
 0x27b   : > { %1702 = vmatprep.mubr.bf16.mxu1 %v7168_v26 }
 0x27d   : > { %v7617_v21 = vpop.f32.mrb[112].mxu1  ;;  %1946 = vmatmul.mubr.bf16.gmra.mrb[48].mxu0 %v7065_v23 }
 0x27e   : > { %9014 = vst [vmem:[#allocation153_spill] sm:$0xff] %v7617_v21  ;;  %v7619_v32 = vpop.f32.mrb[113].mxu1  ;;  %1955 = vmatprep.mubr.bf16.mxu0 %v7067_v24 }
 0x27f   : > { %9015 = vst [vmem:[#allocation154_spill] sm:$0xff] %v7619_v32  ;;  %v7621_v11 = vpop.f32.mrb[114].mxu1 }
 0x280   : > { %9016 = vst [vmem:[#allocation155_spill] sm:$0xff] %v7621_v11  ;;  %v7623_v15 = vpop.f32.mrb[115].mxu1  ;;  %v9022_v11 = vld [vmem:[#allocation30_spill] sm:$0xff] }
 0x281   : > { %9017 = vst [vmem:[#allocation156_spill] sm:$0xff] %v7623_v15 }
 0x282   : > { %1703 = vmatmul.mubr.bf16.gmra.mrb[220].mxu1 %v7176_v47 }
 0x283   : > { %1712 = vmatprep.mubr.bf16.mxu1 %v7178_v48 }
 0x285   : > { %v7629_v49 = vpop.f32.mrb[116].mxu1  ;;  %1956 = vmatmul.mubr.bf16.gmra.mrb[52].mxu0 %v7075_v33  ;;  %v9034_v33 = vld [vmem:[#allocation33_spill] sm:$0xff] }
 0x286   : > { %9018 = vst [vmem:[#allocation157_spill] sm:$0xff] %v7629_v49  ;;  %v7631_v54 = vpop.f32.mrb[117].mxu1  ;;  %1965 = vmatprep.mubr.bf16.mxu0 %v7077_v36  ;;  %v577_v49 = vlaneseq  ;;  %v575_v36 = vld [vmem:[#allocation7] sm:$0x3f] }
 0x287   : > { %9019 = vst [vmem:[#allocation158_spill] sm:$0xff] %v7631_v54  ;;  %v7633_v37 = vpop.f32.mrb[118].mxu1 }
 0x288   : > { %9020 = vst [vmem:[#allocation159_spill] sm:$0xff] %v7633_v37  ;;  %v7635_v21 = vpop.f32.mrb[119].mxu1  ;;  %v9027_v37 = vld [vmem:[#allocation31_spill] sm:$0xff]  ;;  %v7652_v22 = vshrl.u32 %v577_v49, 7 }
 0x289   : > { %9021 = vst [vmem:[#allocation160_spill] sm:$0xff] %v7635_v21  ;;  %v9028_v21 = vld [vmem:[#allocation32_spill] sm:$0xff] }
 0x28a   : > { %1713 = vmatmul.mubr.bf16.gmra.mrb[224].mxu1 %v7186_v1  ;;  %9029 = vst [vmem:[#allocation31_spill] sm:$0xff] %v7652_v22 }
 0x28b   : > { %1722 = vmatprep.mubr.bf16.mxu1 %v9022_v11 }
 0x28d   : > { %v7641_v15 = vpop.f32.mrb[120].mxu1  ;;  %1966 = vmatmul.mubr.bf16.gmra.mrb[56].mxu0 %v7085_v42 }
 0x28e   : > { %9023 = vst [vmem:[#allocation30_spill] sm:$0xff] %v7641_v15  ;;  %v7643_v32 = vpop.f32.mrb[121].mxu1  ;;  %1975 = vmatprep.mubr.bf16.mxu0 %v7087_v46  ;;  %v9035_v46 = vld [vmem:[#allocation34_spill] sm:$0xff] }
 0x28f   : > { %9024 = vst [vmem:[#allocation161_spill] sm:$0xff] %v7643_v32  ;;  %v7645_v38 = vpop.f32.mrb[122].mxu1 }
 0x290   : > { %9025 = vst [vmem:[#allocation162_spill] sm:$0xff] %v7645_v38  ;;  %v7647_v54 = vpop.f32.mrb[123].mxu1  ;;  %v587_v38 = vsub.s32 2, %v7652_v22 }
 0x291   : > { %9026 = vst [vmem:[#allocation163_spill] sm:$0xff] %v7647_v54  ;;  %v591_v54 = vsub.s32 3, %v7652_v22 }
 0x292   : > { %1723 = vmatmul.mubr.bf16.gmra.mrb[228].mxu1 %v9027_v37  ;;  %v7666_v42 = vrot.slane %v575_v36, %v587_v38 }
 0x293   : > { %1732 = vmatprep.mubr.bf16.mxu1 %v9028_v21  ;;  %v7668_v49 = vrot.slane %v575_v36, %v591_v54  ;;  %v9036_v54 = vld [vmem:[#allocation37_spill] sm:$0xff] }
 0x295   : > { %v7655_v59 = vpop.f32.mrb[124].mxu1  ;;  %1976 = vmatmul.mubr.bf16.gmra.mrb[60].mxu0 %v7095_v57 }
 0x296   : > { %9030 = vst [vmem:[#allocation32_spill] sm:$0xff] %v7655_v59  ;;  %v7657_v15 = vpop.f32.mrb[125].mxu1  ;;  %1985 = vmatprep.mubr.bf16.mxu0 %v7097_v58 }
 0x297   : > { %9031 = vst [vmem:[#allocation164_spill] sm:$0xff] %v7657_v15  ;;  %v7660_v32 = vpop.f32.mrb[126].mxu1 }
 0x298   : > { %9032 = vst [vmem:[#allocation165_spill] sm:$0xff] %v7660_v32  ;;  %v7663_v0 = vpop.f32.mrb[127].mxu1 }
 0x299   : > { %9033 = vst [vmem:[#allocation166_spill] sm:$0xff] %v7663_v0 }
 0x29a   : > { %1733 = vmatmul.mubr.bf16.gmra.mrb[232].mxu1 %v9034_v33 }
 0x29b   : > { %1742 = vmatprep.mubr.bf16.mxu1 %v9035_v46 }
 0x29d   : > { %v1474_v15 = vpop.f32.mrb[128].mxu1  ;;  %1986 = vmatmul.mubr.bf16.gmra.mrb[64].mxu0 %v7105_v3 }
 0x29e   : > { %v1475_v32 = vadd.f32 %v1474_v15, %v7666_v42  ;;  %v1476_v59 = vpop.f32.mrb[129].mxu1  ;;  %v9037_v15 = vld [vmem:[#allocation39_spill] sm:$0xff]  ;;  %1995 = vmatprep.mubr.bf16.mxu0 %v7107_v8 }
 0x29f   : > { %v1477_v0 = vadd.f32 %v1476_v59, %v7668_v49  ;;  %v1478_v22 = vpop.f32.mrb[130].mxu1 }
 0x2a0   : > { %v1479_v24 = vadd.f32 %v1478_v22, %v7666_v42  ;;  %v1480_v38 = vpop.f32.mrb[131].mxu1 }
 0x2a1   : > { %v5537_v23 = vpack.c.bf16 %v1477_v0, %v1475_v32  ;;  %v1481_v36 = vadd.f32 %v1480_v38, %v7668_v49 }
 0x2a2   : > { %1743 = vmatmul.mubr.bf16.gmra.mrb[236].mxu1 %v9036_v54 }
 0x2a3   : > { %4832 = vst [vmem:[%s7679_s11 + $0x8] sm:$0xff] %v5537_v23  ;;  %v5540_v58 = vpack.c.bf16 %v1481_v36, %v1479_v24  ;;  %1752 = vmatprep.mubr.bf16.mxu1 %v9037_v15  ;;  %v9038_v36 = vld [vmem:[#allocation43_spill] sm:$0xff] }
 0x2a5   : > { %4835 = vst [vmem:[%s7679_s11 + $0x20] sm:$0xff] %v5540_v58  ;;  %v1484_v22 = vpop.f32.mrb[132].mxu1  ;;  %v9039_v58 = vld [vmem:[#allocation45_spill] sm:$0xff]  ;;  %1996 = vmatmul.mubr.bf16.gmra.mrb[68].mxu0 %v7116_v19 }
 0x2a6   : > { %v1485_v0 = vadd.f32 %v1484_v22, %v7666_v42  ;;  %v1486_v59 = vpop.f32.mrb[133].mxu1  ;;  %2005 = vmatprep.mubr.bf16.mxu0 %v7118_v20 }
 0x2a7   : > { %v1487_v32 = vadd.f32 %v1486_v59, %v7668_v49  ;;  %v1488_v38 = vpop.f32.mrb[134].mxu1 }
 0x2a8   : > { %v1489_v57 = vadd.f32 %v1488_v38, %v7666_v42  ;;  %v1490_v23 = vpop.f32.mrb[135].mxu1 }
 0x2a9   : > { %v5543_v16 = vpack.c.bf16 %v1487_v32, %v1485_v0  ;;  %v1491_v24 = vadd.f32 %v1490_v23, %v7668_v49 }
 0x2aa   : > { %1753 = vmatmul.mubr.bf16.gmra.mrb[240].mxu1 %v9038_v36 }
 0x2ab   : > { %4838 = vst [vmem:[%s7679_s11 + $0x38] sm:$0xff] %v5543_v16  ;;  %v5546_v8 = vpack.c.bf16 %v1491_v24, %v1489_v57  ;;  %1762 = vmatprep.mubr.bf16.mxu1 %v9039_v58  ;;  %v9040_v24 = vld [vmem:[#allocation49_spill] sm:$0xff] }
 0x2ad   : > { %4841 = vst [vmem:[%s7679_s11 + $0x50] sm:$0xff] %v5546_v8  ;;  %v1494_v22 = vpop.f32.mrb[136].mxu1  ;;  %v9041_v8 = vld [vmem:[#allocation51_spill] sm:$0xff]  ;;  %2006 = vmatmul.mubr.bf16.gmra.mrb[72].mxu0 %v7126_v29 }
 0x2ae   : > { %v1495_v59 = vadd.f32 %v1494_v22, %v7666_v42  ;;  %v1496_v38 = vpop.f32.mrb[137].mxu1  ;;  %2015 = vmatprep.mubr.bf16.mxu0 %v7128_v30 }
 0x2af   : > { %v1497_v0 = vadd.f32 %v1496_v38, %v7668_v49  ;;  %v1498_v32 = vpop.f32.mrb[138].mxu1 }
 0x2b0   : > { %v1499_v23 = vadd.f32 %v1498_v32, %v7666_v42  ;;  %v1500_v16 = vpop.f32.mrb[139].mxu1 }
 0x2b1   : > { %v5549_v3 = vpack.c.bf16 %v1497_v0, %v1495_v59  ;;  %v1501_v57 = vadd.f32 %v1500_v16, %v7668_v49 }
 0x2b2   : > { %1763 = vmatmul.mubr.bf16.gmra.mrb[244].mxu1 %v9040_v24 }
 0x2b3   : > { %4844 = vst [vmem:[%s7679_s11 + $0x68] sm:$0xff] %v5549_v3  ;;  %v5552_v20 = vpack.c.bf16 %v1501_v57, %v1499_v23  ;;  %1772 = vmatprep.mubr.bf16.mxu1 %v9041_v8 }
 0x2b5   : > { %4847 = vst [vmem:[%s7679_s11 + $0x80] sm:$0xff] %v5552_v20  ;;  %v1504_v22 = vpop.f32.mrb[140].mxu1  ;;  %2016 = vmatmul.mubr.bf16.gmra.mrb[76].mxu0 %v7136_v39 }
 0x2b6   : > { %v1505_v38 = vadd.f32 %v1504_v22, %v7666_v42  ;;  %v1506_v32 = vpop.f32.mrb[141].mxu1  ;;  %2025 = vmatprep.mubr.bf16.mxu0 %v7138_v40 }
 0x2b7   : > { %v1507_v59 = vadd.f32 %v1506_v32, %v7668_v49  ;;  %v1508_v0 = vpop.f32.mrb[142].mxu1 }
 0x2b8   : > { %v1509_v16 = vadd.f32 %v1508_v0, %v7666_v42  ;;  %v1510_v3 = vpop.f32.mrb[143].mxu1 }
 0x2b9   : > { %v5555_v19 = vpack.c.bf16 %v1507_v59, %v1505_v38  ;;  %v1511_v23 = vadd.f32 %v1510_v3, %v7668_v49 }
 0x2ba   : > { %1773 = vmatmul.mubr.bf16.gmra.mrb[248].mxu1 %v7274_v12 }
 0x2bb   : > { %4850 = vst [vmem:[%s7679_s11 + $0x98] sm:$0xff] %v5555_v19  ;;  %v5558_v57 = vpack.c.bf16 %v1511_v23, %v1509_v16  ;;  %1782 = vmatprep.mubr.bf16.mxu1 %v7278_v13 }
 0x2bd   : > { %4853 = vst [vmem:[%s7679_s11 + $0xb0] sm:$0xff] %v5558_v57  ;;  %v1514_v20 = vpop.f32.mrb[144].mxu1  ;;  %v9042_v57 = vld [vmem:[#allocation15_spill] sm:$0xff]  ;;  %2026 = vmatmul.mubr.bf16.gmra.mrb[80].mxu0 %v7146_v55 }
 0x2be   : > { %v1515_v22 = vadd.f32 %v1514_v20, %v7666_v42  ;;  %v1516_v32 = vpop.f32.mrb[145].mxu1  ;;  %2035 = vmatprep.mubr.bf16.mxu0 %v7148_v56 }
 0x2bf   : > { %v1517_v38 = vadd.f32 %v1516_v32, %v7668_v49  ;;  %v1518_v59 = vpop.f32.mrb[146].mxu1 }
 0x2c0   : > { %v1519_v0 = vadd.f32 %v1518_v59, %v7666_v42  ;;  %v1520_v19 = vpop.f32.mrb[147].mxu1 }
 0x2c1   : > { %v5561_v3 = vpack.c.bf16 %v1517_v38, %v1515_v22  ;;  %v1521_v16 = vadd.f32 %v1520_v19, %v7668_v49 }
 0x2c2   : > { %1783 = vmatmul.mubr.bf16.gmra.mrb[252].mxu1 %v7290_v2 }
 0x2c3   : > { %4856 = vst [vmem:[%s7679_s11 + $0xc8] sm:$0xff] %v5561_v3  ;;  %v5564_v23 = vpack.c.bf16 %v1521_v16, %v1519_v0  ;;  %2306 = vmatprep.mubr.bf16.mxu1 %v9042_v57 }
 0x2c5   : > { %4859 = vst [vmem:[%s7679_s11 + $0xe0] sm:$0xff] %v5564_v23  ;;  %v1524_v20 = vpop.f32.mrb[148].mxu1  ;;  %2036 = vmatmul.mubr.bf16.gmra.mrb[84].mxu0 %v7156_v9 }
 0x2c6   : > { %v1525_v32 = vadd.f32 %v1524_v20, %v7666_v42  ;;  %v1526_v59 = vpop.f32.mrb[149].mxu1  ;;  %2045 = vmatprep.mubr.bf16.mxu0 %v7158_v10 }
 0x2c7   : > { %v1527_v22 = vadd.f32 %v1526_v59, %v7668_v49  ;;  %v1528_v38 = vpop.f32.mrb[150].mxu1 }
 0x2c8   : > { %v1529_v19 = vadd.f32 %v1528_v38, %v7666_v42  ;;  %v1530_v3 = vpop.f32.mrb[151].mxu1 }
 0x2c9   : > { %v5567_v40 = vpack.c.bf16 %v1527_v22, %v1525_v32  ;;  %v1531_v0 = vadd.f32 %v1530_v3, %v7668_v49 }
 0x2ca   : > { %2307 = vmatmul.mubr.bf16.vlgmr.msra.gmra.mrb[128].mxu1 %v6945_v41 }
 0x2cb   : > { %4862 = vst [vmem:[%s7679_s11 + $0xf8] sm:$0xff] %v5567_v40  ;;  %v5570_v16 = vpack.c.bf16 %v1531_v0, %v1529_v19  ;;  %2314 = vmatprep.mubr.bf16.mxu1 %v6947_v43 }
 0x2cd   : > { %4865 = vst [vmem:[%s7679_s11 + $0x110] sm:$0xff] %v5570_v16  ;;  %v1534_v23 = vpop.f32.mrb[152].mxu1  ;;  %2046 = vmatmul.mubr.bf16.gmra.mrb[88].mxu0 %v7166_v25 }
 0x2ce   : > { %v1535_v57 = vadd.f32 %v1534_v23, %v7666_v42  ;;  %v1536_v20 = vpop.f32.mrb[153].mxu1  ;;  %2055 = vmatprep.mubr.bf16.mxu0 %v7168_v26 }
 0x2cf   : > { %v1537_v32 = vadd.f32 %v1536_v20, %v7668_v49  ;;  %v1538_v59 = vpop.f32.mrb[154].mxu1 }
 0x2d0   : > { %v1539_v41 = vadd.f32 %v1538_v59, %v7666_v42  ;;  %v1540_v40 = vpop.f32.mrb[155].mxu1 }
 0x2d1   : > { %v5573_v22 = vpack.c.bf16 %v1537_v32, %v1535_v57  ;;  %v1541_v38 = vadd.f32 %v1540_v40, %v7668_v49 }
 0x2d2   : > { %2315 = vmatmul.mubr.bf16.gmra.mrb[132].mxu1 %v6955_v51 }
 0x2d3   : > { %4868 = vst [vmem:[%s7679_s11 + $0x128] sm:$0xff] %v5573_v22  ;;  %v5576_v43 = vpack.c.bf16 %v1541_v38, %v1539_v41  ;;  %2322 = vmatprep.mubr.bf16.mxu1 %v6957_v53 }
 0x2d5   : > { %4871 = vst [vmem:[%s7679_s11 + $0x140] sm:$0xff] %v5576_v43  ;;  %v1544_v19 = vpop.f32.mrb[156].mxu1  ;;  %2056 = vmatmul.mubr.bf16.gmra.mrb[92].mxu0 %v7176_v47 }
 0x2d6   : > { %v1545_v3 = vadd.f32 %v1544_v19, %v7666_v42  ;;  %v1546_v0 = vpop.f32.mrb[157].mxu1  ;;  %2065 = vmatprep.mubr.bf16.mxu0 %v7178_v48 }
 0x2d7   : > { %v1547_v16 = vadd.f32 %v1546_v0, %v7668_v49  ;;  %v1548_v23 = vpop.f32.mrb[158].mxu1 }
 0x2d8   : > { %v1549_v51 = vadd.f32 %v1548_v23, %v7666_v42  ;;  %v1550_v57 = vpop.f32.mrb[159].mxu1 }
 0x2d9   : > { %v5579_v20 = vpack.c.bf16 %v1547_v16, %v1545_v3  ;;  %v1551_v32 = vadd.f32 %v1550_v57, %v7668_v49 }
 0x2da   : > { %2323 = vmatmul.mubr.bf16.gmra.mrb[136].mxu1 %v6965_v61 }
 0x2db   : > { %4874 = vst [vmem:[%s7679_s11 + $0x158] sm:$0xff] %v5579_v20  ;;  %v5582_v53 = vpack.c.bf16 %v1551_v32, %v1549_v51  ;;  %2330 = vmatprep.mubr.bf16.mxu1 %v6967_v63 }
 0x2dd   : > { %4877 = vst [vmem:[%s7679_s11 + $0x170] sm:$0xff] %v5582_v53  ;;  %v1554_v59 = vpop.f32.mrb[160].mxu1  ;;  %2066 = vmatmul.mubr.bf16.gmra.mrb[96].mxu0 %v7186_v1 }
 0x2de   : > { %v1555_v41 = vadd.f32 %v1554_v59, %v7666_v42  ;;  %v1556_v40 = vpop.f32.mrb[161].mxu1  ;;  %2075 = vmatprep.mubr.bf16.mxu0 %v9022_v11 }
 0x2df   : > { %v1557_v22 = vadd.f32 %v1556_v40, %v7668_v49  ;;  %v1558_v38 = vpop.f32.mrb[162].mxu1 }
 0x2e0   : > { %v1559_v61 = vadd.f32 %v1558_v38, %v7666_v42  ;;  %v1560_v43 = vpop.f32.mrb[163].mxu1 }
 0x2e1   : > { %v5585_v19 = vpack.c.bf16 %v1557_v22, %v1555_v41  ;;  %v1561_v3 = vadd.f32 %v1560_v43, %v7668_v49 }
 0x2e2   : > { %2331 = vmatmul.mubr.bf16.gmra.mrb[140].mxu1 %v6975_v6 }
 0x2e3   : > { %4880 = vst [vmem:[%s7679_s11 + $0x188] sm:$0xff] %v5585_v19  ;;  %v5588_v63 = vpack.c.bf16 %v1561_v3, %v1559_v61  ;;  %2338 = vmatprep.mubr.bf16.mxu1 %v6977_v7 }
 0x2e5   : > { %4883 = vst [vmem:[%s7679_s11 + $0x1a0] sm:$0xff] %v5588_v63  ;;  %v1564_v0 = vpop.f32.mrb[164].mxu1  ;;  %2076 = vmatmul.mubr.bf16.gmra.mrb[100].mxu0 %v9027_v37 }
 0x2e6   : > { %v1565_v16 = vadd.f32 %v1564_v0, %v7666_v42  ;;  %v1566_v23 = vpop.f32.mrb[165].mxu1  ;;  %2085 = vmatprep.mubr.bf16.mxu0 %v9028_v21 }
 0x2e7   : > { %v1567_v51 = vadd.f32 %v1566_v23, %v7668_v49  ;;  %v1568_v57 = vpop.f32.mrb[166].mxu1 }
 0x2e8   : > { %v1569_v6 = vadd.f32 %v1568_v57, %v7666_v42  ;;  %v1570_v20 = vpop.f32.mrb[167].mxu1 }
 0x2e9   : > { %v5591_v32 = vpack.c.bf16 %v1567_v51, %v1565_v16  ;;  %v1571_v53 = vadd.f32 %v1570_v20, %v7668_v49 }
 0x2ea   : > { %2339 = vmatmul.mubr.bf16.gmra.mrb[144].mxu1 %v6985_v17 }
 0x2eb   : > { %4886 = vst [vmem:[%s7679_s11 + $0x1b8] sm:$0xff] %v5591_v32  ;;  %v5594_v7 = vpack.c.bf16 %v1571_v53, %v1569_v6  ;;  %2346 = vmatprep.mubr.bf16.mxu1 %v6987_v18 }
 0x2ed   : > { %4889 = vst [vmem:[%s7679_s11 + $0x1d0] sm:$0xff] %v5594_v7  ;;  %v1574_v59 = vpop.f32.mrb[168].mxu1  ;;  %2086 = vmatmul.mubr.bf16.gmra.mrb[104].mxu0 %v9034_v33 }
 0x2ee   : > { %v1575_v41 = vadd.f32 %v1574_v59, %v7666_v42  ;;  %v1576_v40 = vpop.f32.mrb[169].mxu1  ;;  %2095 = vmatprep.mubr.bf16.mxu0 %v9035_v46 }
 0x2ef   : > { %v1577_v22 = vadd.f32 %v1576_v40, %v7668_v49  ;;  %v1578_v38 = vpop.f32.mrb[170].mxu1 }
 0x2f0   : > { %v1579_v17 = vadd.f32 %v1578_v38, %v7666_v42  ;;  %v1580_v61 = vpop.f32.mrb[171].mxu1 }
 0x2f1   : > { %v5597_v43 = vpack.c.bf16 %v1577_v22, %v1575_v41  ;;  %v1581_v19 = vadd.f32 %v1580_v61, %v7668_v49 }
 0x2f2   : > { %2347 = vmatmul.mubr.bf16.gmra.mrb[148].mxu1 %v6995_v27 }
 0x2f3   : > { %4892 = vst [vmem:[%s7679_s11 + $0x1e8] sm:$0xff] %v5597_v43  ;;  %v5600_v18 = vpack.c.bf16 %v1581_v19, %v1579_v17  ;;  %2354 = vmatprep.mubr.bf16.mxu1 %v6997_v28 }
 0x2f5   : > { %4895 = vst [vmem:[%s7679_s11 + $0x200] sm:$0xff] %v5600_v18  ;;  %v1584_v3 = vpop.f32.mrb[172].mxu1  ;;  %2096 = vmatmul.mubr.bf16.gmra.mrb[108].mxu0 %v9036_v54 }
 0x2f6   : > { %v1585_v63 = vadd.f32 %v1584_v3, %v7666_v42  ;;  %v1586_v0 = vpop.f32.mrb[173].mxu1  ;;  %2105 = vmatprep.mubr.bf16.mxu0 %v9037_v15 }
 0x2f7   : > { %v1587_v16 = vadd.f32 %v1586_v0, %v7668_v49  ;;  %v1588_v23 = vpop.f32.mrb[174].mxu1 }
 0x2f8   : > { %v1589_v27 = vadd.f32 %v1588_v23, %v7666_v42  ;;  %v1590_v51 = vpop.f32.mrb[175].mxu1 }
 0x2f9   : > { %v5603_v57 = vpack.c.bf16 %v1587_v16, %v1585_v63  ;;  %v1591_v6 = vadd.f32 %v1590_v51, %v7668_v49 }
 0x2fa   : > { %2355 = vmatmul.mubr.bf16.gmra.mrb[152].mxu1 %v7005_v34 }
 0x2fb   : > { %4898 = vst [vmem:[%s7679_s11 + $0x218] sm:$0xff] %v5603_v57  ;;  %v5606_v28 = vpack.c.bf16 %v1591_v6, %v1589_v27  ;;  %2362 = vmatprep.mubr.bf16.mxu1 %v7007_v35 }
 0x2fd   : > { %4901 = vst [vmem:[%s7679_s11 + $0x230] sm:$0xff] %v5606_v28  ;;  %v1594_v20 = vpop.f32.mrb[176].mxu1  ;;  %2106 = vmatmul.mubr.bf16.gmra.mrb[112].mxu0 %v9038_v36 }
 0x2fe   : > { %v1595_v32 = vadd.f32 %v1594_v20, %v7666_v42  ;;  %v1596_v53 = vpop.f32.mrb[177].mxu1  ;;  %2115 = vmatprep.mubr.bf16.mxu0 %v9039_v58 }
 0x2ff   : > { %v1597_v7 = vadd.f32 %v1596_v53, %v7668_v49  ;;  %v1598_v59 = vpop.f32.mrb[178].mxu1 }
 0x300   : > { %v1599_v34 = vadd.f32 %v1598_v59, %v7666_v42  ;;  %v1600_v41 = vpop.f32.mrb[179].mxu1 }
 0x301   : > { %v5609_v40 = vpack.c.bf16 %v1597_v7, %v1595_v32  ;;  %v1601_v22 = vadd.f32 %v1600_v41, %v7668_v49 }
 0x302   : > { %2363 = vmatmul.mubr.bf16.gmra.mrb[156].mxu1 %v7015_v44 }
 0x303   : > { %4904 = vst [vmem:[%s7679_s11 + $0x248] sm:$0xff] %v5609_v40  ;;  %v5612_v35 = vpack.c.bf16 %v1601_v22, %v1599_v34  ;;  %2370 = vmatprep.mubr.bf16.mxu1 %v7017_v45 }
 0x305   : > { %4907 = vst [vmem:[%s7679_s11 + $0x260] sm:$0xff] %v5612_v35  ;;  %v1604_v38 = vpop.f32.mrb[180].mxu1  ;;  %2116 = vmatmul.mubr.bf16.gmra.mrb[116].mxu0 %v9040_v24 }
 0x306   : > { %v1605_v17 = vadd.f32 %v1604_v38, %v7666_v42  ;;  %v1606_v61 = vpop.f32.mrb[181].mxu1  ;;  %2125 = vmatprep.mubr.bf16.mxu0 %v9041_v8 }
 0x307   : > { %v1607_v43 = vadd.f32 %v1606_v61, %v7668_v49  ;;  %v1608_v19 = vpop.f32.mrb[182].mxu1 }
 0x308   : > { %v1609_v44 = vadd.f32 %v1608_v19, %v7666_v42  ;;  %v1610_v18 = vpop.f32.mrb[183].mxu1 }
 0x309   : > { %v5615_v3 = vpack.c.bf16 %v1607_v43, %v1605_v17  ;;  %v1611_v63 = vadd.f32 %v1610_v18, %v7668_v49 }
 0x30a   : > { %2371 = vmatmul.mubr.bf16.gmra.mrb[160].mxu1 %v7025_v50 }
 0x30b   : > { %4910 = vst [vmem:[%s7679_s11 + $0x278] sm:$0xff] %v5615_v3  ;;  %v5618_v45 = vpack.c.bf16 %v1611_v63, %v1609_v44  ;;  %2378 = vmatprep.mubr.bf16.mxu1 %v7027_v52  ;;  %v9043_v3 = vld [vmem:[#allocation16_spill] sm:$0xff] }
 0x30d   : > { %4913 = vst [vmem:[%s7679_s11 + $0x290] sm:$0xff] %v5618_v45  ;;  %v1614_v0 = vpop.f32.mrb[184].mxu1  ;;  %2126 = vmatmul.mubr.bf16.gmra.mrb[120].mxu0 %v7274_v12 }
 0x30e   : > { %v1615_v16 = vadd.f32 %v1614_v0, %v7666_v42  ;;  %v1616_v23 = vpop.f32.mrb[185].mxu1  ;;  %2135 = vmatprep.mubr.bf16.mxu0 %v7278_v13 }
 0x30f   : > { %v1617_v27 = vadd.f32 %v1616_v23, %v7668_v49  ;;  %v1618_v51 = vpop.f32.mrb[186].mxu1 }
 0x310   : > { %v1619_v50 = vadd.f32 %v1618_v51, %v7666_v42  ;;  %v1620_v57 = vpop.f32.mrb[187].mxu1 }
 0x311   : > { %v5621_v6 = vpack.c.bf16 %v1617_v27, %v1615_v16  ;;  %v1621_v28 = vadd.f32 %v1620_v57, %v7668_v49 }
 0x312   : > { %2379 = vmatmul.mubr.bf16.gmra.mrb[164].mxu1 %v7035_v60 }
 0x313   : > { %4916 = vst [vmem:[%s7679_s11 + $0x2a8] sm:$0xff] %v5621_v6  ;;  %v5624_v52 = vpack.c.bf16 %v1621_v28, %v1619_v50  ;;  %2386 = vmatprep.mubr.bf16.mxu1 %v7037_v62  ;;  %v9044_v6 = vld [vmem:[#allocation17_spill] sm:$0xff] }
 0x315   : > { %4919 = vst [vmem:[%s7679_s11 + $0x2c0] sm:$0xff] %v5624_v52  ;;  %v1624_v20 = vpop.f32.mrb[188].mxu1  ;;  %2136 = vmatmul.mubr.bf16.gmra.mrb[124].mxu0 %v7290_v2  ;;  %v9045_v52 = vld [vmem:[#allocation18_spill] sm:$0xff] }
 0x316   : > { %v1625_v32 = vadd.f32 %v1624_v20, %v7666_v42  ;;  %v1626_v53 = vpop.f32.mrb[189].mxu1  ;;  %2749 = vmatprep.mubr.bf16.mxu0 %v8925_v31 }
 0x317   : > { %v1627_v7 = vadd.f32 %v1626_v53, %v7668_v49  ;;  %v1628_v59 = vpop.f32.mrb[190].mxu1 }
 0x318   : > { %v1629_v60 = vadd.f32 %v1628_v59, %v7666_v42  ;;  %v1630_v34 = vpop.f32.mrb[191].mxu1 }
 0x319   : > { %v5627_v41 = vpack.c.bf16 %v1627_v7, %v1625_v32  ;;  %v1631_v40 = vadd.f32 %v1630_v34, %v7668_v49 }
 0x31a   : > { %2387 = vmatmul.mubr.bf16.gmra.mrb[168].mxu1 %v7045_v4 }
 0x31b   : > { %4922 = vst [vmem:[%s7679_s11 + $0x2d8] sm:$0xff] %v5627_v41  ;;  %v5630_v62 = vpack.c.bf16 %v1631_v40, %v1629_v60  ;;  %2394 = vmatprep.mubr.bf16.mxu1 %v7047_v5  ;;  %v7841_v5 = vld [vmem:[#allocation8 + $0x8] sm:$0xff] }
 0x31c   : > { %v5270_v63 = vcombine.high %v7841_v5, %v7841_v5 }
 0x31d   : > { %4925 = vst [vmem:[%s7679_s11 + $0x2f0] sm:$0xff] %v5630_v62  ;;  %v1634_v22 = vpop.f32.mrb[192].mxu1  ;;  %v9046_v62 = vld [vmem:[#allocation19_spill] sm:$0xff] }
 0x31e   : > { %v1635_v35 = vadd.f32 %v1634_v22, %v7666_v42  ;;  %v1636_v38 = vpop.f32.mrb[193].mxu1  ;;  %5304 = vmatprep.subr.msk.bf16.mxu0 %vm2704_vm0, %v5270_v63  ;;  %v9048_v63 = vld [vmem:[#allocation21_spill] sm:$0xff] }
 0x31f   : > { %v1637_v17 = vadd.f32 %v1636_v38, %v7668_v49  ;;  %v1638_v61 = vpop.f32.mrb[194].mxu1 }
 0x320   : > { %v1639_v4 = vadd.f32 %v1638_v61, %v7666_v42  ;;  %v1640_v43 = vpop.f32.mrb[195].mxu1 }
 0x321   : > { %v5633_v19 = vpack.c.bf16 %v1637_v17, %v1635_v35  ;;  %v1641_v44 = vadd.f32 %v1640_v43, %v7668_v49  ;;  %v9047_v35 = vld [vmem:[#allocation20_spill] sm:$0xff] }
 0x322   : > { %2395 = vmatmul.mubr.bf16.gmra.mrb[172].mxu1 %v7055_v14 }
 0x323   : > { %4928 = vst [vmem:[%s7679_s11 + $0x308] sm:$0xff] %v5633_v19  ;;  %v5636_v18 = vpack.c.bf16 %v1641_v44, %v1639_v4  ;;  %2402 = vmatprep.mubr.bf16.mxu1 %v9043_v3 }
 0x325   : > { %4931 = vst [vmem:[%s7679_s11 + $0x320] sm:$0xff] %v5636_v18  ;;  %v1644_v45 = vpop.f32.mrb[196].mxu1 }
 0x326   : > { %v1645_v0 = vadd.f32 %v1644_v45, %v7666_v42  ;;  %v1646_v16 = vpop.f32.mrb[197].mxu1 }
 0x327   : > { %v1647_v14 = vadd.f32 %v1646_v16, %v7668_v49  ;;  %v1648_v23 = vpop.f32.mrb[198].mxu1 }
 0x328   : > { %v1649_v27 = vadd.f32 %v1648_v23, %v7666_v42  ;;  %v1650_v51 = vpop.f32.mrb[199].mxu1 }
 0x329   : > { %v5639_v50 = vpack.c.bf16 %v1647_v14, %v1645_v0  ;;  %v1651_v57 = vadd.f32 %v1650_v51, %v7668_v49  ;;  %v9049_v0 = vld [vmem:[#allocation22_spill] sm:$0xff] }
 0x32a   : > { %2403 = vmatmul.mubr.bf16.gmra.mrb[176].mxu1 %v9044_v6 }
 0x32b   : > { %4934 = vst [vmem:[%s7679_s11 + $0x338] sm:$0xff] %v5639_v50  ;;  %v5642_v28 = vpack.c.bf16 %v1651_v57, %v1649_v27  ;;  %2410 = vmatprep.mubr.bf16.mxu1 %v9045_v52  ;;  %v9050_v52 = vld [vmem:[#allocation23_spill] sm:$0xff] }
 0x32d   : > { %4937 = vst [vmem:[%s7679_s11 + $0x350] sm:$0xff] %v5642_v28  ;;  %v1654_v20 = vpop.f32.mrb[200].mxu1 }
 0x32e   : > { %v1655_v32 = vadd.f32 %v1654_v20, %v7666_v42  ;;  %v1656_v53 = vpop.f32.mrb[201].mxu1 }
 0x32f   : > { %v1657_v7 = vadd.f32 %v1656_v53, %v7668_v49  ;;  %v1658_v59 = vpop.f32.mrb[202].mxu1 }
 0x330   : > { %v1659_v60 = vadd.f32 %v1658_v59, %v7666_v42  ;;  %v1660_v34 = vpop.f32.mrb[203].mxu1 }
 0x331   : > { %v5645_v41 = vpack.c.bf16 %v1657_v7, %v1655_v32  ;;  %v1661_v40 = vadd.f32 %v1660_v34, %v7668_v49  ;;  %v9051_v32 = vld [vmem:[#allocation24_spill] sm:$0xff] }
 0x332   : > { %2411 = vmatmul.mubr.bf16.gmra.mrb[180].mxu1 %v9046_v62 }
 0x333   : > { %4940 = vst [vmem:[%s7679_s11 + $0x368] sm:$0xff] %v5645_v41  ;;  %v5648_v22 = vpack.c.bf16 %v1661_v40, %v1659_v60  ;;  %2418 = vmatprep.mubr.bf16.mxu1 %v9047_v35  ;;  %v9052_v35 = vld [vmem:[#allocation25_spill] sm:$0xff] }
 0x335   : > { %4943 = vst [vmem:[%s7679_s11 + $0x380] sm:$0xff] %v5648_v22  ;;  %v1664_v38 = vpop.f32.mrb[204].mxu1 }
 0x336   : > { %v1665_v17 = vadd.f32 %v1664_v38, %v7666_v42  ;;  %v1666_v61 = vpop.f32.mrb[205].mxu1 }
 0x337   : > { %v1667_v4 = vadd.f32 %v1666_v61, %v7668_v49  ;;  %v1668_v43 = vpop.f32.mrb[206].mxu1 }
 0x338   : > { %v1669_v19 = vadd.f32 %v1668_v43, %v7666_v42  ;;  %v1670_v44 = vpop.f32.mrb[207].mxu1 }
 0x339   : > { %v5651_v18 = vpack.c.bf16 %v1667_v4, %v1665_v17  ;;  %v1671_v3 = vadd.f32 %v1670_v44, %v7668_v49  ;;  %v9053_v17 = vld [vmem:[#allocation26_spill] sm:$0xff] }
 0x33a   : > { %2419 = vmatmul.mubr.bf16.gmra.mrb[184].mxu1 %v9048_v63 }
 0x33b   : > { %4946 = vst [vmem:[%s7679_s11 + $0x398] sm:$0xff] %v5651_v18  ;;  %v5654_v45 = vpack.c.bf16 %v1671_v3, %v1669_v19  ;;  %2426 = vmatprep.mubr.bf16.mxu1 %v9049_v0  ;;  %v9054_v0 = vld [vmem:[#allocation27_spill] sm:$0xff] }
 0x33d   : > { %4949 = vst [vmem:[%s7679_s11 + $0x3b0] sm:$0xff] %v5654_v45  ;;  %v1674_v16 = vpop.f32.mrb[208].mxu1 }
 0x33e   : > { %v1675_v14 = vadd.f32 %v1674_v16, %v7666_v42  ;;  %v1676_v23 = vpop.f32.mrb[209].mxu1 }
 0x33f   : > { %v1677_v27 = vadd.f32 %v1676_v23, %v7668_v49  ;;  %v1678_v51 = vpop.f32.mrb[210].mxu1 }
 0x340   : > { %v1679_v50 = vadd.f32 %v1678_v51, %v7666_v42  ;;  %v1680_v57 = vpop.f32.mrb[211].mxu1 }
 0x341   : > { %v5657_v6 = vpack.c.bf16 %v1677_v27, %v1675_v14  ;;  %v1681_v28 = vadd.f32 %v1680_v57, %v7668_v49  ;;  %v9055_v14 = vld [vmem:[#allocation28_spill] sm:$0xff] }
 0x342   : > { %2427 = vmatmul.mubr.bf16.gmra.mrb[188].mxu1 %v9050_v52 }
 0x343   : > { %4952 = vst [vmem:[%s7679_s11 + $0x3c8] sm:$0xff] %v5657_v6  ;;  %v5660_v20 = vpack.c.bf16 %v1681_v28, %v1679_v50  ;;  %2434 = vmatprep.mubr.bf16.mxu1 %v9051_v32 }
 0x345   : > { %4955 = vst [vmem:[%s7679_s11 + $0x3e0] sm:$0xff] %v5660_v20  ;;  %v1684_v53 = vpop.f32.mrb[212].mxu1 }
 0x346   : > { %v1685_v7 = vadd.f32 %v1684_v53, %v7666_v42  ;;  %v1686_v59 = vpop.f32.mrb[213].mxu1 }
 0x347   : > { %v1687_v60 = vadd.f32 %v1686_v59, %v7668_v49  ;;  %v1688_v34 = vpop.f32.mrb[214].mxu1 }
 0x348   : > { %v1689_v41 = vadd.f32 %v1688_v34, %v7666_v42  ;;  %v1690_v40 = vpop.f32.mrb[215].mxu1 }
 0x349   : > { %v5663_v62 = vpack.c.bf16 %v1687_v60, %v1685_v7  ;;  %v1691_v22 = vadd.f32 %v1690_v40, %v7668_v49 }
 0x34a   : > { %2435 = vmatmul.mubr.bf16.gmra.mrb[192].mxu1 %v9052_v35 }
 0x34b   : > { %4958 = vst [vmem:[%s7679_s11 + $0x3f8] sm:$0xff] %v5663_v62  ;;  %v5666_v38 = vpack.c.bf16 %v1691_v22, %v1689_v41  ;;  %2442 = vmatprep.mubr.bf16.mxu1 %v9053_v17 }
 0x34d   : > { %4961 = vst [vmem:[%s7679_s11 + $0x410] sm:$0xff] %v5666_v38  ;;  %v1694_v61 = vpop.f32.mrb[216].mxu1 }
 0x34e   : > { %v1695_v4 = vadd.f32 %v1694_v61, %v7666_v42  ;;  %v1696_v43 = vpop.f32.mrb[217].mxu1 }
 0x34f   : > { %v1697_v19 = vadd.f32 %v1696_v43, %v7668_v49  ;;  %v1698_v44 = vpop.f32.mrb[218].mxu1 }
 0x350   : > { %v1699_v18 = vadd.f32 %v1698_v44, %v7666_v42  ;;  %v1700_v3 = vpop.f32.mrb[219].mxu1 }
 0x351   : > { %v5669_v63 = vpack.c.bf16 %v1697_v19, %v1695_v4  ;;  %v1701_v45 = vadd.f32 %v1700_v3, %v7668_v49 }
 0x352   : > { %2443 = vmatmul.mubr.bf16.gmra.mrb[196].mxu1 %v9054_v0 }
 0x353   : > { %4964 = vst [vmem:[%s7679_s11 + $0x428] sm:$0xff] %v5669_v63  ;;  %v5672_v16 = vpack.c.bf16 %v1701_v45, %v1699_v18  ;;  %2450 = vmatprep.mubr.bf16.mxu1 %v9055_v14 }
 0x355   : > { %4967 = vst [vmem:[%s7679_s11 + $0x440] sm:$0xff] %v5672_v16  ;;  %v1704_v23 = vpop.f32.mrb[220].mxu1 }
 0x356   : > { %v1705_v27 = vadd.f32 %v1704_v23, %v7666_v42  ;;  %v1706_v51 = vpop.f32.mrb[221].mxu1 }
 0x357   : > { %v1707_v50 = vadd.f32 %v1706_v51, %v7668_v49  ;;  %v1708_v57 = vpop.f32.mrb[222].mxu1 }
 0x358   : > { %v1709_v6 = vadd.f32 %v1708_v57, %v7666_v42  ;;  %v1710_v28 = vpop.f32.mrb[223].mxu1 }
 0x359   : > { %v5675_v52 = vpack.c.bf16 %v1707_v50, %v1705_v27  ;;  %v1711_v20 = vadd.f32 %v1710_v28, %v7668_v49 }
 0x35a   : > { %2451 = vmatmul.mubr.bf16.gmra.mrb[200].mxu1 %v7126_v29 }
 0x35b   : > { %4970 = vst [vmem:[%s7679_s11 + $0x458] sm:$0xff] %v5675_v52  ;;  %v5678_v32 = vpack.c.bf16 %v1711_v20, %v1709_v6  ;;  %2458 = vmatprep.mubr.bf16.mxu1 %v7128_v30  ;;  %v9056_v30 = vld [vmem:[#allocation29_spill] sm:$0xff] }
 0x35d   : > { %4973 = vst [vmem:[%s7679_s11 + $0x470] sm:$0xff] %v5678_v32  ;;  %v1714_v53 = vpop.f32.mrb[224].mxu1 }
 0x35e   : > { %v1715_v7 = vadd.f32 %v1714_v53, %v7666_v42  ;;  %v1716_v59 = vpop.f32.mrb[225].mxu1 }
 0x35f   : > { %v1717_v60 = vadd.f32 %v1716_v59, %v7668_v49  ;;  %v1718_v34 = vpop.f32.mrb[226].mxu1 }
 0x360   : > { %v1719_v41 = vadd.f32 %v1718_v34, %v7666_v42  ;;  %v1720_v40 = vpop.f32.mrb[227].mxu1 }
 0x361   : > { %v5681_v62 = vpack.c.bf16 %v1717_v60, %v1715_v7  ;;  %v1721_v22 = vadd.f32 %v1720_v40, %v7668_v49 }
 0x362   : > { %2459 = vmatmul.mubr.bf16.gmra.mrb[204].mxu1 %v7136_v39 }
 0x363   : > { %4976 = vst [vmem:[%s7679_s11 + $0x488] sm:$0xff] %v5681_v62  ;;  %v5684_v29 = vpack.c.bf16 %v1721_v22, %v1719_v41  ;;  %2466 = vmatprep.mubr.bf16.mxu1 %v9056_v30 }
 0x365   : > { %4979 = vst [vmem:[%s7679_s11 + $0x4a0] sm:$0xff] %v5684_v29  ;;  %v1724_v35 = vpop.f32.mrb[228].mxu1 }
 0x366   : > { %v1725_v38 = vadd.f32 %v1724_v35, %v7666_v42  ;;  %v1726_v17 = vpop.f32.mrb[229].mxu1 }
 0x367   : > { %v1727_v61 = vadd.f32 %v1726_v17, %v7668_v49  ;;  %v1728_v4 = vpop.f32.mrb[230].mxu1 }
 0x368   : > { %v1729_v43 = vadd.f32 %v1728_v4, %v7666_v42  ;;  %v1730_v19 = vpop.f32.mrb[231].mxu1 }
 0x369   : > { %v5687_v44 = vpack.c.bf16 %v1727_v61, %v1725_v38  ;;  %v1731_v18 = vadd.f32 %v1730_v19, %v7668_v49 }
 0x36a   : > { %2467 = vmatmul.mubr.bf16.gmra.mrb[208].mxu1 %v7146_v55 }
 0x36b   : > { %4982 = vst [vmem:[%s7679_s11 + $0x4b8] sm:$0xff] %v5687_v44  ;;  %v5690_v39 = vpack.c.bf16 %v1731_v18, %v1729_v43  ;;  %2474 = vmatprep.mubr.bf16.mxu1 %v7148_v56 }
 0x36d   : > { %4985 = vst [vmem:[%s7679_s11 + $0x4d0] sm:$0xff] %v5690_v39  ;;  %v1734_v3 = vpop.f32.mrb[232].mxu1 }
 0x36e   : > { %v1735_v63 = vadd.f32 %v1734_v3, %v7666_v42  ;;  %v1736_v45 = vpop.f32.mrb[233].mxu1 }
 0x36f   : > { %v1737_v0 = vadd.f32 %v1736_v45, %v7668_v49  ;;  %v1738_v16 = vpop.f32.mrb[234].mxu1 }
 0x370   : > { %v1739_v14 = vadd.f32 %v1738_v16, %v7666_v42  ;;  %v1740_v23 = vpop.f32.mrb[235].mxu1 }
 0x371   : > { %v5693_v27 = vpack.c.bf16 %v1737_v0, %v1735_v63  ;;  %v1741_v51 = vadd.f32 %v1740_v23, %v7668_v49 }
 0x372   : > { %2475 = vmatmul.mubr.bf16.gmra.mrb[212].mxu1 %v7156_v9 }
 0x373   : > { %4988 = vst [vmem:[%s7679_s11 + $0x4e8] sm:$0xff] %v5693_v27  ;;  %v5696_v55 = vpack.c.bf16 %v1741_v51, %v1739_v14  ;;  %2482 = vmatprep.mubr.bf16.mxu1 %v7158_v10 }
 0x375   : > { %4991 = vst [vmem:[%s7679_s11 + $0x500] sm:$0xff] %v5696_v55  ;;  %v1744_v56 = vpop.f32.mrb[236].mxu1 }
 0x376   : > { %v1745_v50 = vadd.f32 %v1744_v56, %v7666_v42  ;;  %v1746_v57 = vpop.f32.mrb[237].mxu1 }
 0x377   : > { %v1747_v6 = vadd.f32 %v1746_v57, %v7668_v49  ;;  %v1748_v28 = vpop.f32.mrb[238].mxu1 }
 0x378   : > { %v1749_v52 = vadd.f32 %v1748_v28, %v7666_v42  ;;  %v1750_v20 = vpop.f32.mrb[239].mxu1 }
 0x379   : > { %v5699_v32 = vpack.c.bf16 %v1747_v6, %v1745_v50  ;;  %v1751_v53 = vadd.f32 %v1750_v20, %v7668_v49 }
 0x37a   : > { %2483 = vmatmul.mubr.bf16.gmra.mrb[216].mxu1 %v7166_v25 }
 0x37b   : > { %4994 = vst [vmem:[%s7679_s11 + $0x518] sm:$0xff] %v5699_v32  ;;  %v5702_v9 = vpack.c.bf16 %v1751_v53, %v1749_v52  ;;  %2490 = vmatprep.mubr.bf16.mxu1 %v7168_v26 }
 0x37d   : > { %4997 = vst [vmem:[%s7679_s11 + $0x530] sm:$0xff] %v5702_v9  ;;  %v1754_v10 = vpop.f32.mrb[240].mxu1 }
 0x37e   : > { %v1755_v7 = vadd.f32 %v1754_v10, %v7666_v42  ;;  %v1756_v59 = vpop.f32.mrb[241].mxu1 }
 0x37f   : > { %v1757_v60 = vadd.f32 %v1756_v59, %v7668_v49  ;;  %v1758_v34 = vpop.f32.mrb[242].mxu1 }
 0x380   : > { %v1759_v41 = vadd.f32 %v1758_v34, %v7666_v42  ;;  %v1760_v40 = vpop.f32.mrb[243].mxu1 }
 0x381   : > { %v5705_v62 = vpack.c.bf16 %v1757_v60, %v1755_v7  ;;  %v1761_v22 = vadd.f32 %v1760_v40, %v7668_v49 }
 0x382   : > { %2491 = vmatmul.mubr.bf16.gmra.mrb[220].mxu1 %v7176_v47 }
 0x383   : > { %5000 = vst [vmem:[%s7679_s11 + $0x548] sm:$0xff] %v5705_v62  ;;  %v5708_v25 = vpack.c.bf16 %v1761_v22, %v1759_v41  ;;  %2498 = vmatprep.mubr.bf16.mxu1 %v7178_v48 }
 0x385   : > { %5003 = vst [vmem:[%s7679_s11 + $0x560] sm:$0xff] %v5708_v25  ;;  %v1764_v26 = vpop.f32.mrb[244].mxu1 }
 0x386   : > { %v1765_v29 = vadd.f32 %v1764_v26, %v7666_v42  ;;  %v1766_v30 = vpop.f32.mrb[245].mxu1 }
 0x387   : > { %v1767_v35 = vadd.f32 %v1766_v30, %v7668_v49  ;;  %v1768_v38 = vpop.f32.mrb[246].mxu1 }
 0x388   : > { %v1769_v17 = vadd.f32 %v1768_v38, %v7666_v42  ;;  %v1770_v61 = vpop.f32.mrb[247].mxu1 }
 0x389   : > { %v5711_v4 = vpack.c.bf16 %v1767_v35, %v1765_v29  ;;  %v1771_v43 = vadd.f32 %v1770_v61, %v7668_v49 }
 0x38a   : > { %2499 = vmatmul.mubr.bf16.gmra.mrb[224].mxu1 %v7186_v1 }
 0x38b   : > { %5006 = vst [vmem:[%s7679_s11 + $0x578] sm:$0xff] %v5711_v4  ;;  %v5714_v47 = vpack.c.bf16 %v1771_v43, %v1769_v17  ;;  %2506 = vmatprep.mubr.bf16.mxu1 %v9022_v11 }
 0x38d   : > { %5009 = vst [vmem:[%s7679_s11 + $0x590] sm:$0xff] %v5714_v47  ;;  %v1774_v48 = vpop.f32.mrb[248].mxu1 }
 0x38e   : > { %v1775_v19 = vadd.f32 %v1774_v48, %v7666_v42  ;;  %v1776_v44 = vpop.f32.mrb[249].mxu1 }
 0x38f   : > { %v1777_v18 = vadd.f32 %v1776_v44, %v7668_v49  ;;  %v1778_v39 = vpop.f32.mrb[250].mxu1 }
 0x390   : > { %v1779_v3 = vadd.f32 %v1778_v39, %v7666_v42  ;;  %v1780_v63 = vpop.f32.mrb[251].mxu1 }
 0x391   : > { %v5717_v45 = vpack.c.bf16 %v1777_v18, %v1775_v19  ;;  %v1781_v0 = vadd.f32 %v1780_v63, %v7668_v49 }
 0x392   : > { %2507 = vmatmul.mubr.bf16.gmra.mrb[228].mxu1 %v9027_v37 }
 0x393   : > { %5012 = vst [vmem:[%s7679_s11 + $0x5a8] sm:$0xff] %v5717_v45  ;;  %v5720_v1 = vpack.c.bf16 %v1781_v0, %v1779_v3  ;;  %2514 = vmatprep.mubr.bf16.mxu1 %v9028_v21  ;;  %v5269_v21 = vcombine.low %v7841_v5, %v7841_v5 }
 0x395   : > { %5015 = vst [vmem:[%s7679_s11 + $0x5c0] sm:$0xff] %v5720_v1  ;;  %v1784_v11 = vpop.f32.mrb[252].mxu1  ;;  %v2712_v20 = vsel %vm2704_vm0, %v5269_v21, 0 }
 0x396   : > { %v1785_v16 = vadd.f32 %v1784_v11, %v7666_v42  ;;  %v1786_v14 = vpop.f32.mrb[253].mxu1 }
 0x397   : > { %v1787_v23 = vadd.f32 %v1786_v14, %v7668_v49  ;;  %v1788_v27 = vpop.f32.mrb[254].mxu1 }
 0x398   : > { %v1789_v51 = vadd.f32 %v1788_v27, %v7666_v42  ;;  %v1790_v55 = vpop.f32.mrb[255].mxu1 }
 0x399   : > { %v5723_v56 = vpack.c.bf16 %v1787_v23, %v1785_v16  ;;  %v1791_v50 = vadd.f32 %v1790_v55, %v7668_v49 }
 0x39a   : > { %2515 = vmatmul.mubr.bf16.gmra.mrb[232].mxu1 %v9034_v33 }
 0x39b   : > { %5018 = vst [vmem:[%s7679_s11 + $0x5d8] sm:$0xff] %v5723_v56  ;;  %v5726_v37 = vpack.c.bf16 %v1791_v50, %v1789_v51  ;;  %2522 = vmatprep.mubr.bf16.mxu1 %v9035_v46 }
 0x39d   : > { %5021 = vst [vmem:[%s7679_s11 + $0x5f0] sm:$0xff] %v5726_v37  ;;  %v2308_v57 = vpop.f32.mrb[128].mxu1 }
 0x39e   : > { %v2310_v6 = vpop.f32.mrb[129].mxu1 }
 0x39f   : > { %v2311_v28 = vpop.f32.mrb[130].mxu1 }
 0x3a0   : > { %v7971_v52 = vpack.c.bf16 %v2311_v28, %v2308_v57  ;;  %v2313_v42 = vpop.f32.mrb[131].mxu1 }
 0x3a2   : > { %2523 = vmatmul.mubr.bf16.gmra.mrb[236].mxu1 %v9036_v54  ;;  %5272 = vmatmul.mubr.msk.bf16.vlgmr.msra.gmra.mrb[128].mxu0 %vm2607_vm1, %v7971_v52 }
 0x3a3   : > { %3071 = vmatpush1.bf16.msra.mxu0 %v2712_v20  ;;  %2530 = vmatprep.mubr.bf16.mxu1 %v9037_v15 }
 0x3a4   : > { %2759 = vmatprep.mubr.bf16.mxu0 %v8925_v31 }
 0x3a5   : > { %v2316_v33 = vpop.f32.mrb[132].mxu1 }
 0x3a6   : > { %v2318_v46 = vpop.f32.mrb[133].mxu1 }
 0x3a7   : > { %v2319_v49 = vpop.f32.mrb[134].mxu1 }
 0x3a8   : > { %v7979_v5 = vpack.c.bf16 %v2319_v49, %v2316_v33  ;;  %v2321_v32 = vpop.f32.mrb[135].mxu1 }
 0x3aa   : > { %2531 = vmatmul.mubr.bf16.gmra.mrb[240].mxu1 %v9038_v36  ;;  %5273 = vmatmul.mubr.msk.bf16.gmra.mrb[132].mxu0 %vm2607_vm1, %v7979_v5 }
 0x3ab   : > { %2538 = vmatprep.mubr.bf16.mxu1 %v9039_v58  ;;  %2769 = vmatprep.mubr.bf16.mxu0 %v8925_v31 }
 0x3ad   : > { %v2324_v54 = vpop.f32.mrb[136].mxu1 }
 0x3ae   : > { %v2326_v53 = vpop.f32.mrb[137].mxu1 }
 0x3af   : > { %v2327_v15 = vpop.f32.mrb[138].mxu1 }
 0x3b0   : > { %v7986_v9 = vpack.c.bf16 %v2327_v15, %v2324_v54  ;;  %v2329_v10 = vpop.f32.mrb[139].mxu1 }
 0x3b2   : > { %2539 = vmatmul.mubr.bf16.gmra.mrb[244].mxu1 %v9040_v24  ;;  %5274 = vmatmul.mubr.msk.bf16.gmra.mrb[136].mxu0 %vm2607_vm1, %v7986_v9 }
 0x3b3   : > { %2546 = vmatprep.mubr.bf16.mxu1 %v9041_v8  ;;  %2779 = vmatprep.mubr.bf16.mxu0 %v8925_v31 }
 0x3b5   : > { %v2332_v36 = vpop.f32.mrb[140].mxu1 }
 0x3b6   : > { %v2334_v7 = vpop.f32.mrb[141].mxu1 }
 0x3b7   : > { %v2335_v58 = vpop.f32.mrb[142].mxu1 }
 0x3b8   : > { %v7993_v59 = vpack.c.bf16 %v2335_v58, %v2332_v36  ;;  %v2337_v60 = vpop.f32.mrb[143].mxu1 }
 0x3ba   : > { %2547 = vmatmul.mubr.bf16.gmra.mrb[248].mxu1 %v7274_v12  ;;  %5275 = vmatmul.mubr.msk.bf16.gmra.mrb[140].mxu0 %vm2607_vm1, %v7993_v59 }
 0x3bb   : > { %2554 = vmatprep.mubr.bf16.mxu1 %v7278_v13  ;;  %2789 = vmatprep.mubr.bf16.mxu0 %v8925_v31 }
 0x3bd   : > { %v2340_v24 = vpop.f32.mrb[144].mxu1 }
 0x3be   : > { %v2342_v34 = vpop.f32.mrb[145].mxu1 }
 0x3bf   : > { %v2343_v8 = vpop.f32.mrb[146].mxu1 }
 0x3c0   : > { %v8000_v41 = vpack.c.bf16 %v2343_v8, %v2340_v24  ;;  %v2345_v40 = vpop.f32.mrb[147].mxu1 }
 0x3c2   : > { %2555 = vmatmul.mubr.bf16.gmra.mrb[252].mxu1 %v7290_v2  ;;  %5276 = vmatmul.mubr.msk.bf16.gmra.mrb[144].mxu0 %vm2607_vm1, %v8000_v41 }
 0x3c3   : > { %2799 = vmatprep.mubr.bf16.mxu0 %v8925_v31 }
 0x3c5   : > { %v2348_v12 = vpop.f32.mrb[148].mxu1 }
 0x3c6   : > { %v2350_v62 = vpop.f32.mrb[149].mxu1 }
 0x3c7   : > { %v2351_v22 = vpop.f32.mrb[150].mxu1 }
 0x3c8   : > { %v8006_v25 = vpack.c.bf16 %v2351_v22, %v2348_v12  ;;  %v2353_v13 = vpop.f32.mrb[151].mxu1 }
 0x3ca   : > { %5277 = vmatmul.mubr.msk.bf16.gmra.mrb[148].mxu0 %vm2607_vm1, %v8006_v25 }
 0x3cb   : > { %2809 = vmatprep.mubr.bf16.mxu0 %v8925_v31 }
 0x3cd   : > { %v2356_v26 = vpop.f32.mrb[152].mxu1 }
 0x3ce   : > { %v2358_v29 = vpop.f32.mrb[153].mxu1 }
 0x3cf   : > { %v2359_v30 = vpop.f32.mrb[154].mxu1 }
 0x3d0   : > { %v8011_v2 = vpack.c.bf16 %v2359_v30, %v2356_v26  ;;  %v2361_v35 = vpop.f32.mrb[155].mxu1 }
 0x3d2   : > { %5278 = vmatmul.mubr.msk.bf16.gmra.mrb[152].mxu0 %vm2607_vm1, %v8011_v2 }
 0x3d3   : > { %2819 = vmatprep.mubr.bf16.mxu0 %v8925_v31 }
 0x3d5   : > { %v2364_v38 = vpop.f32.mrb[156].mxu1 }
 0x3d6   : > { %v2366_v17 = vpop.f32.mrb[157].mxu1 }
 0x3d7   : > { %v2367_v61 = vpop.f32.mrb[158].mxu1 }
 0x3d8   : > { %v8016_v4 = vpack.c.bf16 %v2367_v61, %v2364_v38  ;;  %v2369_v43 = vpop.f32.mrb[159].mxu1 }
 0x3da   : > { %5279 = vmatmul.mubr.msk.bf16.gmra.mrb[156].mxu0 %vm2607_vm1, %v8016_v4 }
 0x3db   : > { %2829 = vmatprep.mubr.bf16.mxu0 %v8925_v31 }
 0x3dd   : > { %v2372_v47 = vpop.f32.mrb[160].mxu1 }
 0x3de   : > { %v2374_v48 = vpop.f32.mrb[161].mxu1 }
 0x3df   : > { %v2375_v19 = vpop.f32.mrb[162].mxu1 }
 0x3e0   : > { %v8021_v44 = vpack.c.bf16 %v2375_v19, %v2372_v47  ;;  %v2377_v18 = vpop.f32.mrb[163].mxu1 }
 0x3e2   : > { %5280 = vmatmul.mubr.msk.bf16.gmra.mrb[160].mxu0 %vm2607_vm1, %v8021_v44 }
 0x3e3   : > { %2839 = vmatprep.mubr.bf16.mxu0 %v8925_v31 }
 0x3e5   : > { %v2380_v39 = vpop.f32.mrb[164].mxu1 }
 0x3e6   : > { %v2382_v3 = vpop.f32.mrb[165].mxu1 }
 0x3e7   : > { %v2383_v63 = vpop.f32.mrb[166].mxu1 }
 0x3e8   : > { %v8026_v45 = vpack.c.bf16 %v2383_v63, %v2380_v39  ;;  %v2385_v0 = vpop.f32.mrb[167].mxu1 }
 0x3ea   : > { %5281 = vmatmul.mubr.msk.bf16.gmra.mrb[164].mxu0 %vm2607_vm1, %v8026_v45 }
 0x3eb   : > { %2849 = vmatprep.mubr.bf16.mxu0 %v8925_v31 }
 0x3ed   : > { %v2388_v1 = vpop.f32.mrb[168].mxu1 }
 0x3ee   : > { %v2390_v11 = vpop.f32.mrb[169].mxu1 }
 0x3ef   : > { %v2391_v16 = vpop.f32.mrb[170].mxu1 }
 0x3f0   : > { %v8031_v14 = vpack.c.bf16 %v2391_v16, %v2388_v1  ;;  %v2393_v23 = vpop.f32.mrb[171].mxu1 }
 0x3f2   : > { %5282 = vmatmul.mubr.msk.bf16.gmra.mrb[168].mxu0 %vm2607_vm1, %v8031_v14 }
 0x3f3   : > { %2859 = vmatprep.mubr.bf16.mxu0 %v8925_v31 }
 0x3f5   : > { %v2396_v27 = vpop.f32.mrb[172].mxu1 }
 0x3f6   : > { %v2398_v51 = vpop.f32.mrb[173].mxu1 }
 0x3f7   : > { %v2399_v55 = vpop.f32.mrb[174].mxu1 }
 0x3f8   : > { %v8036_v56 = vpack.c.bf16 %v2399_v55, %v2396_v27  ;;  %v2401_v50 = vpop.f32.mrb[175].mxu1 }
 0x3fa   : > { %5283 = vmatmul.mubr.msk.bf16.gmra.mrb[172].mxu0 %vm2607_vm1, %v8036_v56 }
 0x3fb   : > { %2869 = vmatprep.mubr.bf16.mxu0 %v8925_v31 }
 0x3fd   : > { %v2404_v37 = vpop.f32.mrb[176].mxu1 }
 0x3fe   : > { %v2406_v21 = vpop.f32.mrb[177].mxu1 }
 0x3ff   : > { %v2407_v57 = vpop.f32.mrb[178].mxu1 }
 0x400   : > { %v8041_v6 = vpack.c.bf16 %v2407_v57, %v2404_v37  ;;  %v2409_v28 = vpop.f32.mrb[179].mxu1 }
 0x402   : > { %5284 = vmatmul.mubr.msk.bf16.gmra.mrb[176].mxu0 %vm2607_vm1, %v8041_v6 }
 0x403   : > { %2879 = vmatprep.mubr.bf16.mxu0 %v8925_v31 }
 0x405   : > { %v2412_v42 = vpop.f32.mrb[180].mxu1 }
 0x406   : > { %v2414_v20 = vpop.f32.mrb[181].mxu1 }
 0x407   : > { %v2415_v33 = vpop.f32.mrb[182].mxu1 }
 0x408   : > { %v8046_v46 = vpack.c.bf16 %v2415_v33, %v2412_v42  ;;  %v2417_v49 = vpop.f32.mrb[183].mxu1 }
 0x40a   : > { %5285 = vmatmul.mubr.msk.bf16.gmra.mrb[180].mxu0 %vm2607_vm1, %v8046_v46 }
 0x40b   : > { %2889 = vmatprep.mubr.bf16.mxu0 %v8925_v31 }
 0x40d   : > { %v2420_v32 = vpop.f32.mrb[184].mxu1 }
 0x40e   : > { %v2422_v54 = vpop.f32.mrb[185].mxu1 }
 0x40f   : > { %v2423_v53 = vpop.f32.mrb[186].mxu1 }
 0x410   : > { %v8051_v15 = vpack.c.bf16 %v2423_v53, %v2420_v32  ;;  %v2425_v10 = vpop.f32.mrb[187].mxu1 }
 0x412   : > { %5286 = vmatmul.mubr.msk.bf16.gmra.mrb[184].mxu0 %vm2607_vm1, %v8051_v15 }
 0x413   : > { %2899 = vmatprep.mubr.bf16.mxu0 %v8925_v31 }
 0x415   : > { %v2428_v36 = vpop.f32.mrb[188].mxu1 }
 0x416   : > { %v2430_v7 = vpop.f32.mrb[189].mxu1 }
 0x417   : > { %v2431_v58 = vpop.f32.mrb[190].mxu1 }
 0x418   : > { %v8056_v60 = vpack.c.bf16 %v2431_v58, %v2428_v36  ;;  %v2433_v24 = vpop.f32.mrb[191].mxu1 }
 0x41a   : > { %5287 = vmatmul.mubr.msk.bf16.gmra.mrb[188].mxu0 %vm2607_vm1, %v8056_v60 }
 0x41b   : > { %2909 = vmatprep.mubr.bf16.mxu0 %v8925_v31 }
 0x41d   : > { %v2436_v34 = vpop.f32.mrb[192].mxu1 }
 0x41e   : > { %v2438_v8 = vpop.f32.mrb[193].mxu1 }
 0x41f   : > { %v2439_v40 = vpop.f32.mrb[194].mxu1 }
 0x420   : > { %v8061_v12 = vpack.c.bf16 %v2439_v40, %v2436_v34  ;;  %v2441_v62 = vpop.f32.mrb[195].mxu1 }
 0x421   : > { %v9057_v62 = vld [vmem:[#allocation31_spill] sm:$0xff] }
 0x422   : > { %5288 = vmatmul.mubr.msk.bf16.gmra.mrb[192].mxu0 %vm2607_vm1, %v8061_v12 }
 0x423   : > { %2919 = vmatprep.mubr.bf16.mxu0 %v8925_v31 }
 0x425   : > { %v2444_v22 = vpop.f32.mrb[196].mxu1 }
 0x426   : > { %v2446_v13 = vpop.f32.mrb[197].mxu1 }
 0x427   : > { %v2447_v26 = vpop.f32.mrb[198].mxu1  ;;  %v583_v13 = vsub.s32 1, %v9057_v62 }
 0x428   : > { %v8066_v29 = vpack.c.bf16 %v2447_v26, %v2444_v22  ;;  %v2449_v30 = vpop.f32.mrb[199].mxu1  ;;  %v579_v22 = vsub.s32 0, %v9057_v62 }
 0x42a   : > { %5289 = vmatmul.mubr.msk.bf16.gmra.mrb[196].mxu0 %vm2607_vm1, %v8066_v29 }
 0x42b   : > { %2929 = vmatprep.mubr.bf16.mxu0 %v8925_v31 }
 0x42d   : > { %v2452_v35 = vpop.f32.mrb[200].mxu1 }
 0x42e   : > { %v2454_v38 = vpop.f32.mrb[201].mxu1 }
 0x42f   : > { %v2455_v17 = vpop.f32.mrb[202].mxu1  ;;  %v6490_v38 = vld [vmem:[#allocation7] sm:$0x3f] }
 0x430   : > { %v8071_v61 = vpack.c.bf16 %v2455_v17, %v2452_v35  ;;  %v2457_v43 = vpop.f32.mrb[203].mxu1  ;;  %v8113_v17 = vrot.slane %v6490_v38, %v579_v22 }
 0x432   : > { %5290 = vmatmul.mubr.msk.bf16.gmra.mrb[200].mxu0 %vm2607_vm1, %v8071_v61 }
 0x433   : > { %2939 = vmatprep.mubr.bf16.mxu0 %v8925_v31 }
 0x435   : > { %v2460_v47 = vpop.f32.mrb[204].mxu1 }
 0x436   : > { %v2462_v48 = vpop.f32.mrb[205].mxu1 }
 0x437   : > { %v2463_v19 = vpop.f32.mrb[206].mxu1  ;;  %v8117_v48 = vrot.slane %v6490_v38, %v583_v13 }
 0x438   : > { %v8076_v18 = vpack.c.bf16 %v2463_v19, %v2460_v47  ;;  %v2465_v39 = vpop.f32.mrb[207].mxu1  ;;  %v9058_v19 = vld [vmem:[#allocation35_spill] sm:$0xff] }
 0x439   : > { %v1122_v39 = vadd.f32 %v9058_v19, %v8113_v17 }
 0x43a   : > { %5291 = vmatmul.mubr.msk.bf16.gmra.mrb[204].mxu0 %vm2607_vm1, %v8076_v18 }
 0x43b   : > { %2949 = vmatprep.mubr.bf16.mxu0 %v8925_v31 }
 0x43d   : > { %v2468_v3 = vpop.f32.mrb[208].mxu1 }
 0x43e   : > { %v2470_v63 = vpop.f32.mrb[209].mxu1 }
 0x43f   : > { %v2471_v0 = vpop.f32.mrb[210].mxu1 }
 0x440   : > { %v8081_v1 = vpack.c.bf16 %v2471_v0, %v2468_v3  ;;  %v2473_v11 = vpop.f32.mrb[211].mxu1  ;;  %v9059_v3 = vld [vmem:[#allocation36_spill] sm:$0xff] }
 0x441   : > { %v1124_v63 = vadd.f32 %v9059_v3, %v8117_v48 }
 0x442   : > { %5292 = vmatmul.mubr.msk.bf16.gmra.mrb[208].mxu0 %vm2607_vm1, %v8081_v1 }
 0x443   : > { %2959 = vmatprep.mubr.bf16.mxu0 %v8925_v31 }
 0x445   : > { %v2476_v16 = vpop.f32.mrb[212].mxu1 }
 0x446   : > { %v2478_v23 = vpop.f32.mrb[213].mxu1 }
 0x447   : > { %v2479_v27 = vpop.f32.mrb[214].mxu1 }
 0x448   : > { %v8086_v51 = vpack.c.bf16 %v2479_v27, %v2476_v16  ;;  %v2481_v55 = vpop.f32.mrb[215].mxu1  ;;  %v9060_v16 = vld [vmem:[#allocation38_spill] sm:$0xff] }
 0x449   : > { %v1126_v23 = vadd.f32 %v9060_v16, %v8113_v17 }
 0x44a   : > { %5293 = vmatmul.mubr.msk.bf16.gmra.mrb[212].mxu0 %vm2607_vm1, %v8086_v51 }
 0x44b   : > { %2969 = vmatprep.mubr.bf16.mxu0 %v8925_v31 }
 0x44d   : > { %v2484_v50 = vpop.f32.mrb[216].mxu1 }
 0x44e   : > { %v2486_v37 = vpop.f32.mrb[217].mxu1 }
 0x44f   : > { %v2487_v21 = vpop.f32.mrb[218].mxu1  ;;  %v9061_v37 = vld [vmem:[#allocation40_spill] sm:$0xff] }
 0x450   : > { %v8091_v57 = vpack.c.bf16 %v2487_v21, %v2484_v50  ;;  %v2489_v28 = vpop.f32.mrb[219].mxu1  ;;  %v1128_v21 = vadd.f32 %v9061_v37, %v8117_v48 }
 0x452   : > { %5294 = vmatmul.mubr.msk.bf16.gmra.mrb[216].mxu0 %vm2607_vm1, %v8091_v57 }
 0x453   : > { %2979 = vmatprep.mubr.bf16.mxu0 %v8925_v31 }
 0x455   : > { %v2492_v42 = vpop.f32.mrb[220].mxu1 }
 0x456   : > { %v2494_v20 = vpop.f32.mrb[221].mxu1 }
 0x457   : > { %v2495_v33 = vpop.f32.mrb[222].mxu1 }
 0x458   : > { %v8096_v49 = vpack.c.bf16 %v2495_v33, %v2492_v42  ;;  %v2497_v32 = vpop.f32.mrb[223].mxu1 }
 0x45a   : > { %5295 = vmatmul.mubr.msk.bf16.gmra.mrb[220].mxu0 %vm2607_vm1, %v8096_v49 }
 0x45b   : > { %2989 = vmatprep.mubr.bf16.mxu0 %v8925_v31 }
 0x45d   : > { %v2500_v54 = vpop.f32.mrb[224].mxu1 }
 0x45e   : > { %v2502_v53 = vpop.f32.mrb[225].mxu1 }
 0x45f   : > { %v2503_v10 = vpop.f32.mrb[226].mxu1 }
 0x460   : > { %v8101_v36 = vpack.c.bf16 %v2503_v10, %v2500_v54  ;;  %v2505_v7 = vpop.f32.mrb[227].mxu1 }
 0x462   : > { %5296 = vmatmul.mubr.msk.bf16.gmra.mrb[224].mxu0 %vm2607_vm1, %v8101_v36 }
 0x463   : > { %2999 = vmatprep.mubr.bf16.mxu0 %v8925_v31 }
 0x465   : > { %v2508_v58 = vpop.f32.mrb[228].mxu1 }
 0x466   : > { %v2510_v24 = vpop.f32.mrb[229].mxu1 }
 0x467   : > { %v2511_v34 = vpop.f32.mrb[230].mxu1  ;;  %v9062_v24 = vld [vmem:[#allocation41_spill] sm:$0xff] }
 0x468   : > { %v8106_v8 = vpack.c.bf16 %v2511_v34, %v2508_v58  ;;  %v2513_v40 = vpop.f32.mrb[231].mxu1  ;;  %v1132_v34 = vadd.f32 %v9062_v24, %v8113_v17 }
 0x469   : > { %v9063_v40 = vld [vmem:[#allocation42_spill] sm:$0xff] }
 0x46a   : > { %5297 = vmatmul.mubr.msk.bf16.gmra.mrb[228].mxu0 %vm2607_vm1, %v8106_v8  ;;  %v1134_v22 = vadd.f32 %v9063_v40, %v8117_v48  ;;  %v9069_v40 = vld [vmem:[#allocation52_spill] sm:$0xff] }
 0x46b   : > { %3009 = vmatprep.mubr.bf16.mxu0 %v8925_v31 }
 0x46d   : > { %v2516_v26 = vpop.f32.mrb[232].mxu1 }
 0x46e   : > { %v2518_v30 = vpop.f32.mrb[233].mxu1 }
 0x46f   : > { %v2519_v35 = vpop.f32.mrb[234].mxu1  ;;  %v9064_v30 = vld [vmem:[#allocation44_spill] sm:$0xff] }
 0x470   : > { %v8115_v43 = vpack.c.bf16 %v2519_v35, %v2516_v26  ;;  %v2521_v47 = vpop.f32.mrb[235].mxu1  ;;  %v1136_v35 = vadd.f32 %v9064_v30, %v8113_v17 }
 0x472   : > { %5298 = vmatmul.mubr.msk.bf16.gmra.mrb[232].mxu0 %vm2607_vm1, %v8115_v43 }
 0x473   : > { %3019 = vmatprep.mubr.bf16.mxu0 %v8925_v31 }
 0x475   : > { %v2524_v0 = vpop.f32.mrb[236].mxu1  ;;  %v2751_v11 = vpop.f32.mrb[128].mxu0 }
 0x476   : > { %v3423_v27 = vadd.f32 %v2751_v11, %v1122_v39  ;;  %v2526_v55 = vpop.f32.mrb[237].mxu1  ;;  %v2753_v50 = vpop.f32.mrb[129].mxu0  ;;  %v9065_v39 = vld [vmem:[#allocation46_spill] sm:$0xff] }
 0x477   : > { %v3424_v28 = vadd.f32 %v2753_v50, %v1124_v63  ;;  %v2527_v42 = vpop.f32.mrb[238].mxu1  ;;  %v2755_v20 = vpop.f32.mrb[130].mxu0  ;;  %v1138_v3 = vadd.f32 %v9065_v39, %v8117_v48 }
 0x478   : > { %v8130_v33 = vpack.c.bf16 %v2527_v42, %v2524_v0  ;;  %v3425_v32 = vadd.f32 %v2755_v20, %v1126_v23  ;;  %v2529_v54 = vpop.f32.mrb[239].mxu1  ;;  %v2757_v53 = vpop.f32.mrb[131].mxu0  ;;  %v9067_v20 = vld [vmem:[#allocation48_spill] sm:$0xff] }
 0x479   : > { %v5536_v10 = vpack.c.bf16 %v3424_v28, %v3423_v27  ;;  %v3426_v7 = vadd.f32 %v2757_v53, %v1128_v21  ;;  %v9066_v28 = vld [vmem:[#allocation47_spill] sm:$0xff] }
 0x47a   : > { %5299 = vmatmul.mubr.msk.bf16.gmra.mrb[236].mxu0 %vm2607_vm1, %v8130_v33  ;;  %v1142_v42 = vadd.f32 %v9066_v28, %v8113_v17 }
 0x47b   : > { %4831 = vst [vmem:[%s7679_s11] sm:$0xff] %v5536_v10  ;;  %v5539_v58 = vpack.c.bf16 %v3426_v7, %v3425_v32  ;;  %3029 = vmatprep.mubr.bf16.mxu0 %v8925_v31  ;;  %v1144_v32 = vadd.f32 %v9067_v20, %v8117_v48  ;;  %v9068_v10 = vld [vmem:[#allocation50_spill] sm:$0xff] }
 0x47c   : > { %v1146_v7 = vadd.f32 %v9068_v10, %v8113_v17 }
 0x47d   : > { %4834 = vst [vmem:[%s7679_s11 + $0x18] sm:$0xff] %v5539_v58  ;;  %v2532_v13 = vpop.f32.mrb[240].mxu1  ;;  %v2761_v26 = vpop.f32.mrb[132].mxu0 }
 0x47e   : > { %v3427_v38 = vadd.f32 %v2761_v26, %v1132_v34  ;;  %v2534_v47 = vpop.f32.mrb[241].mxu1  ;;  %v2763_v19 = vpop.f32.mrb[133].mxu0 }
 0x47f   : > { %v3428_v63 = vadd.f32 %v2763_v19, %v1134_v22  ;;  %v2535_v0 = vpop.f32.mrb[242].mxu1  ;;  %v2765_v11 = vpop.f32.mrb[134].mxu0  ;;  %v1148_v22 = vadd.f32 %v9069_v40, %v8117_v48 }
 0x480   : > { %v8145_v16 = vpack.c.bf16 %v2535_v0, %v2532_v13  ;;  %v3429_v23 = vadd.f32 %v2765_v11, %v1136_v35  ;;  %v2537_v27 = vpop.f32.mrb[243].mxu1  ;;  %v2767_v55 = vpop.f32.mrb[135].mxu0  ;;  %v9070_v0 = vld [vmem:[#allocation53_spill] sm:$0xff] }
 0x481   : > { %v5542_v50 = vpack.c.bf16 %v3428_v63, %v3427_v38  ;;  %v3430_v37 = vadd.f32 %v2767_v55, %v1138_v3  ;;  %v1152_v11 = vadd.f32 %v9070_v0, %v8113_v17 }
 0x482   : > { %5300 = vmatmul.mubr.msk.bf16.gmra.mrb[240].mxu0 %vm2607_vm1, %v8145_v16 }
 0x483   : > { %4837 = vst [vmem:[%s7679_s11 + $0x30] sm:$0xff] %v5542_v50  ;;  %v5545_v21 = vpack.c.bf16 %v3430_v37, %v3429_v23  ;;  %3039 = vmatprep.mubr.bf16.mxu0 %v8925_v31  ;;  %v9071_v23 = vld [vmem:[#allocation54_spill] sm:$0xff]  ;;  %v9072_v37 = vld [vmem:[#allocation55_spill] sm:$0xff] }
 0x484   : > { %v1154_v27 = vadd.f32 %v9071_v23, %v8117_v48 }
 0x485   : > { %4840 = vst [vmem:[%s7679_s11 + $0x48] sm:$0xff] %v5545_v21  ;;  %v2540_v54 = vpop.f32.mrb[244].mxu1  ;;  %v2771_v53 = vpop.f32.mrb[136].mxu0  ;;  %v1156_v21 = vadd.f32 %v9072_v37, %v8113_v17 }
 0x486   : > { %v3431_v58 = vadd.f32 %v2771_v53, %v1142_v42  ;;  %v2542_v24 = vpop.f32.mrb[245].mxu1  ;;  %v2773_v34 = vpop.f32.mrb[137].mxu0 }
 0x487   : > { %v3432_v13 = vadd.f32 %v2773_v34, %v1144_v32  ;;  %v2543_v26 = vpop.f32.mrb[246].mxu1  ;;  %v2775_v30 = vpop.f32.mrb[138].mxu0  ;;  %v9073_v32 = vld [vmem:[#allocation56_spill] sm:$0xff] }
 0x488   : > { %v8160_v35 = vpack.c.bf16 %v2543_v26, %v2540_v54  ;;  %v3433_v38 = vadd.f32 %v2775_v30, %v1146_v7  ;;  %v2545_v47 = vpop.f32.mrb[247].mxu1  ;;  %v2777_v19 = vpop.f32.mrb[139].mxu0  ;;  %v1158_v54 = vadd.f32 %v9073_v32, %v8117_v48  ;;  %v9074_v30 = vld [vmem:[#allocation57_spill] sm:$0xff] }
 0x489   : > { %v5548_v39 = vpack.c.bf16 %v3432_v13, %v3431_v58  ;;  %v3434_v3 = vadd.f32 %v2777_v19, %v1148_v22  ;;  %v9075_v47 = vld [vmem:[#allocation58_spill] sm:$0xff] }
 0x48a   : > { %5301 = vmatmul.mubr.msk.bf16.gmra.mrb[244].mxu0 %vm2607_vm1, %v8160_v35  ;;  %v1164_v19 = vadd.f32 %v9075_v47, %v8117_v48 }
 0x48b   : > { %4843 = vst [vmem:[%s7679_s11 + $0x60] sm:$0xff] %v5548_v39  ;;  %v5551_v63 = vpack.c.bf16 %v3434_v3, %v3433_v38  ;;  %3049 = vmatprep.mubr.bf16.mxu0 %v8925_v31  ;;  %v1162_v38 = vadd.f32 %v9074_v30, %v8113_v17 }
 0x48d   : > { %4846 = vst [vmem:[%s7679_s11 + $0x78] sm:$0xff] %v5551_v63  ;;  %v2548_v55 = vpop.f32.mrb[248].mxu1  ;;  %v2781_v50 = vpop.f32.mrb[140].mxu0  ;;  %v9076_v63 = vld [vmem:[#allocation59_spill] sm:$0xff] }
 0x48e   : > { %v3435_v28 = vadd.f32 %v2781_v50, %v1152_v11  ;;  %v2550_v42 = vpop.f32.mrb[249].mxu1  ;;  %v2783_v20 = vpop.f32.mrb[141].mxu0  ;;  %v1166_v0 = vadd.f32 %v9076_v63, %v8113_v17 }
 0x48f   : > { %v3436_v53 = vadd.f32 %v2783_v20, %v1154_v27  ;;  %v2551_v10 = vpop.f32.mrb[250].mxu1  ;;  %v2785_v7 = vpop.f32.mrb[142].mxu0 }
 0x490   : > { %v8175_v58 = vpack.c.bf16 %v2551_v10, %v2548_v55  ;;  %v3437_v24 = vadd.f32 %v2785_v7, %v1156_v21  ;;  %v2553_v34 = vpop.f32.mrb[251].mxu1  ;;  %v2787_v40 = vpop.f32.mrb[143].mxu0  ;;  %v9077_v55 = vld [vmem:[#allocation60_spill] sm:$0xff] }
 0x491   : > { %v5554_v22 = vpack.c.bf16 %v3436_v53, %v3435_v28  ;;  %v3438_v13 = vadd.f32 %v2787_v40, %v1158_v54  ;;  %v1168_v50 = vadd.f32 %v9077_v55, %v8117_v48  ;;  %v9079_v40 = vld [vmem:[#allocation62_spill] sm:$0xff] }
 0x492   : > { %5302 = vmatmul.mubr.msk.bf16.gmra.mrb[248].mxu0 %vm2607_vm1, %v8175_v58 }
 0x493   : > { %4849 = vst [vmem:[%s7679_s11 + $0x90] sm:$0xff] %v5554_v22  ;;  %v5557_v26 = vpack.c.bf16 %v3438_v13, %v3437_v24  ;;  %3059 = vmatprep.mubr.bf16.mxu0 %v8925_v31  ;;  %v9078_v24 = vld [vmem:[#allocation61_spill] sm:$0xff]  ;;  %v1174_v22 = vadd.f32 %v9079_v40, %v8117_v48 }
 0x494   : > { %v1172_v34 = vadd.f32 %v9078_v24, %v8113_v17 }
 0x495   : > { %4852 = vst [vmem:[%s7679_s11 + $0xa8] sm:$0xff] %v5557_v26  ;;  %v2556_v39 = vpop.f32.mrb[252].mxu1  ;;  %v2791_v3 = vpop.f32.mrb[144].mxu0  ;;  %v9080_v26 = vld [vmem:[#allocation63_spill] sm:$0xff] }
 0x496   : > { %v3439_v11 = vadd.f32 %v2791_v3, %v1162_v38  ;;  %v2558_v23 = vpop.f32.mrb[253].mxu1  ;;  %v2793_v27 = vpop.f32.mrb[145].mxu0  ;;  %v1176_v30 = vadd.f32 %v9080_v26, %v8113_v17 }
 0x497   : > { %v3440_v37 = vadd.f32 %v2793_v27, %v1164_v19  ;;  %v2559_v21 = vpop.f32.mrb[254].mxu1  ;;  %v2795_v28 = vpop.f32.mrb[146].mxu0  ;;  %v9081_v19 = vld [vmem:[#allocation64_spill] sm:$0xff] }
 0x498   : > { %v8190_v42 = vpack.c.bf16 %v2559_v21, %v2556_v39  ;;  %v3441_v20 = vadd.f32 %v2795_v28, %v1166_v0  ;;  %v2561_v32 = vpop.f32.mrb[255].mxu1  ;;  %v2797_v54 = vpop.f32.mrb[147].mxu0  ;;  %v1178_v39 = vadd.f32 %v9081_v19, %v8117_v48  ;;  %v9083_v21 = vld [vmem:[#allocation66_spill] sm:$0xff] }
 0x499   : > { %v5560_v53 = vpack.c.bf16 %v3440_v37, %v3439_v11  ;;  %v3442_v10 = vadd.f32 %v2797_v54, %v1168_v50  ;;  %v9082_v50 = vld [vmem:[#allocation65_spill] sm:$0xff]  ;;  %v1184_v28 = vadd.f32 %v9083_v21, %v8117_v48  ;;  %v9084_v32 = vld [vmem:[#allocation67_spill] sm:$0xff]  ;;  %v9087_v19 = vld [vmem:[#allocation70_spill] sm:$0xff] }
 0x49a   : > { %5303 = vmatmul.mubr.msk.bf16.gmra.mrb[252].mxu0 %vm2607_vm1, %v8190_v42  ;;  %v1182_v37 = vadd.f32 %v9082_v50, %v8113_v17  ;;  %v1186_v54 = vadd.f32 %v9084_v32, %v8113_v17 }
 0x49b   : > { %4855 = vst [vmem:[%s7679_s11 + $0xc0] sm:$0xff] %v5560_v53  ;;  %v5563_v7 = vpack.c.bf16 %v3442_v10, %v3441_v20  ;;  %3102 = vmatprep.mubr.bf16.mxu0 %v8925_v31 }
 0x49d   : > { %4858 = vst [vmem:[%s7679_s11 + $0xd8] sm:$0xff] %v5563_v7  ;;  %v2801_v13 = vpop.f32.mrb[148].mxu0 }
 0x49e   : > { %v3443_v38 = vadd.f32 %v2801_v13, %v1172_v34  ;;  %v2803_v47 = vpop.f32.mrb[149].mxu0 }
 0x49f   : > { %v3444_v3 = vadd.f32 %v2803_v47, %v1174_v22  ;;  %v2805_v63 = vpop.f32.mrb[150].mxu0 }
 0x4a0   : > { %v3445_v0 = vadd.f32 %v2805_v63, %v1176_v30  ;;  %v2807_v11 = vpop.f32.mrb[151].mxu0  ;;  %v9088_v63 = vld [vmem:[#allocation71_spill] sm:$0xff] }
 0x4a1   : > { %v5566_v23 = vpack.c.bf16 %v3444_v3, %v3443_v38  ;;  %v3446_v27 = vadd.f32 %v2807_v11, %v1178_v39  ;;  %v9086_v38 = vld [vmem:[#allocation69_spill] sm:$0xff]  ;;  %v1194_v39 = vadd.f32 %v9087_v19, %v8117_v48 }
 0x4a2   : > { %5305 = vmatmul.mubr.msk.bf16.vlgmr.msra.gmra.mrb[0].mxu0 %vm2607_vm1, %v7971_v52  ;;  %v9085_v52 = vld [vmem:[#allocation68_spill] sm:$0xff]  ;;  %v1192_v47 = vadd.f32 %v9086_v38, %v8113_v17 }
 0x4a3   : > { %4861 = vst [vmem:[%s7679_s11 + $0xf0] sm:$0xff] %v5566_v23  ;;  %v5569_v55 = vpack.c.bf16 %v3446_v27, %v3445_v0  ;;  %3112 = vmatprep.mubr.bf16.mxu0 %v8925_v31  ;;  %v1188_v7 = vadd.f32 %v9085_v52, %v8117_v48  ;;  %v1196_v0 = vadd.f32 %v9088_v63, %v8113_v17  ;;  %v9094_v63 = vld [vmem:[#allocation77_spill] sm:$0xff] }
 0x4a5   : > { %4864 = vst [vmem:[%s7679_s11 + $0x108] sm:$0xff] %v5569_v55  ;;  %v2811_v20 = vpop.f32.mrb[152].mxu0 }
 0x4a6   : > { %v3447_v53 = vadd.f32 %v2811_v20, %v1182_v37  ;;  %v2813_v10 = vpop.f32.mrb[153].mxu0 }
 0x4a7   : > { %v3448_v24 = vadd.f32 %v2813_v10, %v1184_v28  ;;  %v2815_v34 = vpop.f32.mrb[154].mxu0  ;;  %v9091_v10 = vld [vmem:[#allocation74_spill] sm:$0xff] }
 0x4a8   : > { %v3449_v40 = vadd.f32 %v2815_v34, %v1186_v54  ;;  %v2817_v22 = vpop.f32.mrb[155].mxu0  ;;  %v9090_v54 = vld [vmem:[#allocation73_spill] sm:$0xff]  ;;  %v1204_v52 = vadd.f32 %v9091_v10, %v8117_v48 }
 0x4a9   : > { %v5572_v13 = vpack.c.bf16 %v3448_v24, %v3447_v53  ;;  %v3450_v26 = vadd.f32 %v2817_v22, %v1188_v7  ;;  %v1202_v53 = vadd.f32 %v9090_v54, %v8113_v17  ;;  %v9092_v24 = vld [vmem:[#allocation75_spill] sm:$0xff] }
 0x4aa   : > { %5306 = vmatmul.mubr.msk.bf16.gmra.mrb[4].mxu0 %vm2607_vm1, %v7979_v5  ;;  %v9089_v5 = vld [vmem:[#allocation72_spill] sm:$0xff]  ;;  %v1206_v34 = vadd.f32 %v9092_v24, %v8113_v17 }
 0x4ab   : > { %4867 = vst [vmem:[%s7679_s11 + $0x120] sm:$0xff] %v5572_v13  ;;  %v5575_v30 = vpack.c.bf16 %v3450_v26, %v3449_v40  ;;  %3122 = vmatprep.mubr.bf16.mxu0 %v8925_v31  ;;  %v1198_v27 = vadd.f32 %v9089_v5, %v8117_v48 }
 0x4ad   : > { %4870 = vst [vmem:[%s7679_s11 + $0x138] sm:$0xff] %v5575_v30  ;;  %v2821_v3 = vpop.f32.mrb[156].mxu0 }
 0x4ae   : > { %v3451_v11 = vadd.f32 %v2821_v3, %v1192_v47  ;;  %v2823_v23 = vpop.f32.mrb[157].mxu0 }
 0x4af   : > { %v3452_v55 = vadd.f32 %v2823_v23, %v1194_v39  ;;  %v2825_v50 = vpop.f32.mrb[158].mxu0 }
 0x4b0   : > { %v3453_v37 = vadd.f32 %v2825_v50, %v1196_v0  ;;  %v2827_v21 = vpop.f32.mrb[159].mxu0  ;;  %v1212_v0 = vadd.f32 %v9094_v63, %v8113_v17 }
 0x4b1   : > { %v5578_v28 = vpack.c.bf16 %v3452_v55, %v3451_v11  ;;  %v3454_v20 = vadd.f32 %v2827_v21, %v1198_v27  ;;  %v9095_v11 = vld [vmem:[#allocation78_spill] sm:$0xff]  ;;  %v9096_v27 = vld [vmem:[#allocation79_spill] sm:$0xff] }
 0x4b2   : > { %5307 = vmatmul.mubr.msk.bf16.gmra.mrb[8].mxu0 %vm2607_vm1, %v7986_v9  ;;  %v9093_v9 = vld [vmem:[#allocation76_spill] sm:$0xff]  ;;  %v1214_v23 = vadd.f32 %v9095_v11, %v8117_v48  ;;  %v1216_v55 = vadd.f32 %v9096_v27, %v8113_v17  ;;  %v9103_v27 = vld [vmem:[#allocation86_spill] sm:$0xff] }
 0x4b3   : > { %4873 = vst [vmem:[%s7679_s11 + $0x150] sm:$0xff] %v5578_v28  ;;  %v5581_v32 = vpack.c.bf16 %v3454_v20, %v3453_v37  ;;  %3132 = vmatprep.mubr.bf16.mxu0 %v8925_v31  ;;  %v1208_v13 = vadd.f32 %v9093_v9, %v8117_v48  ;;  %v9100_v9 = vld [vmem:[#allocation83_spill] sm:$0xff] }
 0x4b5   : > { %4876 = vst [vmem:[%s7679_s11 + $0x168] sm:$0xff] %v5581_v32  ;;  %v2831_v7 = vpop.f32.mrb[160].mxu0 }
 0x4b6   : > { %v3455_v40 = vadd.f32 %v2831_v7, %v1202_v53  ;;  %v2833_v22 = vpop.f32.mrb[161].mxu0  ;;  %v9098_v7 = vld [vmem:[#allocation81_spill] sm:$0xff] }
 0x4b7   : > { %v3456_v26 = vadd.f32 %v2833_v22, %v1204_v52  ;;  %v2835_v30 = vpop.f32.mrb[162].mxu0  ;;  %v1222_v24 = vadd.f32 %v9098_v7, %v8113_v17 }
 0x4b8   : > { %v3457_v38 = vadd.f32 %v2835_v30, %v1206_v34  ;;  %v2837_v47 = vpop.f32.mrb[163].mxu0  ;;  %v9099_v34 = vld [vmem:[#allocation82_spill] sm:$0xff] }
 0x4b9   : > { %v5584_v19 = vpack.c.bf16 %v3456_v26, %v3455_v40  ;;  %v3458_v39 = vadd.f32 %v2837_v47, %v1208_v13  ;;  %v1224_v40 = vadd.f32 %v9099_v34, %v8117_v48  ;;  %v1226_v13 = vadd.f32 %v9100_v9, %v8113_v17  ;;  %v9106_v34 = vld [vmem:[#allocation89_spill] sm:$0xff] }
 0x4ba   : > { %5308 = vmatmul.mubr.msk.bf16.gmra.mrb[12].mxu0 %vm2607_vm1, %v7993_v59  ;;  %v9097_v59 = vld [vmem:[#allocation80_spill] sm:$0xff] }
 0x4bb   : > { %4879 = vst [vmem:[%s7679_s11 + $0x180] sm:$0xff] %v5584_v19  ;;  %v5587_v3 = vpack.c.bf16 %v3458_v39, %v3457_v38  ;;  %3142 = vmatprep.mubr.bf16.mxu0 %v8925_v31  ;;  %v1218_v21 = vadd.f32 %v9097_v59, %v8117_v48 }
 0x4bd   : > { %4882 = vst [vmem:[%s7679_s11 + $0x198] sm:$0xff] %v5587_v3  ;;  %v2841_v5 = vpop.f32.mrb[164].mxu0 }
 0x4be   : > { %v3459_v50 = vadd.f32 %v2841_v5, %v1212_v0  ;;  %v2843_v37 = vpop.f32.mrb[165].mxu0 }
 0x4bf   : > { %v3460_v28 = vadd.f32 %v2843_v37, %v1214_v23  ;;  %v2845_v20 = vpop.f32.mrb[166].mxu0  ;;  %v9102_v23 = vld [vmem:[#allocation85_spill] sm:$0xff]  ;;  %v9104_v37 = vld [vmem:[#allocation87_spill] sm:$0xff] }
 0x4c0   : > { %v3461_v32 = vadd.f32 %v2845_v20, %v1216_v55  ;;  %v2847_v54 = vpop.f32.mrb[167].mxu0  ;;  %v1232_v5 = vadd.f32 %v9102_v23, %v8113_v17  ;;  %v1234_v55 = vadd.f32 %v9103_v27, %v8117_v48  ;;  %v1236_v59 = vadd.f32 %v9104_v37, %v8113_v17 }
 0x4c1   : > { %v5590_v53 = vpack.c.bf16 %v3460_v28, %v3459_v50  ;;  %v3462_v10 = vadd.f32 %v2847_v54, %v1218_v21 }
 0x4c2   : > { %5309 = vmatmul.mubr.msk.bf16.gmra.mrb[16].mxu0 %vm2607_vm1, %v8000_v41  ;;  %v9101_v41 = vld [vmem:[#allocation84_spill] sm:$0xff] }
 0x4c3   : > { %4885 = vst [vmem:[%s7679_s11 + $0x1b0] sm:$0xff] %v5590_v53  ;;  %v5593_v52 = vpack.c.bf16 %v3462_v10, %v3461_v32  ;;  %3152 = vmatprep.mubr.bf16.mxu0 %v8925_v31  ;;  %v1228_v38 = vadd.f32 %v9101_v41, %v8117_v48 }
 0x4c5   : > { %4888 = vst [vmem:[%s7679_s11 + $0x1c8] sm:$0xff] %v5593_v52  ;;  %v2851_v22 = vpop.f32.mrb[168].mxu0 }
 0x4c6   : > { %v3463_v26 = vadd.f32 %v2851_v22, %v1222_v24  ;;  %v2853_v30 = vpop.f32.mrb[169].mxu0  ;;  %v9107_v22 = vld [vmem:[#allocation90_spill] sm:$0xff] }
 0x4c7   : > { %v3464_v47 = vadd.f32 %v2853_v30, %v1224_v40  ;;  %v2855_v19 = vpop.f32.mrb[170].mxu0  ;;  %v1242_v40 = vadd.f32 %v9106_v34, %v8113_v17  ;;  %v1244_v9 = vadd.f32 %v9107_v22, %v8117_v48  ;;  %v9114_v34 = vld [vmem:[#allocation97_spill] sm:$0xff]  ;;  %v9115_v22 = vld [vmem:[#allocation98_spill] sm:$0xff] }
 0x4c8   : > { %v3465_v39 = vadd.f32 %v2855_v19, %v1226_v13  ;;  %v2857_v3 = vpop.f32.mrb[171].mxu0 }
 0x4c9   : > { %v5596_v63 = vpack.c.bf16 %v3464_v47, %v3463_v26  ;;  %v3466_v0 = vadd.f32 %v2857_v3, %v1228_v38  ;;  %v9108_v26 = vld [vmem:[#allocation91_spill] sm:$0xff] }
 0x4ca   : > { %5310 = vmatmul.mubr.msk.bf16.gmra.mrb[20].mxu0 %vm2607_vm1, %v8006_v25  ;;  %v9105_v25 = vld [vmem:[#allocation88_spill] sm:$0xff]  ;;  %v1246_v30 = vadd.f32 %v9108_v26, %v8113_v17  ;;  %v9116_v26 = vld [vmem:[#allocation99_spill] sm:$0xff] }
 0x4cb   : > { %4891 = vst [vmem:[%s7679_s11 + $0x1e0] sm:$0xff] %v5596_v63  ;;  %v5599_v11 = vpack.c.bf16 %v3466_v0, %v3465_v39  ;;  %3162 = vmatprep.mubr.bf16.mxu0 %v8925_v31  ;;  %v1238_v20 = vadd.f32 %v9105_v25, %v8117_v48 }
 0x4cd   : > { %4894 = vst [vmem:[%s7679_s11 + $0x1f8] sm:$0xff] %v5599_v11  ;;  %v2861_v50 = vpop.f32.mrb[172].mxu0 }
 0x4ce   : > { %v3467_v21 = vadd.f32 %v2861_v50, %v1232_v5  ;;  %v2863_v28 = vpop.f32.mrb[173].mxu0  ;;  %v9110_v5 = vld [vmem:[#allocation93_spill] sm:$0xff] }
 0x4cf   : > { %v3468_v32 = vadd.f32 %v2863_v28, %v1234_v55  ;;  %v2865_v54 = vpop.f32.mrb[174].mxu0  ;;  %v1252_v27 = vadd.f32 %v9110_v5, %v8113_v17  ;;  %v9111_v55 = vld [vmem:[#allocation94_spill] sm:$0xff] }
 0x4d0   : > { %v3469_v53 = vadd.f32 %v2865_v54, %v1236_v59  ;;  %v2867_v10 = vpop.f32.mrb[175].mxu0  ;;  %v1254_v50 = vadd.f32 %v9111_v55, %v8117_v48  ;;  %v9112_v59 = vld [vmem:[#allocation95_spill] sm:$0xff] }
 0x4d1   : > { %v5602_v52 = vpack.c.bf16 %v3468_v32, %v3467_v21  ;;  %v3470_v7 = vadd.f32 %v2867_v10, %v1238_v20  ;;  %v1256_v21 = vadd.f32 %v9112_v59, %v8113_v17 }
 0x4d2   : > { %5311 = vmatmul.mubr.msk.bf16.gmra.mrb[24].mxu0 %vm2607_vm1, %v8011_v2  ;;  %v9109_v2 = vld [vmem:[#allocation92_spill] sm:$0xff] }
 0x4d3   : > { %4897 = vst [vmem:[%s7679_s11 + $0x210] sm:$0xff] %v5602_v52  ;;  %v5605_v24 = vpack.c.bf16 %v3470_v7, %v3469_v53  ;;  %3172 = vmatprep.mubr.bf16.mxu0 %v8925_v31  ;;  %v1248_v47 = vadd.f32 %v9109_v2, %v8117_v48 }
 0x4d5   : > { %4900 = vst [vmem:[%s7679_s11 + $0x228] sm:$0xff] %v5605_v24  ;;  %v2871_v13 = vpop.f32.mrb[176].mxu0 }
 0x4d6   : > { %v3471_v41 = vadd.f32 %v2871_v13, %v1242_v40  ;;  %v2873_v38 = vpop.f32.mrb[177].mxu0  ;;  %v1262_v40 = vadd.f32 %v9114_v34, %v8113_v17  ;;  %v9123_v34 = vld [vmem:[#allocation106_spill] sm:$0xff] }
 0x4d7   : > { %v3472_v19 = vadd.f32 %v2873_v38, %v1244_v9  ;;  %v2875_v39 = vpop.f32.mrb[178].mxu0  ;;  %v1264_v9 = vadd.f32 %v9115_v22, %v8117_v48 }
 0x4d8   : > { %v3473_v3 = vadd.f32 %v2875_v39, %v1246_v30  ;;  %v2877_v63 = vpop.f32.mrb[179].mxu0  ;;  %v1266_v30 = vadd.f32 %v9116_v26, %v8113_v17 }
 0x4d9   : > { %v5608_v0 = vpack.c.bf16 %v3472_v19, %v3471_v41  ;;  %v3474_v11 = vadd.f32 %v2877_v63, %v1248_v47 }
 0x4da   : > { %5312 = vmatmul.mubr.msk.bf16.gmra.mrb[28].mxu0 %vm2607_vm1, %v8016_v4  ;;  %v9113_v4 = vld [vmem:[#allocation96_spill] sm:$0xff] }
 0x4db   : > { %4903 = vst [vmem:[%s7679_s11 + $0x240] sm:$0xff] %v5608_v0  ;;  %v5611_v23 = vpack.c.bf16 %v3474_v11, %v3473_v3  ;;  %3182 = vmatprep.mubr.bf16.mxu0 %v8925_v31  ;;  %v1258_v20 = vadd.f32 %v9113_v4, %v8117_v48 }
 0x4dd   : > { %4906 = vst [vmem:[%s7679_s11 + $0x258] sm:$0xff] %v5611_v23  ;;  %v2881_v37 = vpop.f32.mrb[180].mxu0  ;;  %v9118_v23 = vld [vmem:[#allocation101_spill] sm:$0xff] }
 0x4de   : > { %v3475_v28 = vadd.f32 %v2881_v37, %v1252_v27  ;;  %v2883_v25 = vpop.f32.mrb[181].mxu0  ;;  %v1272_v5 = vadd.f32 %v9118_v23, %v8113_v17  ;;  %v9119_v27 = vld [vmem:[#allocation102_spill] sm:$0xff]  ;;  %v9120_v37 = vld [vmem:[#allocation103_spill] sm:$0xff] }
 0x4df   : > { %v3476_v32 = vadd.f32 %v2883_v25, %v1254_v50  ;;  %v2885_v54 = vpop.f32.mrb[182].mxu0  ;;  %v1274_v55 = vadd.f32 %v9119_v27, %v8117_v48  ;;  %v1276_v59 = vadd.f32 %v9120_v37, %v8113_v17  ;;  %v9128_v27 = vld [vmem:[#allocation111_spill] sm:$0xff] }
 0x4e0   : > { %v3477_v53 = vadd.f32 %v2885_v54, %v1256_v21  ;;  %v2887_v10 = vpop.f32.mrb[183].mxu0 }
 0x4e1   : > { %v5614_v52 = vpack.c.bf16 %v3476_v32, %v3475_v28  ;;  %v3478_v7 = vadd.f32 %v2887_v10, %v1258_v20 }
 0x4e2   : > { %5313 = vmatmul.mubr.msk.bf16.gmra.mrb[32].mxu0 %vm2607_vm1, %v8021_v44  ;;  %v9117_v44 = vld [vmem:[#allocation100_spill] sm:$0xff] }
 0x4e3   : > { %4909 = vst [vmem:[%s7679_s11 + $0x270] sm:$0xff] %v5614_v52  ;;  %v5617_v24 = vpack.c.bf16 %v3478_v7, %v3477_v53  ;;  %3192 = vmatprep.mubr.bf16.mxu0 %v8925_v31  ;;  %v1268_v2 = vadd.f32 %v9117_v44, %v8117_v48  ;;  %v9122_v7 = vld [vmem:[#allocation105_spill] sm:$0xff] }
 0x4e5   : > { %4912 = vst [vmem:[%s7679_s11 + $0x288] sm:$0xff] %v5617_v24  ;;  %v2891_v13 = vpop.f32.mrb[184].mxu0  ;;  %v1282_v24 = vadd.f32 %v9122_v7, %v8113_v17 }
 0x4e6   : > { %v3479_v41 = vadd.f32 %v2891_v13, %v1262_v40  ;;  %v2893_v38 = vpop.f32.mrb[185].mxu0  ;;  %v1284_v40 = vadd.f32 %v9123_v34, %v8117_v48 }
 0x4e7   : > { %v3480_v47 = vadd.f32 %v2893_v38, %v1264_v9  ;;  %v2895_v19 = vpop.f32.mrb[186].mxu0  ;;  %v9124_v9 = vld [vmem:[#allocation107_spill] sm:$0xff] }
 0x4e8   : > { %v3481_v39 = vadd.f32 %v2895_v19, %v1266_v30  ;;  %v2897_v3 = vpop.f32.mrb[187].mxu0  ;;  %v1286_v13 = vadd.f32 %v9124_v9, %v8113_v17 }
 0x4e9   : > { %v5620_v63 = vpack.c.bf16 %v3480_v47, %v3479_v41  ;;  %v3482_v0 = vadd.f32 %v2897_v3, %v1268_v2 }
 0x4ea   : > { %5314 = vmatmul.mubr.msk.bf16.gmra.mrb[36].mxu0 %vm2607_vm1, %v8026_v45  ;;  %v9121_v45 = vld [vmem:[#allocation104_spill] sm:$0xff] }
 0x4eb   : > { %4915 = vst [vmem:[%s7679_s11 + $0x2a0] sm:$0xff] %v5620_v63  ;;  %v5623_v11 = vpack.c.bf16 %v3482_v0, %v3481_v39  ;;  %3202 = vmatprep.mubr.bf16.mxu0 %v8925_v31  ;;  %v1278_v25 = vadd.f32 %v9121_v45, %v8117_v48  ;;  %v9126_v63 = vld [vmem:[#allocation109_spill] sm:$0xff] }
 0x4ec   : > { %v1292_v0 = vadd.f32 %v9126_v63, %v8113_v17  ;;  %v9136_v63 = vld [vmem:[#allocation119_spill] sm:$0xff] }
 0x4ed   : > { %4918 = vst [vmem:[%s7679_s11 + $0x2b8] sm:$0xff] %v5623_v11  ;;  %v2901_v50 = vpop.f32.mrb[188].mxu0  ;;  %v9127_v11 = vld [vmem:[#allocation110_spill] sm:$0xff] }
 0x4ee   : > { %v3483_v21 = vadd.f32 %v2901_v50, %v1272_v5  ;;  %v2903_v28 = vpop.f32.mrb[189].mxu0  ;;  %v1294_v23 = vadd.f32 %v9127_v11, %v8117_v48 }
 0x4ef   : > { %v3484_v4 = vadd.f32 %v2903_v28, %v1274_v55  ;;  %v2905_v20 = vpop.f32.mrb[190].mxu0  ;;  %v1296_v55 = vadd.f32 %v9128_v27, %v8113_v17 }
 0x4f0   : > { %v3485_v32 = vadd.f32 %v2905_v20, %v1276_v59  ;;  %v2907_v54 = vpop.f32.mrb[191].mxu0 }
 0x4f1   : > { %v5626_v53 = vpack.c.bf16 %v3484_v4, %v3483_v21  ;;  %v3486_v10 = vadd.f32 %v2907_v54, %v1278_v25  ;;  %v9130_v54 = vld [vmem:[#allocation113_spill] sm:$0xff] }
 0x4f2   : > { %5315 = vmatmul.mubr.msk.bf16.gmra.mrb[40].mxu0 %vm2607_vm1, %v8031_v14  ;;  %v9125_v14 = vld [vmem:[#allocation108_spill] sm:$0xff] }
 0x4f3   : > { %4921 = vst [vmem:[%s7679_s11 + $0x2d0] sm:$0xff] %v5626_v53  ;;  %v5629_v52 = vpack.c.bf16 %v3486_v10, %v3485_v32  ;;  %3212 = vmatprep.mubr.bf16.mxu0 %v8925_v31  ;;  %v1288_v41 = vadd.f32 %v9125_v14, %v8117_v48  ;;  %v1302_v53 = vadd.f32 %v9130_v54, %v8113_v17  ;;  %v9131_v10 = vld [vmem:[#allocation114_spill] sm:$0xff] }
 0x4f5   : > { %4924 = vst [vmem:[%s7679_s11 + $0x2e8] sm:$0xff] %v5629_v52  ;;  %v2911_v22 = vpop.f32.mrb[192].mxu0  ;;  %v1304_v52 = vadd.f32 %v9131_v10, %v8117_v48 }
 0x4f6   : > { %v3487_v26 = vadd.f32 %v2911_v22, %v1282_v24  ;;  %v2913_v30 = vpop.f32.mrb[193].mxu0  ;;  %v9132_v24 = vld [vmem:[#allocation115_spill] sm:$0xff] }
 0x4f7   : > { %v3488_v38 = vadd.f32 %v2913_v30, %v1284_v40  ;;  %v2915_v44 = vpop.f32.mrb[194].mxu0  ;;  %v1306_v34 = vadd.f32 %v9132_v24, %v8113_v17 }
 0x4f8   : > { %v3489_v2 = vadd.f32 %v2915_v44, %v1286_v13  ;;  %v2917_v47 = vpop.f32.mrb[195].mxu0 }
 0x4f9   : > { %v5632_v19 = vpack.c.bf16 %v3488_v38, %v3487_v26  ;;  %v3490_v39 = vadd.f32 %v2917_v47, %v1288_v41 }
 0x4fa   : > { %5316 = vmatmul.mubr.msk.bf16.gmra.mrb[44].mxu0 %vm2607_vm1, %v8036_v56  ;;  %v9129_v56 = vld [vmem:[#allocation112_spill] sm:$0xff] }
 0x4fb   : > { %4927 = vst [vmem:[%s7679_s11 + $0x300] sm:$0xff] %v5632_v19  ;;  %v5635_v3 = vpack.c.bf16 %v3490_v39, %v3489_v2  ;;  %3222 = vmatprep.mubr.bf16.mxu0 %v8925_v31  ;;  %v1298_v59 = vadd.f32 %v9129_v56, %v8117_v48  ;;  %v9134_v2 = vld [vmem:[#allocation117_spill] sm:$0xff]  ;;  %v9135_v19 = vld [vmem:[#allocation118_spill] sm:$0xff] }
 0x4fc   : > { %v1312_v47 = vadd.f32 %v9134_v2, %v8113_v17  ;;  %v1314_v39 = vadd.f32 %v9135_v19, %v8117_v48 }
 0x4fd   : > { %4930 = vst [vmem:[%s7679_s11 + $0x318] sm:$0xff] %v5635_v3  ;;  %v2921_v5 = vpop.f32.mrb[196].mxu0 }
 0x4fe   : > { %v3491_v50 = vadd.f32 %v2921_v5, %v1292_v0  ;;  %v2923_v37 = vpop.f32.mrb[197].mxu0  ;;  %v1316_v0 = vadd.f32 %v9136_v63, %v8113_v17 }
 0x4ff   : > { %v3492_v21 = vadd.f32 %v2923_v37, %v1294_v23  ;;  %v2925_v28 = vpop.f32.mrb[198].mxu0 }
 0x500   : > { %v3493_v45 = vadd.f32 %v2925_v28, %v1296_v55  ;;  %v2927_v25 = vpop.f32.mrb[199].mxu0  ;;  %v9138_v28 = vld [vmem:[#allocation121_spill] sm:$0xff] }
 0x501   : > { %v5638_v4 = vpack.c.bf16 %v3492_v21, %v3491_v50  ;;  %v3494_v20 = vadd.f32 %v2927_v25, %v1298_v59  ;;  %v9139_v25 = vld [vmem:[#allocation122_spill] sm:$0xff] }
 0x502   : > { %5317 = vmatmul.mubr.msk.bf16.gmra.mrb[48].mxu0 %vm2607_vm1, %v8041_v6  ;;  %v9133_v6 = vld [vmem:[#allocation116_spill] sm:$0xff] }
 0x503   : > { %4933 = vst [vmem:[%s7679_s11 + $0x330] sm:$0xff] %v5638_v4  ;;  %v5641_v32 = vpack.c.bf16 %v3494_v20, %v3493_v45  ;;  %3232 = vmatprep.mubr.bf16.mxu0 %v8925_v31  ;;  %v1308_v9 = vadd.f32 %v9133_v6, %v8117_v48  ;;  %v1322_v45 = vadd.f32 %v9138_v28, %v8113_v17 }
 0x504   : > { %v1324_v4 = vadd.f32 %v9139_v25, %v8117_v48 }
 0x505   : > { %4936 = vst [vmem:[%s7679_s11 + $0x348] sm:$0xff] %v5641_v32  ;;  %v2931_v7 = vpop.f32.mrb[200].mxu0  ;;  %v9140_v32 = vld [vmem:[#allocation123_spill] sm:$0xff] }
 0x506   : > { %v3495_v40 = vadd.f32 %v2931_v7, %v1302_v53  ;;  %v2933_v22 = vpop.f32.mrb[201].mxu0  ;;  %v1326_v54 = vadd.f32 %v9140_v32, %v8113_v17 }
 0x507   : > { %v3496_v13 = vadd.f32 %v2933_v22, %v1304_v52  ;;  %v2935_v26 = vpop.f32.mrb[202].mxu0 }
 0x508   : > { %v3497_v30 = vadd.f32 %v2935_v26, %v1306_v34  ;;  %v2937_v14 = vpop.f32.mrb[203].mxu0 }
 0x509   : > { %v5644_v41 = vpack.c.bf16 %v3496_v13, %v3495_v40  ;;  %v3498_v38 = vadd.f32 %v2937_v14, %v1308_v9  ;;  %v9142_v13 = vld [vmem:[#allocation125_spill] sm:$0xff] }
 0x50a   : > { %5318 = vmatmul.mubr.msk.bf16.gmra.mrb[52].mxu0 %vm2607_vm1, %v8046_v46  ;;  %v9137_v46 = vld [vmem:[#allocation120_spill] sm:$0xff]  ;;  %v1332_v26 = vadd.f32 %v9142_v13, %v8113_v17 }
 0x50b   : > { %4939 = vst [vmem:[%s7679_s11 + $0x360] sm:$0xff] %v5644_v41  ;;  %v5647_v44 = vpack.c.bf16 %v3498_v38, %v3497_v30  ;;  %3242 = vmatprep.mubr.bf16.mxu0 %v8925_v31  ;;  %v1318_v5 = vadd.f32 %v9137_v46, %v8117_v48  ;;  %v9143_v30 = vld [vmem:[#allocation126_spill] sm:$0xff]  ;;  %v9144_v38 = vld [vmem:[#allocation127_spill] sm:$0xff] }
 0x50c   : > { %v1334_v14 = vadd.f32 %v9143_v30, %v8117_v48 }
 0x50d   : > { %4942 = vst [vmem:[%s7679_s11 + $0x378] sm:$0xff] %v5647_v44  ;;  %v2941_v3 = vpop.f32.mrb[204].mxu0  ;;  %v1336_v44 = vadd.f32 %v9144_v38, %v8113_v17 }
 0x50e   : > { %v3499_v11 = vadd.f32 %v2941_v3, %v1312_v47  ;;  %v2943_v23 = vpop.f32.mrb[205].mxu0 }
 0x50f   : > { %v3500_v27 = vadd.f32 %v2943_v23, %v1314_v39  ;;  %v2945_v55 = vpop.f32.mrb[206].mxu0 }
 0x510   : > { %v3501_v50 = vadd.f32 %v2945_v55, %v1316_v0  ;;  %v2947_v37 = vpop.f32.mrb[207].mxu0  ;;  %v9147_v55 = vld [vmem:[#allocation130_spill] sm:$0xff] }
 0x511   : > { %v5650_v56 = vpack.c.bf16 %v3500_v27, %v3499_v11  ;;  %v3502_v59 = vadd.f32 %v2947_v37, %v1318_v5  ;;  %v9146_v5 = vld [vmem:[#allocation129_spill] sm:$0xff] }
 0x512   : > { %5319 = vmatmul.mubr.msk.bf16.gmra.mrb[56].mxu0 %vm2607_vm1, %v8051_v15  ;;  %v9141_v15 = vld [vmem:[#allocation124_spill] sm:$0xff]  ;;  %v1342_v27 = vadd.f32 %v9146_v5, %v8113_v17 }
 0x513   : > { %4945 = vst [vmem:[%s7679_s11 + $0x390] sm:$0xff] %v5650_v56  ;;  %v5653_v21 = vpack.c.bf16 %v3502_v59, %v3501_v50  ;;  %3252 = vmatprep.mubr.bf16.mxu0 %v8925_v31  ;;  %v1328_v52 = vadd.f32 %v9141_v15, %v8117_v48  ;;  %v1344_v50 = vadd.f32 %v9147_v55, %v8117_v48  ;;  %v9148_v56 = vld [vmem:[#allocation131_spill] sm:$0xff]  ;;  %v9150_v15 = vld [vmem:[#allocation133_spill] sm:$0xff] }
 0x514   : > { %v1346_v59 = vadd.f32 %v9148_v56, %v8113_v17 }
 0x515   : > { %4948 = vst [vmem:[%s7679_s11 + $0x3a8] sm:$0xff] %v5653_v21  ;;  %v2951_v20 = vpop.f32.mrb[208].mxu0 }
 0x516   : > { %v3503_v53 = vadd.f32 %v2951_v20, %v1322_v45  ;;  %v2953_v10 = vpop.f32.mrb[209].mxu0 }
 0x517   : > { %v3504_v7 = vadd.f32 %v2953_v10, %v1324_v4  ;;  %v2955_v24 = vpop.f32.mrb[210].mxu0 }
 0x518   : > { %v3505_v34 = vadd.f32 %v2955_v24, %v1326_v54  ;;  %v2957_v40 = vpop.f32.mrb[211].mxu0 }
 0x519   : > { %v5656_v22 = vpack.c.bf16 %v3504_v7, %v3503_v53  ;;  %v3506_v6 = vadd.f32 %v2957_v40, %v1328_v52  ;;  %v1352_v52 = vadd.f32 %v9150_v15, %v8113_v17  ;;  %v9151_v7 = vld [vmem:[#allocation134_spill] sm:$0xff]  ;;  %v9152_v40 = vld [vmem:[#allocation135_spill] sm:$0xff] }
 0x51a   : > { %5320 = vmatmul.mubr.msk.bf16.gmra.mrb[60].mxu0 %vm2607_vm1, %v8056_v60  ;;  %v9145_v60 = vld [vmem:[#allocation128_spill] sm:$0xff]  ;;  %v1354_v24 = vadd.f32 %v9151_v7, %v8117_v48 }
 0x51b   : > { %4951 = vst [vmem:[%s7679_s11 + $0x3c0] sm:$0xff] %v5656_v22  ;;  %v5659_v9 = vpack.c.bf16 %v3506_v6, %v3505_v34  ;;  %3262 = vmatprep.mubr.bf16.mxu0 %v8925_v31  ;;  %v1338_v19 = vadd.f32 %v9145_v60, %v8117_v48  ;;  %v1356_v22 = vadd.f32 %v9152_v40, %v8113_v17 }
 0x51d   : > { %4954 = vst [vmem:[%s7679_s11 + $0x3d8] sm:$0xff] %v5659_v9  ;;  %v2961_v41 = vpop.f32.mrb[212].mxu0 }
 0x51e   : > { %v3507_v2 = vadd.f32 %v2961_v41, %v1332_v26  ;;  %v2963_v47 = vpop.f32.mrb[213].mxu0 }
 0x51f   : > { %v3508_v39 = vadd.f32 %v2963_v47, %v1334_v14  ;;  %v2965_v3 = vpop.f32.mrb[214].mxu0  ;;  %v9154_v47 = vld [vmem:[#allocation137_spill] sm:$0xff] }
 0x520   : > { %v3509_v63 = vadd.f32 %v2965_v3, %v1336_v44  ;;  %v2967_v0 = vpop.f32.mrb[215].mxu0  ;;  %v1362_v60 = vadd.f32 %v9154_v47, %v8113_v17 }
 0x521   : > { %v5662_v11 = vpack.c.bf16 %v3508_v39, %v3507_v2  ;;  %v3510_v23 = vadd.f32 %v2967_v0, %v1338_v19  ;;  %v9155_v19 = vld [vmem:[#allocation138_spill] sm:$0xff] }
 0x522   : > { %5321 = vmatmul.mubr.msk.bf16.gmra.mrb[64].mxu0 %vm2607_vm1, %v8061_v12  ;;  %v9149_v12 = vld [vmem:[#allocation132_spill] sm:$0xff]  ;;  %v1364_v39 = vadd.f32 %v9155_v19, %v8117_v48 }
 0x523   : > { %4957 = vst [vmem:[%s7679_s11 + $0x3f0] sm:$0xff] %v5662_v11  ;;  %v5665_v46 = vpack.c.bf16 %v3510_v23, %v3509_v63  ;;  %3272 = vmatprep.mubr.bf16.mxu0 %v8925_v31  ;;  %v1348_v45 = vadd.f32 %v9149_v12, %v8117_v48  ;;  %v9156_v63 = vld [vmem:[#allocation139_spill] sm:$0xff]  ;;  %v9159_v12 = vld [vmem:[#allocation142_spill] sm:$0xff] }
 0x524   : > { %v1366_v0 = vadd.f32 %v9156_v63, %v8113_v17  ;;  %v9166_v63 = vld [vmem:[#allocation149_spill] sm:$0xff] }
 0x525   : > { %4960 = vst [vmem:[%s7679_s11 + $0x408] sm:$0xff] %v5665_v46  ;;  %v2971_v37 = vpop.f32.mrb[216].mxu0 }
 0x526   : > { %v3511_v21 = vadd.f32 %v2971_v37, %v1342_v27  ;;  %v2973_v28 = vpop.f32.mrb[217].mxu0 }
 0x527   : > { %v3512_v25 = vadd.f32 %v2973_v28, %v1344_v50  ;;  %v2975_v4 = vpop.f32.mrb[218].mxu0 }
 0x528   : > { %v3513_v20 = vadd.f32 %v2975_v4, %v1346_v59  ;;  %v2977_v32 = vpop.f32.mrb[219].mxu0  ;;  %v9160_v4 = vld [vmem:[#allocation143_spill] sm:$0xff] }
 0x529   : > { %v5668_v54 = vpack.c.bf16 %v3512_v25, %v3511_v21  ;;  %v3514_v53 = vadd.f32 %v2977_v32, %v1348_v45  ;;  %v9158_v21 = vld [vmem:[#allocation141_spill] sm:$0xff]  ;;  %v1374_v45 = vadd.f32 %v9159_v12, %v8117_v48 }
 0x52a   : > { %5322 = vmatmul.mubr.msk.bf16.gmra.mrb[68].mxu0 %vm2607_vm1, %v8066_v29  ;;  %v9153_v29 = vld [vmem:[#allocation136_spill] sm:$0xff]  ;;  %v1372_v28 = vadd.f32 %v9158_v21, %v8113_v17 }
 0x52b   : > { %4963 = vst [vmem:[%s7679_s11 + $0x420] sm:$0xff] %v5668_v54  ;;  %v5671_v10 = vpack.c.bf16 %v3514_v53, %v3513_v20  ;;  %3282 = vmatprep.mubr.bf16.mxu0 %v8925_v31  ;;  %v1358_v13 = vadd.f32 %v9153_v29, %v8117_v48  ;;  %v1376_v20 = vadd.f32 %v9160_v4, %v8113_v17 }
 0x52d   : > { %4966 = vst [vmem:[%s7679_s11 + $0x438] sm:$0xff] %v5671_v10  ;;  %v2981_v34 = vpop.f32.mrb[220].mxu0 }
 0x52e   : > { %v3515_v6 = vadd.f32 %v2981_v34, %v1352_v52  ;;  %v2983_v9 = vpop.f32.mrb[221].mxu0 }
 0x52f   : > { %v3516_v26 = vadd.f32 %v2983_v9, %v1354_v24  ;;  %v2985_v30 = vpop.f32.mrb[222].mxu0  ;;  %v9163_v9 = vld [vmem:[#allocation146_spill] sm:$0xff] }
 0x530   : > { %v3517_v14 = vadd.f32 %v2985_v30, %v1356_v22  ;;  %v2987_v41 = vpop.f32.mrb[223].mxu0  ;;  %v9162_v22 = vld [vmem:[#allocation145_spill] sm:$0xff]  ;;  %v1384_v29 = vadd.f32 %v9163_v9, %v8117_v48 }
 0x531   : > { %v5674_v38 = vpack.c.bf16 %v3516_v26, %v3515_v6  ;;  %v3518_v44 = vadd.f32 %v2987_v41, %v1358_v13  ;;  %v1382_v6 = vadd.f32 %v9162_v22, %v8113_v17  ;;  %v9164_v26 = vld [vmem:[#allocation147_spill] sm:$0xff] }
 0x532   : > { %5323 = vmatmul.mubr.msk.bf16.gmra.mrb[72].mxu0 %vm2607_vm1, %v8071_v61  ;;  %v9157_v61 = vld [vmem:[#allocation140_spill] sm:$0xff]  ;;  %v1386_v30 = vadd.f32 %v9164_v26, %v8113_v17  ;;  %v9175_v26 = vld [vmem:[#allocation158_spill] sm:$0xff] }
 0x533   : > { %4969 = vst [vmem:[%s7679_s11 + $0x450] sm:$0xff] %v5674_v38  ;;  %v5677_v2 = vpack.c.bf16 %v3518_v44, %v3517_v14  ;;  %3292 = vmatprep.mubr.bf16.mxu0 %v8925_v31  ;;  %v1368_v46 = vadd.f32 %v9157_v61, %v8117_v48 }
 0x535   : > { %4972 = vst [vmem:[%s7679_s11 + $0x468] sm:$0xff] %v5677_v2  ;;  %v2991_v3 = vpop.f32.mrb[224].mxu0 }
 0x536   : > { %v3519_v11 = vadd.f32 %v2991_v3, %v1362_v60  ;;  %v2993_v23 = vpop.f32.mrb[225].mxu0 }
 0x537   : > { %v3520_v5 = vadd.f32 %v2993_v23, %v1364_v39  ;;  %v2995_v27 = vpop.f32.mrb[226].mxu0 }
 0x538   : > { %v3521_v55 = vadd.f32 %v2995_v27, %v1366_v0  ;;  %v2997_v50 = vpop.f32.mrb[227].mxu0  ;;  %v1392_v0 = vadd.f32 %v9166_v63, %v8113_v17 }
 0x539   : > { %v5680_v37 = vpack.c.bf16 %v3520_v5, %v3519_v11  ;;  %v3522_v56 = vadd.f32 %v2997_v50, %v1368_v46  ;;  %v9167_v11 = vld [vmem:[#allocation150_spill] sm:$0xff]  ;;  %v9168_v46 = vld [vmem:[#allocation151_spill] sm:$0xff] }
 0x53a   : > { %5324 = vmatmul.mubr.msk.bf16.gmra.mrb[76].mxu0 %vm2607_vm1, %v8076_v18  ;;  %v9161_v18 = vld [vmem:[#allocation144_spill] sm:$0xff]  ;;  %v1394_v23 = vadd.f32 %v9167_v11, %v8117_v48  ;;  %v1396_v5 = vadd.f32 %v9168_v46, %v8113_v17  ;;  %v9178_v11 = vld [vmem:[#allocation30_spill] sm:$0xff] }
 0x53b   : > { %4975 = vst [vmem:[%s7679_s11 + $0x480] sm:$0xff] %v5680_v37  ;;  %v5683_v59 = vpack.c.bf16 %v3522_v56, %v3521_v55  ;;  %3302 = vmatprep.mubr.bf16.mxu0 %v8925_v31  ;;  %v1378_v53 = vadd.f32 %v9161_v18, %v8117_v48  ;;  %v9172_v18 = vld [vmem:[#allocation155_spill] sm:$0xff] }
 0x53d   : > { %4978 = vst [vmem:[%s7679_s11 + $0x498] sm:$0xff] %v5683_v59  ;;  %v3001_v25 = vpop.f32.mrb[228].mxu0 }
 0x53e   : > { %v3523_v32 = vadd.f32 %v3001_v25, %v1372_v28  ;;  %v3003_v54 = vpop.f32.mrb[229].mxu0  ;;  %v9170_v25 = vld [vmem:[#allocation153_spill] sm:$0xff] }
 0x53f   : > { %v3524_v10 = vadd.f32 %v3003_v54, %v1374_v45  ;;  %v3005_v15 = vpop.f32.mrb[230].mxu0  ;;  %v1402_v4 = vadd.f32 %v9170_v25, %v8113_v17 }
 0x540   : > { %v3525_v52 = vadd.f32 %v3005_v15, %v1376_v20  ;;  %v3007_v7 = vpop.f32.mrb[231].mxu0  ;;  %v9171_v20 = vld [vmem:[#allocation154_spill] sm:$0xff] }
 0x541   : > { %v5686_v24 = vpack.c.bf16 %v3524_v10, %v3523_v32  ;;  %v3526_v34 = vadd.f32 %v3007_v7, %v1378_v53  ;;  %v1404_v32 = vadd.f32 %v9171_v20, %v8117_v48  ;;  %v1406_v53 = vadd.f32 %v9172_v18, %v8113_v17 }
 0x542   : > { %5325 = vmatmul.mubr.msk.bf16.gmra.mrb[80].mxu0 %vm2607_vm1, %v8081_v1  ;;  %v9165_v1 = vld [vmem:[#allocation148_spill] sm:$0xff] }
 0x543   : > { %4981 = vst [vmem:[%s7679_s11 + $0x4b0] sm:$0xff] %v5686_v24  ;;  %v5689_v40 = vpack.c.bf16 %v3526_v34, %v3525_v52  ;;  %3312 = vmatprep.mubr.bf16.mxu0 %v8925_v31  ;;  %v1388_v38 = vadd.f32 %v9165_v1, %v8117_v48 }
 0x545   : > { %4984 = vst [vmem:[%s7679_s11 + $0x4c8] sm:$0xff] %v5689_v40  ;;  %v3011_v13 = vpop.f32.mrb[232].mxu0 }
 0x546   : > { %v3527_v14 = vadd.f32 %v3011_v13, %v1382_v6  ;;  %v3013_v41 = vpop.f32.mrb[233].mxu0 }
 0x547   : > { %v3528_v44 = vadd.f32 %v3013_v41, %v1384_v29  ;;  %v3015_v2 = vpop.f32.mrb[234].mxu0  ;;  %v9174_v29 = vld [vmem:[#allocation157_spill] sm:$0xff]  ;;  %v9176_v41 = vld [vmem:[#allocation159_spill] sm:$0xff] }
 0x548   : > { %v3529_v47 = vadd.f32 %v3015_v2, %v1386_v30  ;;  %v3017_v60 = vpop.f32.mrb[235].mxu0  ;;  %v1412_v13 = vadd.f32 %v9174_v29, %v8113_v17  ;;  %v1414_v30 = vadd.f32 %v9175_v26, %v8117_v48  ;;  %v1416_v1 = vadd.f32 %v9176_v41, %v8113_v17 }
 0x549   : > { %v5692_v19 = vpack.c.bf16 %v3528_v44, %v3527_v14  ;;  %v3530_v39 = vadd.f32 %v3017_v60, %v1388_v38 }
 0x54a   : > { %5326 = vmatmul.mubr.msk.bf16.gmra.mrb[84].mxu0 %vm2607_vm1, %v8086_v51  ;;  %v9169_v51 = vld [vmem:[#allocation152_spill] sm:$0xff] }
 0x54b   : > { %4987 = vst [vmem:[%s7679_s11 + $0x4e0] sm:$0xff] %v5692_v19  ;;  %v5695_v3 = vpack.c.bf16 %v3530_v39, %v3529_v47  ;;  %3322 = vmatprep.mubr.bf16.mxu0 %v8925_v31  ;;  %v1398_v50 = vadd.f32 %v9169_v51, %v8117_v48 }
 0x54d   : > { %4990 = vst [vmem:[%s7679_s11 + $0x4f8] sm:$0xff] %v5695_v3  ;;  %v3021_v61 = vpop.f32.mrb[236].mxu0 }
 0x54e   : > { %v3531_v27 = vadd.f32 %v3021_v61, %v1392_v0  ;;  %v3023_v55 = vpop.f32.mrb[237].mxu0  ;;  %v9179_v61 = vld [vmem:[#allocation161_spill] sm:$0xff] }
 0x54f   : > { %v3532_v37 = vadd.f32 %v3023_v55, %v1394_v23  ;;  %v3025_v56 = vpop.f32.mrb[238].mxu0  ;;  %v1422_v23 = vadd.f32 %v9178_v11, %v8113_v17  ;;  %v1424_v46 = vadd.f32 %v9179_v61, %v8117_v48 }
 0x550   : > { %v3533_v59 = vadd.f32 %v3025_v56, %v1396_v5  ;;  %v3027_v21 = vpop.f32.mrb[239].mxu0 }
 0x551   : > { %v5698_v28 = vpack.c.bf16 %v3532_v37, %v3531_v27  ;;  %v3534_v12 = vadd.f32 %v3027_v21, %v1398_v50  ;;  %v9180_v27 = vld [vmem:[#allocation162_spill] sm:$0xff] }
 0x552   : > { %5327 = vmatmul.mubr.msk.bf16.gmra.mrb[88].mxu0 %vm2607_vm1, %v8091_v57  ;;  %v9173_v57 = vld [vmem:[#allocation156_spill] sm:$0xff]  ;;  %v1426_v55 = vadd.f32 %v9180_v27, %v8113_v17 }
 0x553   : > { %4993 = vst [vmem:[%s7679_s11 + $0x510] sm:$0xff] %v5698_v28  ;;  %v5701_v45 = vpack.c.bf16 %v3534_v12, %v3533_v59  ;;  %3332 = vmatprep.mubr.bf16.mxu0 %v8925_v31  ;;  %v1408_v52 = vadd.f32 %v9173_v57, %v8117_v48 }
 0x555   : > { %4996 = vst [vmem:[%s7679_s11 + $0x528] sm:$0xff] %v5701_v45  ;;  %v3031_v54 = vpop.f32.mrb[240].mxu0 }
 0x556   : > { %v3535_v10 = vadd.f32 %v3031_v54, %v1402_v4  ;;  %v3033_v15 = vpop.f32.mrb[241].mxu0  ;;  %v9182_v4 = vld [vmem:[#allocation32_spill] sm:$0xff] }
 0x557   : > { %v3536_v7 = vadd.f32 %v3033_v15, %v1404_v32  ;;  %v3035_v24 = vpop.f32.mrb[242].mxu0  ;;  %v1432_v20 = vadd.f32 %v9182_v4, %v8113_v17  ;;  %v9183_v32 = vld [vmem:[#allocation164_spill] sm:$0xff] }
 0x558   : > { %v3537_v34 = vadd.f32 %v3035_v24, %v1406_v53  ;;  %v3037_v40 = vpop.f32.mrb[243].mxu0  ;;  %v1434_v54 = vadd.f32 %v9183_v32, %v8117_v48  ;;  %v9184_v53 = vld [vmem:[#allocation165_spill] sm:$0xff] }
 0x559   : > { %v5704_v22 = vpack.c.bf16 %v3536_v7, %v3535_v10  ;;  %v3538_v6 = vadd.f32 %v3037_v40, %v1408_v52  ;;  %v1436_v10 = vadd.f32 %v9184_v53, %v8113_v17  ;;  %v9185_v52 = vld [vmem:[#allocation166_spill] sm:$0xff]  ;;  %v599_v40 = vsub.s32 5, %v9057_v62  ;;  %v6491_v17 = vld [vmem:[#allocation7] sm:$0x3f] }
 0x55a   : > { %5328 = vmatmul.mubr.msk.bf16.gmra.mrb[92].mxu0 %vm2607_vm1, %v8096_v49  ;;  %v9177_v49 = vld [vmem:[#allocation160_spill] sm:$0xff]  ;;  %v1438_v7 = vadd.f32 %v9185_v52, %v8117_v48 }
 0x55b   : > { %4999 = vst [vmem:[%s7679_s11 + $0x540] sm:$0xff] %v5704_v22  ;;  %v5707_v9 = vpack.c.bf16 %v3538_v6, %v3537_v34  ;;  %3342 = vmatprep.mubr.bf16.mxu0 %v8925_v31  ;;  %v1418_v2 = vadd.f32 %v9177_v49, %v8117_v48 }
 0x55d   : > { %5002 = vst [vmem:[%s7679_s11 + $0x558] sm:$0xff] %v5707_v9  ;;  %v3041_v14 = vpop.f32.mrb[244].mxu0 }
 0x55e   : > { %v3539_v38 = vadd.f32 %v3041_v14, %v1412_v13  ;;  %v3043_v44 = vpop.f32.mrb[245].mxu0 }
 0x55f   : > { %v3540_v47 = vadd.f32 %v3043_v44, %v1414_v30  ;;  %v3045_v60 = vpop.f32.mrb[246].mxu0  ;;  %v8550_v30 = vrot.slane %v6491_v17, %v599_v40 }
 0x560   : > { %v3541_v19 = vadd.f32 %v3045_v60, %v1416_v1  ;;  %v3047_v39 = vpop.f32.mrb[247].mxu0 }
 0x561   : > { %v5710_v3 = vpack.c.bf16 %v3540_v47, %v3539_v38  ;;  %v3542_v63 = vadd.f32 %v3047_v39, %v1418_v2 }
 0x562   : > { %5329 = vmatmul.mubr.msk.bf16.gmra.mrb[96].mxu0 %vm2607_vm1, %v8101_v36  ;;  %v9181_v36 = vld [vmem:[#allocation163_spill] sm:$0xff] }
 0x563   : > { %5005 = vst [vmem:[%s7679_s11 + $0x570] sm:$0xff] %v5710_v3  ;;  %v5713_v0 = vpack.c.bf16 %v3542_v63, %v3541_v19  ;;  %3352 = vmatprep.mubr.bf16.mxu0 %v8925_v31  ;;  %v1428_v37 = vadd.f32 %v9181_v36, %v8117_v48 }
 0x565   : > { %5008 = vst [vmem:[%s7679_s11 + $0x588] sm:$0xff] %v5713_v0  ;;  %v3051_v5 = vpop.f32.mrb[248].mxu0 }
 0x566   : > { %v3543_v51 = vadd.f32 %v3051_v5, %v1422_v23  ;;  %v3053_v50 = vpop.f32.mrb[249].mxu0 }
 0x567   : > { %v3544_v56 = vadd.f32 %v3053_v50, %v1424_v46  ;;  %v3055_v59 = vpop.f32.mrb[250].mxu0 }
 0x568   : > { %v3545_v21 = vadd.f32 %v3055_v59, %v1426_v55  ;;  %v3057_v28 = vpop.f32.mrb[251].mxu0 }
 0x569   : > { %v5716_v12 = vpack.c.bf16 %v3544_v56, %v3543_v51  ;;  %v3546_v45 = vadd.f32 %v3057_v28, %v1428_v37 }
 0x56a   : > { %5330 = vmatmul.mubr.msk.bf16.gmra.mrb[100].mxu0 %vm2607_vm1, %v8106_v8  ;;  %v595_v8 = vsub.s32 4, %v9057_v62 }
 0x56b   : > { %5011 = vst [vmem:[%s7679_s11 + $0x5a0] sm:$0xff] %v5716_v12  ;;  %v5719_v25 = vpack.c.bf16 %v3546_v45, %v3545_v21  ;;  %3362 = vmatprep.mubr.bf16.mxu0 %v8925_v31 }
 0x56c   : > { %v8547_v13 = vrot.slane %v6491_v17, %v595_v8 }
 0x56d   : > { %5014 = vst [vmem:[%s7679_s11 + $0x5b8] sm:$0xff] %v5719_v25  ;;  %v3061_v18 = vpop.f32.mrb[252].mxu0 }
 0x56e   : > { %v3547_v15 = vadd.f32 %v3061_v18, %v1432_v20  ;;  %v3063_v57 = vpop.f32.mrb[253].mxu0 }
 0x56f   : > { %v3548_v24 = vadd.f32 %v3063_v57, %v1434_v54  ;;  %v3065_v34 = vpop.f32.mrb[254].mxu0 }
 0x570   : > { %v3549_v22 = vadd.f32 %v3065_v34, %v1436_v10  ;;  %v3067_v6 = vpop.f32.mrb[255].mxu0 }
 0x571   : > { %v5722_v9 = vpack.c.bf16 %v3548_v24, %v3547_v15  ;;  %v3550_v29 = vadd.f32 %v3067_v6, %v1438_v7 }
 0x572   : > { %5331 = vmatmul.mubr.msk.bf16.gmra.mrb[104].mxu0 %vm2607_vm1, %v8115_v43 }
 0x573   : > { %5017 = vst [vmem:[%s7679_s11 + $0x5d0] sm:$0xff] %v5722_v9  ;;  %v5725_v26 = vpack.c.bf16 %v3550_v29, %v3549_v22  ;;  %3372 = vmatprep.mubr.bf16.mxu0 %v8925_v31 }
 0x575   : > { %5020 = vst [vmem:[%s7679_s11 + $0x5e8] sm:$0xff] %v5725_v26  ;;  %v3104_v62 = vpop.f32.mrb[0].mxu0 }
 0x576   : > { %v5984_v48 = vadd.f32 %v3104_v62, %v8547_v13  ;;  %v3106_v14 = vpop.f32.mrb[1].mxu0 }
 0x577   : > { %v5985_v41 = vadd.f32 %v3106_v14, %v8550_v30  ;;  %v3108_v1 = vpop.f32.mrb[2].mxu0 }
 0x578   : > { %v5986_v43 = vadd.f32 %v3108_v1, %v8547_v13  ;;  %v3110_v38 = vpop.f32.mrb[3].mxu0 }
 0x579   : > { %v5538_v44 = vpack.c.bf16 %v5985_v41, %v5984_v48  ;;  %v5987_v49 = vadd.f32 %v3110_v38, %v8550_v30 }
 0x57a   : > { %5332 = vmatmul.mubr.msk.bf16.gmra.mrb[108].mxu0 %vm2607_vm1, %v8130_v33 }
 0x57b   : > { %4833 = vst [vmem:[%s7679_s11 + $0x10] sm:$0xff] %v5538_v44  ;;  %v5541_v2 = vpack.c.bf16 %v5987_v49, %v5986_v43  ;;  %3382 = vmatprep.mubr.bf16.mxu0 %v8925_v31 }
 0x57d   : > { %4836 = vst [vmem:[%s7679_s11 + $0x28] sm:$0xff] %v5541_v2  ;;  %v3114_v47 = vpop.f32.mrb[4].mxu0 }
 0x57e   : > { %v5988_v60 = vadd.f32 %v3114_v47, %v8547_v13  ;;  %v3116_v19 = vpop.f32.mrb[5].mxu0 }
 0x57f   : > { %v5989_v39 = vadd.f32 %v3116_v19, %v8550_v30  ;;  %v3118_v3 = vpop.f32.mrb[6].mxu0 }
 0x580   : > { %v5990_v63 = vadd.f32 %v3118_v3, %v8547_v13  ;;  %v3120_v0 = vpop.f32.mrb[7].mxu0 }
 0x581   : > { %v5544_v11 = vpack.c.bf16 %v5989_v39, %v5988_v60  ;;  %v5991_v23 = vadd.f32 %v3120_v0, %v8550_v30 }
 0x582   : > { %5333 = vmatmul.mubr.msk.bf16.gmra.mrb[112].mxu0 %vm2607_vm1, %v8145_v16 }
 0x583   : > { %4839 = vst [vmem:[%s7679_s11 + $0x40] sm:$0xff] %v5544_v11  ;;  %v5547_v33 = vpack.c.bf16 %v5991_v23, %v5990_v63  ;;  %3392 = vmatprep.mubr.bf16.mxu0 %v8925_v31 }
 0x585   : > { %4842 = vst [vmem:[%s7679_s11 + $0x58] sm:$0xff] %v5547_v33  ;;  %v3124_v61 = vpop.f32.mrb[8].mxu0 }
 0x586   : > { %v5992_v46 = vadd.f32 %v3124_v61, %v8547_v13  ;;  %v3126_v5 = vpop.f32.mrb[9].mxu0 }
 0x587   : > { %v5993_v27 = vadd.f32 %v3126_v5, %v8550_v30  ;;  %v3128_v55 = vpop.f32.mrb[10].mxu0 }
 0x588   : > { %v5994_v51 = vadd.f32 %v3128_v55, %v8547_v13  ;;  %v3130_v50 = vpop.f32.mrb[11].mxu0 }
 0x589   : > { %v5550_v36 = vpack.c.bf16 %v5993_v27, %v5992_v46  ;;  %v5995_v37 = vadd.f32 %v3130_v50, %v8550_v30 }
 0x58a   : > { %5334 = vmatmul.mubr.msk.bf16.gmra.mrb[116].mxu0 %vm2607_vm1, %v8160_v35 }
 0x58b   : > { %4845 = vst [vmem:[%s7679_s11 + $0x70] sm:$0xff] %v5550_v36  ;;  %v5553_v16 = vpack.c.bf16 %v5995_v37, %v5994_v51  ;;  %3402 = vmatprep.mubr.bf16.mxu0 %v8925_v31 }
 0x58d   : > { %4848 = vst [vmem:[%s7679_s11 + $0x88] sm:$0xff] %v5553_v16  ;;  %v3134_v56 = vpop.f32.mrb[12].mxu0 }
 0x58e   : > { %v5996_v59 = vadd.f32 %v3134_v56, %v8547_v13  ;;  %v3136_v21 = vpop.f32.mrb[13].mxu0 }
 0x58f   : > { %v5997_v28 = vadd.f32 %v3136_v21, %v8550_v30  ;;  %v3138_v12 = vpop.f32.mrb[14].mxu0 }
 0x590   : > { %v5998_v45 = vadd.f32 %v3138_v12, %v8547_v13  ;;  %v3140_v25 = vpop.f32.mrb[15].mxu0 }
 0x591   : > { %v5556_v4 = vpack.c.bf16 %v5997_v28, %v5996_v59  ;;  %v5999_v20 = vadd.f32 %v3140_v25, %v8550_v30 }
 0x592   : > { %5335 = vmatmul.mubr.msk.bf16.gmra.mrb[120].mxu0 %vm2607_vm1, %v8175_v58 }
 0x593   : > { %4851 = vst [vmem:[%s7679_s11 + $0xa0] sm:$0xff] %v5556_v4  ;;  %v5559_v35 = vpack.c.bf16 %v5999_v20, %v5998_v45  ;;  %3412 = vmatprep.mubr.bf16.mxu0 %v8925_v31 }
 0x595   : > { %4854 = vst [vmem:[%s7679_s11 + $0xb8] sm:$0xff] %v5559_v35  ;;  %v3144_v32 = vpop.f32.mrb[16].mxu0 }
 0x596   : > { %v6000_v54 = vadd.f32 %v3144_v32, %v8547_v13  ;;  %v3146_v18 = vpop.f32.mrb[17].mxu0 }
 0x597   : > { %v6001_v53 = vadd.f32 %v3146_v18, %v8550_v30  ;;  %v3148_v10 = vpop.f32.mrb[18].mxu0 }
 0x598   : > { %v6002_v15 = vadd.f32 %v3148_v10, %v8547_v13  ;;  %v3150_v57 = vpop.f32.mrb[19].mxu0 }
 0x599   : > { %v5562_v8 = vpack.c.bf16 %v6001_v53, %v6000_v54  ;;  %v6003_v58 = vadd.f32 %v3150_v57, %v8550_v30 }
 0x59a   : > { %5336 = vmatmul.mubr.msk.bf16.gmra.mrb[124].mxu0 %vm2607_vm1, %v8190_v42 }
 0x59b   : > { %4857 = vst [vmem:[%s7679_s11 + $0xd0] sm:$0xff] %v5562_v8  ;;  %v5565_v31 = vpack.c.bf16 %v6003_v58, %v6002_v15 }
 0x59d   : > { %4860 = vst [vmem:[%s7679_s11 + $0xe8] sm:$0xff] %v5565_v31  ;;  %v3154_v52 = vpop.f32.mrb[20].mxu0 }
 0x59e   : > { %v6004_v7 = vadd.f32 %v3154_v52, %v8547_v13  ;;  %v3156_v24 = vpop.f32.mrb[21].mxu0 }
 0x59f   : > { %v6005_v34 = vadd.f32 %v3156_v24, %v8550_v30  ;;  %v3158_v40 = vpop.f32.mrb[22].mxu0 }
 0x5a0   : > { %v6006_v22 = vadd.f32 %v3158_v40, %v8547_v13  ;;  %v3160_v6 = vpop.f32.mrb[23].mxu0 }
 0x5a1   : > { %v5568_v9 = vpack.c.bf16 %v6005_v34, %v6004_v7  ;;  %v6007_v29 = vadd.f32 %v3160_v6, %v8550_v30 }
 0x5a3   : > { %4863 = vst [vmem:[%s7679_s11 + $0x100] sm:$0xff] %v5568_v9  ;;  %v5571_v42 = vpack.c.bf16 %v6007_v29, %v6006_v22 }
 0x5a5   : > { %4866 = vst [vmem:[%s7679_s11 + $0x118] sm:$0xff] %v5571_v42  ;;  %v3164_v17 = vpop.f32.mrb[24].mxu0 }
 0x5a6   : > { %v6008_v26 = vadd.f32 %v3164_v17, %v8547_v13  ;;  %v3166_v62 = vpop.f32.mrb[25].mxu0 }
 0x5a7   : > { %v6009_v48 = vadd.f32 %v3166_v62, %v8550_v30  ;;  %v3168_v14 = vpop.f32.mrb[26].mxu0 }
 0x5a8   : > { %v6010_v41 = vadd.f32 %v3168_v14, %v8547_v13  ;;  %v3170_v1 = vpop.f32.mrb[27].mxu0 }
 0x5a9   : > { %v5574_v43 = vpack.c.bf16 %v6009_v48, %v6008_v26  ;;  %v6011_v38 = vadd.f32 %v3170_v1, %v8550_v30 }
 0x5ab   : > { %4869 = vst [vmem:[%s7679_s11 + $0x130] sm:$0xff] %v5574_v43  ;;  %v5577_v44 = vpack.c.bf16 %v6011_v38, %v6010_v41 }
 0x5ad   : > { %4872 = vst [vmem:[%s7679_s11 + $0x148] sm:$0xff] %v5577_v44  ;;  %v3174_v49 = vpop.f32.mrb[28].mxu0 }
 0x5ae   : > { %v6012_v2 = vadd.f32 %v3174_v49, %v8547_v13  ;;  %v3176_v47 = vpop.f32.mrb[29].mxu0 }
 0x5af   : > { %v6013_v60 = vadd.f32 %v3176_v47, %v8550_v30  ;;  %v3178_v19 = vpop.f32.mrb[30].mxu0 }
 0x5b0   : > { %v6014_v39 = vadd.f32 %v3178_v19, %v8547_v13  ;;  %v3180_v3 = vpop.f32.mrb[31].mxu0 }
 0x5b1   : > { %v5580_v63 = vpack.c.bf16 %v6013_v60, %v6012_v2  ;;  %v6015_v0 = vadd.f32 %v3180_v3, %v8550_v30 }
 0x5b3   : > { %4875 = vst [vmem:[%s7679_s11 + $0x160] sm:$0xff] %v5580_v63  ;;  %v5583_v11 = vpack.c.bf16 %v6015_v0, %v6014_v39 }
 0x5b5   : > { %4878 = vst [vmem:[%s7679_s11 + $0x178] sm:$0xff] %v5583_v11  ;;  %v3184_v23 = vpop.f32.mrb[32].mxu0 }
 0x5b6   : > { %v6016_v33 = vadd.f32 %v3184_v23, %v8547_v13  ;;  %v3186_v61 = vpop.f32.mrb[33].mxu0 }
 0x5b7   : > { %v6017_v46 = vadd.f32 %v3186_v61, %v8550_v30  ;;  %v3188_v5 = vpop.f32.mrb[34].mxu0 }
 0x5b8   : > { %v6018_v27 = vadd.f32 %v3188_v5, %v8547_v13  ;;  %v3190_v55 = vpop.f32.mrb[35].mxu0 }
 0x5b9   : > { %v5586_v51 = vpack.c.bf16 %v6017_v46, %v6016_v33  ;;  %v6019_v50 = vadd.f32 %v3190_v55, %v8550_v30 }
 0x5bb   : > { %4881 = vst [vmem:[%s7679_s11 + $0x190] sm:$0xff] %v5586_v51  ;;  %v5589_v36 = vpack.c.bf16 %v6019_v50, %v6018_v27 }
 0x5bd   : > { %4884 = vst [vmem:[%s7679_s11 + $0x1a8] sm:$0xff] %v5589_v36  ;;  %v3194_v37 = vpop.f32.mrb[36].mxu0 }
 0x5be   : > { %v6020_v16 = vadd.f32 %v3194_v37, %v8547_v13  ;;  %v3196_v56 = vpop.f32.mrb[37].mxu0 }
 0x5bf   : > { %v6021_v59 = vadd.f32 %v3196_v56, %v8550_v30  ;;  %v3198_v21 = vpop.f32.mrb[38].mxu0 }
 0x5c0   : > { %v6022_v28 = vadd.f32 %v3198_v21, %v8547_v13  ;;  %v3200_v12 = vpop.f32.mrb[39].mxu0 }
 0x5c1   : > { %v5592_v45 = vpack.c.bf16 %v6021_v59, %v6020_v16  ;;  %v6023_v25 = vadd.f32 %v3200_v12, %v8550_v30 }
 0x5c3   : > { %4887 = vst [vmem:[%s7679_s11 + $0x1c0] sm:$0xff] %v5592_v45  ;;  %v5595_v4 = vpack.c.bf16 %v6023_v25, %v6022_v28 }
 0x5c5   : > { %4890 = vst [vmem:[%s7679_s11 + $0x1d8] sm:$0xff] %v5595_v4  ;;  %v3204_v20 = vpop.f32.mrb[40].mxu0 }
 0x5c6   : > { %v6024_v35 = vadd.f32 %v3204_v20, %v8547_v13  ;;  %v3206_v32 = vpop.f32.mrb[41].mxu0 }
 0x5c7   : > { %v6025_v54 = vadd.f32 %v3206_v32, %v8550_v30  ;;  %v3208_v18 = vpop.f32.mrb[42].mxu0 }
 0x5c8   : > { %v6026_v53 = vadd.f32 %v3208_v18, %v8547_v13  ;;  %v3210_v10 = vpop.f32.mrb[43].mxu0 }
 0x5c9   : > { %v5598_v15 = vpack.c.bf16 %v6025_v54, %v6024_v35  ;;  %v6027_v57 = vadd.f32 %v3210_v10, %v8550_v30 }
 0x5cb   : > { %4893 = vst [vmem:[%s7679_s11 + $0x1f0] sm:$0xff] %v5598_v15  ;;  %v5601_v8 = vpack.c.bf16 %v6027_v57, %v6026_v53 }
 0x5cd   : > { %4896 = vst [vmem:[%s7679_s11 + $0x208] sm:$0xff] %v5601_v8  ;;  %v3214_v58 = vpop.f32.mrb[44].mxu0 }
 0x5ce   : > { %v6028_v31 = vadd.f32 %v3214_v58, %v8547_v13  ;;  %v3216_v52 = vpop.f32.mrb[45].mxu0 }
 0x5cf   : > { %v6029_v7 = vadd.f32 %v3216_v52, %v8550_v30  ;;  %v3218_v24 = vpop.f32.mrb[46].mxu0 }
 0x5d0   : > { %v6030_v34 = vadd.f32 %v3218_v24, %v8547_v13  ;;  %v3220_v40 = vpop.f32.mrb[47].mxu0 }
 0x5d1   : > { %v5604_v22 = vpack.c.bf16 %v6029_v7, %v6028_v31  ;;  %v6031_v6 = vadd.f32 %v3220_v40, %v8550_v30 }
 0x5d3   : > { %4899 = vst [vmem:[%s7679_s11 + $0x220] sm:$0xff] %v5604_v22  ;;  %v5607_v9 = vpack.c.bf16 %v6031_v6, %v6030_v34 }
 0x5d5   : > { %4902 = vst [vmem:[%s7679_s11 + $0x238] sm:$0xff] %v5607_v9  ;;  %v3224_v29 = vpop.f32.mrb[48].mxu0 }
 0x5d6   : > { %v6032_v42 = vadd.f32 %v3224_v29, %v8547_v13  ;;  %v3226_v17 = vpop.f32.mrb[49].mxu0 }
 0x5d7   : > { %v6033_v26 = vadd.f32 %v3226_v17, %v8550_v30  ;;  %v3228_v62 = vpop.f32.mrb[50].mxu0 }
 0x5d8   : > { %v6034_v48 = vadd.f32 %v3228_v62, %v8547_v13  ;;  %v3230_v14 = vpop.f32.mrb[51].mxu0 }
 0x5d9   : > { %v5610_v41 = vpack.c.bf16 %v6033_v26, %v6032_v42  ;;  %v6035_v1 = vadd.f32 %v3230_v14, %v8550_v30 }
 0x5db   : > { %4905 = vst [vmem:[%s7679_s11 + $0x250] sm:$0xff] %v5610_v41  ;;  %v5613_v43 = vpack.c.bf16 %v6035_v1, %v6034_v48 }
 0x5dd   : > { %4908 = vst [vmem:[%s7679_s11 + $0x268] sm:$0xff] %v5613_v43  ;;  %v3234_v38 = vpop.f32.mrb[52].mxu0 }
 0x5de   : > { %v6036_v44 = vadd.f32 %v3234_v38, %v8547_v13  ;;  %v3236_v49 = vpop.f32.mrb[53].mxu0 }
 0x5df   : > { %v6037_v2 = vadd.f32 %v3236_v49, %v8550_v30  ;;  %v3238_v47 = vpop.f32.mrb[54].mxu0 }
 0x5e0   : > { %v6038_v60 = vadd.f32 %v3238_v47, %v8547_v13  ;;  %v3240_v19 = vpop.f32.mrb[55].mxu0 }
 0x5e1   : > { %v5616_v39 = vpack.c.bf16 %v6037_v2, %v6036_v44  ;;  %v6039_v3 = vadd.f32 %v3240_v19, %v8550_v30 }
 0x5e3   : > { %4911 = vst [vmem:[%s7679_s11 + $0x280] sm:$0xff] %v5616_v39  ;;  %v5619_v63 = vpack.c.bf16 %v6039_v3, %v6038_v60 }
 0x5e5   : > { %4914 = vst [vmem:[%s7679_s11 + $0x298] sm:$0xff] %v5619_v63  ;;  %v3244_v0 = vpop.f32.mrb[56].mxu0 }
 0x5e6   : > { %v6040_v11 = vadd.f32 %v3244_v0, %v8547_v13  ;;  %v3246_v23 = vpop.f32.mrb[57].mxu0 }
 0x5e7   : > { %v6041_v33 = vadd.f32 %v3246_v23, %v8550_v30  ;;  %v3248_v61 = vpop.f32.mrb[58].mxu0 }
 0x5e8   : > { %v6042_v46 = vadd.f32 %v3248_v61, %v8547_v13  ;;  %v3250_v5 = vpop.f32.mrb[59].mxu0 }
 0x5e9   : > { %v5622_v27 = vpack.c.bf16 %v6041_v33, %v6040_v11  ;;  %v6043_v55 = vadd.f32 %v3250_v5, %v8550_v30 }
 0x5eb   : > { %4917 = vst [vmem:[%s7679_s11 + $0x2b0] sm:$0xff] %v5622_v27  ;;  %v5625_v51 = vpack.c.bf16 %v6043_v55, %v6042_v46 }
 0x5ed   : > { %4920 = vst [vmem:[%s7679_s11 + $0x2c8] sm:$0xff] %v5625_v51  ;;  %v3254_v50 = vpop.f32.mrb[60].mxu0 }
 0x5ee   : > { %v6044_v36 = vadd.f32 %v3254_v50, %v8547_v13  ;;  %v3256_v37 = vpop.f32.mrb[61].mxu0 }
 0x5ef   : > { %v6045_v16 = vadd.f32 %v3256_v37, %v8550_v30  ;;  %v3258_v56 = vpop.f32.mrb[62].mxu0 }
 0x5f0   : > { %v6046_v59 = vadd.f32 %v3258_v56, %v8547_v13  ;;  %v3260_v21 = vpop.f32.mrb[63].mxu0 }
 0x5f1   : > { %v5628_v28 = vpack.c.bf16 %v6045_v16, %v6044_v36  ;;  %v6047_v12 = vadd.f32 %v3260_v21, %v8550_v30 }
 0x5f3   : > { %4923 = vst [vmem:[%s7679_s11 + $0x2e0] sm:$0xff] %v5628_v28  ;;  %v5631_v45 = vpack.c.bf16 %v6047_v12, %v6046_v59 }
 0x5f5   : > { %4926 = vst [vmem:[%s7679_s11 + $0x2f8] sm:$0xff] %v5631_v45  ;;  %v3264_v25 = vpop.f32.mrb[64].mxu0 }
 0x5f6   : > { %v6048_v4 = vadd.f32 %v3264_v25, %v8547_v13  ;;  %v3266_v20 = vpop.f32.mrb[65].mxu0 }
 0x5f7   : > { %v6049_v35 = vadd.f32 %v3266_v20, %v8550_v30  ;;  %v3268_v32 = vpop.f32.mrb[66].mxu0 }
 0x5f8   : > { %v6050_v54 = vadd.f32 %v3268_v32, %v8547_v13  ;;  %v3270_v18 = vpop.f32.mrb[67].mxu0 }
 0x5f9   : > { %v5634_v53 = vpack.c.bf16 %v6049_v35, %v6048_v4  ;;  %v6051_v10 = vadd.f32 %v3270_v18, %v8550_v30 }
 0x5fb   : > { %4929 = vst [vmem:[%s7679_s11 + $0x310] sm:$0xff] %v5634_v53  ;;  %v5637_v15 = vpack.c.bf16 %v6051_v10, %v6050_v54 }
 0x5fd   : > { %4932 = vst [vmem:[%s7679_s11 + $0x328] sm:$0xff] %v5637_v15  ;;  %v3274_v57 = vpop.f32.mrb[68].mxu0 }
 0x5fe   : > { %v6052_v8 = vadd.f32 %v3274_v57, %v8547_v13  ;;  %v3276_v58 = vpop.f32.mrb[69].mxu0 }
 0x5ff   : > { %v6053_v31 = vadd.f32 %v3276_v58, %v8550_v30  ;;  %v3278_v52 = vpop.f32.mrb[70].mxu0 }
 0x600   : > { %v6054_v7 = vadd.f32 %v3278_v52, %v8547_v13  ;;  %v3280_v24 = vpop.f32.mrb[71].mxu0 }
 0x601   : > { %v5640_v34 = vpack.c.bf16 %v6053_v31, %v6052_v8  ;;  %v6055_v40 = vadd.f32 %v3280_v24, %v8550_v30 }
 0x603   : > { %4935 = vst [vmem:[%s7679_s11 + $0x340] sm:$0xff] %v5640_v34  ;;  %v5643_v22 = vpack.c.bf16 %v6055_v40, %v6054_v7 }
 0x605   : > { %4938 = vst [vmem:[%s7679_s11 + $0x358] sm:$0xff] %v5643_v22  ;;  %v3284_v6 = vpop.f32.mrb[72].mxu0 }
 0x606   : > { %v6056_v9 = vadd.f32 %v3284_v6, %v8547_v13  ;;  %v3286_v29 = vpop.f32.mrb[73].mxu0 }
 0x607   : > { %v6057_v42 = vadd.f32 %v3286_v29, %v8550_v30  ;;  %v3288_v17 = vpop.f32.mrb[74].mxu0 }
 0x608   : > { %v6058_v26 = vadd.f32 %v3288_v17, %v8547_v13  ;;  %v3290_v62 = vpop.f32.mrb[75].mxu0 }
 0x609   : > { %v5646_v48 = vpack.c.bf16 %v6057_v42, %v6056_v9  ;;  %v6059_v14 = vadd.f32 %v3290_v62, %v8550_v30 }
 0x60b   : > { %4941 = vst [vmem:[%s7679_s11 + $0x370] sm:$0xff] %v5646_v48  ;;  %v5649_v41 = vpack.c.bf16 %v6059_v14, %v6058_v26 }
 0x60d   : > { %4944 = vst [vmem:[%s7679_s11 + $0x388] sm:$0xff] %v5649_v41  ;;  %v3294_v1 = vpop.f32.mrb[76].mxu0 }
 0x60e   : > { %v6060_v43 = vadd.f32 %v3294_v1, %v8547_v13  ;;  %v3296_v38 = vpop.f32.mrb[77].mxu0 }
 0x60f   : > { %v6061_v44 = vadd.f32 %v3296_v38, %v8550_v30  ;;  %v3298_v49 = vpop.f32.mrb[78].mxu0 }
 0x610   : > { %v6062_v2 = vadd.f32 %v3298_v49, %v8547_v13  ;;  %v3300_v47 = vpop.f32.mrb[79].mxu0 }
 0x611   : > { %v5652_v60 = vpack.c.bf16 %v6061_v44, %v6060_v43  ;;  %v6063_v19 = vadd.f32 %v3300_v47, %v8550_v30 }
 0x613   : > { %4947 = vst [vmem:[%s7679_s11 + $0x3a0] sm:$0xff] %v5652_v60  ;;  %v5655_v39 = vpack.c.bf16 %v6063_v19, %v6062_v2 }
 0x615   : > { %4950 = vst [vmem:[%s7679_s11 + $0x3b8] sm:$0xff] %v5655_v39  ;;  %v3304_v3 = vpop.f32.mrb[80].mxu0 }
 0x616   : > { %v6064_v63 = vadd.f32 %v3304_v3, %v8547_v13  ;;  %v3306_v0 = vpop.f32.mrb[81].mxu0 }
 0x617   : > { %v6065_v11 = vadd.f32 %v3306_v0, %v8550_v30  ;;  %v3308_v23 = vpop.f32.mrb[82].mxu0 }
 0x618   : > { %v6066_v33 = vadd.f32 %v3308_v23, %v8547_v13  ;;  %v3310_v61 = vpop.f32.mrb[83].mxu0 }
 0x619   : > { %v5658_v46 = vpack.c.bf16 %v6065_v11, %v6064_v63  ;;  %v6067_v5 = vadd.f32 %v3310_v61, %v8550_v30 }
 0x61b   : > { %4953 = vst [vmem:[%s7679_s11 + $0x3d0] sm:$0xff] %v5658_v46  ;;  %v5661_v27 = vpack.c.bf16 %v6067_v5, %v6066_v33 }
 0x61d   : > { %4956 = vst [vmem:[%s7679_s11 + $0x3e8] sm:$0xff] %v5661_v27  ;;  %v3314_v55 = vpop.f32.mrb[84].mxu0 }
 0x61e   : > { %v6068_v51 = vadd.f32 %v3314_v55, %v8547_v13  ;;  %v3316_v50 = vpop.f32.mrb[85].mxu0 }
 0x61f   : > { %v6069_v36 = vadd.f32 %v3316_v50, %v8550_v30  ;;  %v3318_v37 = vpop.f32.mrb[86].mxu0 }
 0x620   : > { %v6070_v16 = vadd.f32 %v3318_v37, %v8547_v13  ;;  %v3320_v56 = vpop.f32.mrb[87].mxu0 }
 0x621   : > { %v5664_v59 = vpack.c.bf16 %v6069_v36, %v6068_v51  ;;  %v6071_v21 = vadd.f32 %v3320_v56, %v8550_v30 }
 0x623   : > { %4959 = vst [vmem:[%s7679_s11 + $0x400] sm:$0xff] %v5664_v59  ;;  %v5667_v28 = vpack.c.bf16 %v6071_v21, %v6070_v16 }
 0x625   : > { %4962 = vst [vmem:[%s7679_s11 + $0x418] sm:$0xff] %v5667_v28  ;;  %v3324_v12 = vpop.f32.mrb[88].mxu0 }
 0x626   : > { %v6072_v45 = vadd.f32 %v3324_v12, %v8547_v13  ;;  %v3326_v25 = vpop.f32.mrb[89].mxu0 }
 0x627   : > { %v6073_v4 = vadd.f32 %v3326_v25, %v8550_v30  ;;  %v3328_v20 = vpop.f32.mrb[90].mxu0 }
 0x628   : > { %v6074_v35 = vadd.f32 %v3328_v20, %v8547_v13  ;;  %v3330_v32 = vpop.f32.mrb[91].mxu0 }
 0x629   : > { %v5670_v54 = vpack.c.bf16 %v6073_v4, %v6072_v45  ;;  %v6075_v18 = vadd.f32 %v3330_v32, %v8550_v30 }
 0x62b   : > { %4965 = vst [vmem:[%s7679_s11 + $0x430] sm:$0xff] %v5670_v54  ;;  %v5673_v53 = vpack.c.bf16 %v6075_v18, %v6074_v35 }
 0x62d   : > { %4968 = vst [vmem:[%s7679_s11 + $0x448] sm:$0xff] %v5673_v53  ;;  %v3334_v10 = vpop.f32.mrb[92].mxu0 }
 0x62e   : > { %v6076_v15 = vadd.f32 %v3334_v10, %v8547_v13  ;;  %v3336_v57 = vpop.f32.mrb[93].mxu0 }
 0x62f   : > { %v6077_v8 = vadd.f32 %v3336_v57, %v8550_v30  ;;  %v3338_v58 = vpop.f32.mrb[94].mxu0 }
 0x630   : > { %v6078_v31 = vadd.f32 %v3338_v58, %v8547_v13  ;;  %v3340_v52 = vpop.f32.mrb[95].mxu0 }
 0x631   : > { %v5676_v7 = vpack.c.bf16 %v6077_v8, %v6076_v15  ;;  %v6079_v24 = vadd.f32 %v3340_v52, %v8550_v30 }
 0x633   : > { %4971 = vst [vmem:[%s7679_s11 + $0x460] sm:$0xff] %v5676_v7  ;;  %v5679_v34 = vpack.c.bf16 %v6079_v24, %v6078_v31 }
 0x635   : > { %4974 = vst [vmem:[%s7679_s11 + $0x478] sm:$0xff] %v5679_v34  ;;  %v3344_v40 = vpop.f32.mrb[96].mxu0 }
 0x636   : > { %v6080_v22 = vadd.f32 %v3344_v40, %v8547_v13  ;;  %v3346_v6 = vpop.f32.mrb[97].mxu0 }
 0x637   : > { %v6081_v9 = vadd.f32 %v3346_v6, %v8550_v30  ;;  %v3348_v29 = vpop.f32.mrb[98].mxu0 }
 0x638   : > { %v6082_v42 = vadd.f32 %v3348_v29, %v8547_v13  ;;  %v3350_v17 = vpop.f32.mrb[99].mxu0 }
 0x639   : > { %v5682_v26 = vpack.c.bf16 %v6081_v9, %v6080_v22  ;;  %v6083_v62 = vadd.f32 %v3350_v17, %v8550_v30 }
 0x63b   : > { %4977 = vst [vmem:[%s7679_s11 + $0x490] sm:$0xff] %v5682_v26  ;;  %v5685_v48 = vpack.c.bf16 %v6083_v62, %v6082_v42 }
 0x63d   : > { %4980 = vst [vmem:[%s7679_s11 + $0x4a8] sm:$0xff] %v5685_v48  ;;  %v3354_v14 = vpop.f32.mrb[100].mxu0 }
 0x63e   : > { %v6084_v41 = vadd.f32 %v3354_v14, %v8547_v13  ;;  %v3356_v1 = vpop.f32.mrb[101].mxu0 }
 0x63f   : > { %v6085_v43 = vadd.f32 %v3356_v1, %v8550_v30  ;;  %v3358_v38 = vpop.f32.mrb[102].mxu0 }
 0x640   : > { %v6086_v44 = vadd.f32 %v3358_v38, %v8547_v13  ;;  %v3360_v49 = vpop.f32.mrb[103].mxu0 }
 0x641   : > { %v5688_v2 = vpack.c.bf16 %v6085_v43, %v6084_v41  ;;  %v6087_v47 = vadd.f32 %v3360_v49, %v8550_v30 }
 0x643   : > { %4983 = vst [vmem:[%s7679_s11 + $0x4c0] sm:$0xff] %v5688_v2  ;;  %v5691_v60 = vpack.c.bf16 %v6087_v47, %v6086_v44 }
 0x645   : > { %4986 = vst [vmem:[%s7679_s11 + $0x4d8] sm:$0xff] %v5691_v60  ;;  %v3364_v19 = vpop.f32.mrb[104].mxu0 }
 0x646   : > { %v6088_v39 = vadd.f32 %v3364_v19, %v8547_v13  ;;  %v3366_v3 = vpop.f32.mrb[105].mxu0 }
 0x647   : > { %v6089_v63 = vadd.f32 %v3366_v3, %v8550_v30  ;;  %v3368_v0 = vpop.f32.mrb[106].mxu0 }
 0x648   : > { %v6090_v11 = vadd.f32 %v3368_v0, %v8547_v13  ;;  %v3370_v23 = vpop.f32.mrb[107].mxu0 }
 0x649   : > { %v5694_v33 = vpack.c.bf16 %v6089_v63, %v6088_v39  ;;  %v6091_v61 = vadd.f32 %v3370_v23, %v8550_v30 }
 0x64b   : > { %4989 = vst [vmem:[%s7679_s11 + $0x4f0] sm:$0xff] %v5694_v33  ;;  %v5697_v46 = vpack.c.bf16 %v6091_v61, %v6090_v11 }
 0x64d   : > { %4992 = vst [vmem:[%s7679_s11 + $0x508] sm:$0xff] %v5697_v46  ;;  %v3374_v5 = vpop.f32.mrb[108].mxu0 }
 0x64e   : > { %v6092_v27 = vadd.f32 %v3374_v5, %v8547_v13  ;;  %v3376_v55 = vpop.f32.mrb[109].mxu0 }
 0x64f   : > { %v6093_v51 = vadd.f32 %v3376_v55, %v8550_v30  ;;  %v3378_v50 = vpop.f32.mrb[110].mxu0 }
 0x650   : > { %v6094_v36 = vadd.f32 %v3378_v50, %v8547_v13  ;;  %v3380_v37 = vpop.f32.mrb[111].mxu0 }
 0x651   : > { %v5700_v16 = vpack.c.bf16 %v6093_v51, %v6092_v27  ;;  %v6095_v56 = vadd.f32 %v3380_v37, %v8550_v30 }
 0x653   : > { %4995 = vst [vmem:[%s7679_s11 + $0x520] sm:$0xff] %v5700_v16  ;;  %v5703_v59 = vpack.c.bf16 %v6095_v56, %v6094_v36 }
 0x655   : > { %4998 = vst [vmem:[%s7679_s11 + $0x538] sm:$0xff] %v5703_v59  ;;  %v3384_v21 = vpop.f32.mrb[112].mxu0 }
 0x656   : > { %v6096_v28 = vadd.f32 %v3384_v21, %v8547_v13  ;;  %v3386_v12 = vpop.f32.mrb[113].mxu0 }
 0x657   : > { %v6097_v45 = vadd.f32 %v3386_v12, %v8550_v30  ;;  %v3388_v25 = vpop.f32.mrb[114].mxu0 }
 0x658   : > { %v6098_v4 = vadd.f32 %v3388_v25, %v8547_v13  ;;  %v3390_v20 = vpop.f32.mrb[115].mxu0 }
 0x659   : > { %v5706_v35 = vpack.c.bf16 %v6097_v45, %v6096_v28  ;;  %v6099_v32 = vadd.f32 %v3390_v20, %v8550_v30 }
 0x65b   : > { %5001 = vst [vmem:[%s7679_s11 + $0x550] sm:$0xff] %v5706_v35  ;;  %v5709_v54 = vpack.c.bf16 %v6099_v32, %v6098_v4 }
 0x65d   : > { %5004 = vst [vmem:[%s7679_s11 + $0x568] sm:$0xff] %v5709_v54  ;;  %v3394_v18 = vpop.f32.mrb[116].mxu0 }
 0x65e   : > { %v6100_v53 = vadd.f32 %v3394_v18, %v8547_v13  ;;  %v3396_v10 = vpop.f32.mrb[117].mxu0 }
 0x65f   : > { %v6101_v15 = vadd.f32 %v3396_v10, %v8550_v30  ;;  %v3398_v57 = vpop.f32.mrb[118].mxu0 }
 0x660   : > { %v6102_v8 = vadd.f32 %v3398_v57, %v8547_v13  ;;  %v3400_v58 = vpop.f32.mrb[119].mxu0 }
 0x661   : > { %v5712_v31 = vpack.c.bf16 %v6101_v15, %v6100_v53  ;;  %v6103_v52 = vadd.f32 %v3400_v58, %v8550_v30 }
 0x663   : > { %5007 = vst [vmem:[%s7679_s11 + $0x580] sm:$0xff] %v5712_v31  ;;  %v5715_v7 = vpack.c.bf16 %v6103_v52, %v6102_v8 }
 0x665   : > { %5010 = vst [vmem:[%s7679_s11 + $0x598] sm:$0xff] %v5715_v7  ;;  %v3404_v24 = vpop.f32.mrb[120].mxu0 }
 0x666   : > { %v6104_v34 = vadd.f32 %v3404_v24, %v8547_v13  ;;  %v3406_v40 = vpop.f32.mrb[121].mxu0 }
 0x667   : > { %v6105_v22 = vadd.f32 %v3406_v40, %v8550_v30  ;;  %v3408_v6 = vpop.f32.mrb[122].mxu0 }
 0x668   : > { %v6106_v9 = vadd.f32 %v3408_v6, %v8547_v13  ;;  %v3410_v29 = vpop.f32.mrb[123].mxu0 }
 0x669   : > { %v5718_v42 = vpack.c.bf16 %v6105_v22, %v6104_v34  ;;  %v6107_v17 = vadd.f32 %v3410_v29, %v8550_v30 }
 0x66b   : > { %5013 = vst [vmem:[%s7679_s11 + $0x5b0] sm:$0xff] %v5718_v42  ;;  %v5721_v26 = vpack.c.bf16 %v6107_v17, %v6106_v9 }
 0x66d   : > { %5016 = vst [vmem:[%s7679_s11 + $0x5c8] sm:$0xff] %v5721_v26  ;;  %v3414_v62 = vpop.f32.mrb[124].mxu0 }
 0x66e   : > { %v6108_v48 = vadd.f32 %v3414_v62, %v8547_v13  ;;  %v3416_v14 = vpop.f32.mrb[125].mxu0 }
 0x66f   : > { %v6109_v41 = vadd.f32 %v3416_v14, %v8550_v30  ;;  %v3418_v1 = vpop.f32.mrb[126].mxu0 }
 0x670   : > { %v6110_v43 = vadd.f32 %v3418_v1, %v8547_v13  ;;  %v3420_v38 = vpop.f32.mrb[127].mxu0 }
 0x671   : > { %v5724_v44 = vpack.c.bf16 %v6109_v41, %v6108_v48  ;;  %v6111_v49 = vadd.f32 %v3420_v38, %v8550_v30 }
 0x673   : > { %5019 = vst [vmem:[%s7679_s11 + $0x5e0] sm:$0xff] %v5724_v44  ;;  %v5727_v2 = vpack.c.bf16 %v6111_v49, %v6110_v43 }
 0x675   : > { %5022 = vst [vmem:[%s7679_s11 + $0x5f8] sm:$0xff] %v5727_v2 }
 0x676   : > { %6619 = shalt.err (!%p6616_p4)
}
 0x677   : > { %s6620_s27 = scalar_lea.hbm %s8763_s7, 24576  ;;  %s6624_s26 = scalar_lea.hbm %s8816_s5, 49152 }
 0x678   : > { %p6621_p9 = scmp.ne.s32.totalorder %s8763_s7, %s6620_s27  ;;  %p6625_p8 = scmp.lt.u32.totalorder %s8763_s7, %s8816_s5 }
 0x679   : > { %p6626_p13 = scmp.lt.u32.totalorder %s6624_s26, %s6620_s27  ;;  %p6628_p10 = scmp.lt.u32.totalorder %s6620_s27, %s8763_s7 }
 0x67a   : > { %p6622_p0 = pnand %p6621_p9, %p6869_p5 }
 0x67b   : > { %p6627_p6 = por %p6626_p13, %p6625_p8 }
 0x67c   : > { %p6623_p11 = pneg %p6622_p0 }
 0x67d   : > { %p6629_p3 = por %p6628_p10, %p6627_p6 }
 0x67f   : > { %p6630_p7 = pnand %p6629_p3, %p6623_p11 }
 0x681   : > { %6633 = shalt.err (!%p6630_p7)
}
 0x682   : > { %s6692_s12 = smov 384   ;;  %s6693_s23 = smov 24  }
 0x683   : > { %6256 = dma.vmem_to_hbm [thread:$0]  (%p6869_p5), %s8765_s13, 24576, %s8763_s7, %s5024_s22, %s6692_s12, %s6692_s12, %s6693_s23  }
 0x684 PF: > { %s5053_s30 = sand.u32 1, %s6668_s18   ;;  %p9186_p12 = scmp.ne.s32.totalorder %s8862_s25, 0 }
 0x685   : > { %p9187_p2 = scmp.ge.s32.totalorder %s6680_s21, 2  ;;  %s5054_s10 = scalar_lea.sflag [#allocation4], %s5053_s30 }
 0x687   : > { %p6273_p1 = pnand %p9187_p2, %p9186_p12 }
 0x689   : > { %6663 = dma.done.wait (!%p6273_p1), %s5054_s10, 24576  }
 0x68a   : > { %6665 = vsyncadd (!%p6273_p1), %s5054_s10, 4294942720  ;;  %p20_p4 = scmp.ge.s32.totalorder %s6855_s14, 4   ;;  %s9188_s18 = smov %s6672_s19 }
 0x68b   : > { %s9189_s19 = smov %s6676_s20  ;;  %s9190_s20 = smov %s6865_s28 }
 0x68c   : > { %s9191_s21 = smov %s6855_s14  ;;  %22 = sbr.rel (!%p20_p4) target bundleno = 7 (0x7), region = 97 }
 0x693   :  { %5059 = vsyncpa [#allocation3], 1 }
 0x694   :  { %5061 = vsyncpa [#allocation3 + $0x1], 1 }
 0x695   :  { %5062 = vsyncpa [#allocation6], 1 }
 0x696   :  { %5063 = vsyncpa [#allocation9], 1 }
 0x697   :  { %5064 = vsyncpa [#allocation4], 1 }
 0x698   :  { %5066 = vsyncpa [#allocation4 + $0x1], 1 }

</bundles_post_ra>
